<compile_context>
chip_gen: v5e
topology: v5e:2x2
jax: 0.10.0
libtpu: 0.0.40
codegen_flags: <defaults>
</compile_context>

<pallas_src>
import jax
import jax.numpy as jnp
from jax.experimental import pallas as pl
from jax.experimental.pallas import tpu as pltpu


# ----------------------------- Pallas kernel ------------------------------- #

def _pretrain_head_kernel(ft_ref, dww_ref, pww_ref, vecc_ref, projw_ref,
                          proto_ref, veck_ref, out_ref):
    _, N, K = out_ref.shape                       # N = TH*W
    THp, Wp, Cp = ft_ref.shape[2], ft_ref.shape[3], ft_ref.shape[4]
    TH, W = THp - 2, Wp - 2
    KM = proto_ref.shape[1]
    M = KM // K

    xp = ft_ref[0, 0]                             # (TH+2, W+2, Cp), bf16

    # ---- depthwise 3x3, stride 1 (halo pre-baked into the slab) ----
    # 3 sublane-crossing W-slices, each reused for 3 cheap leading-dim H taps.
    acc = jnp.zeros((TH, W, Cp), jnp.float32)
    for dw in range(3):
        col = xp[:, dw:dw + W, :]                 # (TH+2, W, Cp)
        for dh in range(3):
            tap = dww_ref[dh * 3 + dw:dh * 3 + dw + 1, :].reshape(1, 1, Cp)
            acc = acc + col[dh:dh + TH] * tap     # bf16*f32 -> f32 accumulate
    y = acc.reshape(N, Cp)

    # ---- pointwise 1x1 conv with folded (dw_b, pw_b, eval BatchNorm) ----
    y = jnp.dot(y.astype(jnp.bfloat16), pww_ref[...],
                preferred_element_type=jnp.float32) + vecc_ref[0:1, :]
    # ---- Dropout2d(0.1): identity at inference ----
    # ---- proj_head (1x1 conv projection) ----
    y = jnp.dot(y.astype(jnp.bfloat16), projw_ref[...],
                preferred_element_type=jnp.float32) + vecc_ref[1:2, :]
    # ---- feat_norm: LayerNorm over channels ----
    mu = jnp.mean(y, axis=-1, keepdims=True)
    var = jnp.mean(jnp.square(y - mu), axis=-1, keepdims=True)
    y = (y - mu) * jax.lax.rsqrt(var + 1e-5) * vecc_ref[2:3, :] + vecc_ref[3:4, :]
    # ---- l2_normalize per pixel ----
    c = y * jax.lax.rsqrt(jnp.maximum(jnp.sum(y * y, axis=-1, keepdims=True),
                                      1e-24))
    # ---- masks = einsum('nd,kmd->nmk') against pre-normalized prototypes ----
    masks = jnp.dot(c.astype(jnp.bfloat16), proto_ref[...],
                    preferred_element_type=jnp.float32)          # (N, K*M)
    # ---- out_seg = max over prototypes within each class ----
    # (kept as K lane-slices: safe Mosaic lowering; fine for small K)
    cols = [jnp.max(masks[:, k * M:(k + 1) * M], axis=-1, keepdims=True)
            for k in range(K)]
    scores = jnp.concatenate(cols, axis=-1)                      # (N, K)
    # ---- mask_norm: LayerNorm over classes ----
    mu = jnp.mean(scores, axis=-1, keepdims=True)
    var = jnp.mean(jnp.square(scores - mu), axis=-1, keepdims=True)
    out_ref[0] = ((scores - mu) * jax.lax.rsqrt(var + 1e-5)
                  * veck_ref[0:1, :] + veck_ref[1:2, :])


# ------------------------------ wrapper glue -------------------------------- #

def build_feats(x_list):
    """cat([x1, nearest-up(x2), nearest-up(x3), nearest-up(x4)], channels)."""
    x1, x2, x3, x4 = x_list[1], x_list[2], x_list[3], x_list[4]
    _, h, w, _ = x1.shape

    def up(x):
        fh = h // x.shape[1]
        fw = w // x.shape[2]
        return jnp.repeat(jnp.repeat(x, fh, axis=1), fw, axis=2)

    return jnp.concatenate([x1, up(x2), up(x3), up(x4)], axis=-1)


def _prepare(x_list, params):
    """Trace-time prep shared by the Pallas wrapper and the JAX reference:
    build feats, fold dw-bias/pw-bias/eval-BN into the 1x1 conv, pre-normalize
    prototypes, pad Cin to a 128 multiple, cast matmul operands to bf16."""
    feats = build_feats(x_list)                         # (B, H, W, Cin) f32
    B, H, W, Cin = feats.shape
    Cout = params["pw_w"].shape[1]
    K = params["mn_g"].shape[1]

    # Fold dw bias + pw bias + eval-mode BatchNorm into the pointwise conv.
    scale = params["bn_g"] * jax.lax.rsqrt(params["bn_v"] + 1e-5)      # (1,Cout)
    pw_w = params["pw_w"] * scale                                      # (Cin,Cout)
    pw_b = (params["dw_b"] @ params["pw_w"] + params["pw_b"]
            - params["bn_m"]) * scale + params["bn_b"]                 # (1,Cout)

    # Prototype column L2 normalization, hoisted out of the kernel.
    p = params["protos_t"]
    p = p / jnp.maximum(jnp.sqrt(jnp.sum(p * p, axis=0, keepdims=True)), 1e-12)

    # Pad Cin to a multiple of 128 (zero channels/rows are exact no-ops).
    Cp = ((Cin + 127) // 128) * 128
    pc = Cp - Cin
    feats = jnp.pad(feats, ((0, 0), (0, 0), (0, 0), (0, pc)))
    dw_w = jnp.pad(params["dw_w"], ((0, 0), (0, pc)))
    pw_w = jnp.pad(pw_w, ((0, pc), (0, 0)))

    return dict(
        feats=feats.astype(jnp.bfloat16),               # bf16 HBM feats: 1/2 DMA
        dw_w=dw_w.astype(jnp.float32),
        pw_w=pw_w.astype(jnp.bfloat16),
        proj_w=params["proj_w"].astype(jnp.bfloat16),
        protos=p.astype(jnp.bfloat16),
        vec_c=jnp.concatenate([pw_b, params["proj_b"],
                               params["ln_g"], params["ln_b"]], axis=0),  # (4,Cout)
        vec_k=jnp.concatenate([params["mn_g"], params["mn_b"]], axis=0),  # (2,K)
        dims=(B, H, W, Cp, Cout, K),
    )


def _pick_tile_h(H, W, Cp, Cout, budget_bytes=6 * 1024 * 1024):
    """Largest TH dividing H with TH*W a sublane multiple and a per-step VMEM
    footprint well inside even v7x's 64 MiB VMEM."""
    best = H
    for th in range(1, H + 1):
        if H % th:
            continue
        if (th * W) % 8 != 0 and th != H:
            continue
        need = (2 * (th + 2) * (W + 2) * Cp * 2          # double-buffered bf16 slab
                + th * W * Cp * 4                        # dw-conv f32 accumulator
                + 2 * th * W * Cout * 4)                 # f32 activations
        if need <= budget_bytes:
            best = th
    return best


def _const_spec(shape):
    rank = len(shape)

    def idx(b, t):
        return (0,) * rank

    return pl.BlockSpec(shape, idx)


def pretrain_forward(x_list, params, *, tile_h=None):
    prep = _prepare(x_list, params)
    B, H, W, Cp, Cout, K = prep["dims"]

    TH = tile_h if tile_h is not None else _pick_tile_h(H, W, Cp, Cout)
    if H % TH != 0 or ((TH * W) % 8 != 0 and TH != H):
        TH = H
    NT = H // TH

    # Haloed but non-overlapping row slabs (B, NT, TH+2, W+2, Cp) so the feats
    # BlockSpec stays rectangular and Pallas auto-pipelines the DMA.
    fp = jnp.pad(prep["feats"], ((0, 0), (1, 1), (1, 1), (0, 0)))
    slabs = jnp.stack([fp[:, t * TH:t * TH + TH + 2] for t in range(NT)], axis=1)

    args = (slabs, prep["dw_w"], prep["pw_w"], prep["vec_c"],
            prep["proj_w"], prep["protos"], prep["vec_k"])

    in_specs = [
        pl.BlockSpec((1, 1, TH + 2, W + 2, Cp), lambda b, t: (b, t, 0, 0, 0)),
        _const_spec(prep["dw_w"].shape),
        _const_spec(prep["pw_w"].shape),
        _const_spec(prep["vec_c"].shape),
        _const_spec(prep["proj_w"].shape),
        _const_spec(prep["protos"].shape),
        _const_spec(prep["vec_k"].shape),
    ]

    seg = pl.pallas_call(
        _pretrain_head_kernel,
        out_shape=jax.ShapeDtypeStruct((B, H * W, K), jnp.float32),
        grid_spec=pltpu.PrefetchScalarGridSpec(
            num_scalar_prefetch=0,
            grid=(B, NT),
            in_specs=in_specs,
            out_specs=pl.BlockSpec((1, TH * W, K), lambda b, t: (b, t, 0)),
        ),
        compiler_params=pltpu.CompilerParams(
            dimension_semantics=("parallel", "parallel"),
            vmem_limit_bytes=64 * 1024 * 1024,   # tiles sized far below this
        ),
    )(*args)

    # back to PyTorch layout: (b, k, h, w)
    return jnp.transpose(seg.reshape(B, H, W, K), (0, 3, 1, 2))


# ------------------------- pure-JAX reference ------------------------------- #

def reference_forward(x_list, params):
    """Pure-JAX reference mirroring the kernel math (same folding, same bf16
    matmul operands with f32 accumulation, same op/accumulation order)."""
    prep = _prepare(x_list, params)
    B, H, W, Cp, Cout, K = prep["dims"]
    fp = jnp.pad(prep["feats"], ((0, 0), (1, 1), (1, 1), (0, 0)))

    acc = jnp.zeros((B, H, W, Cp), jnp.float32)
    for dw in range(3):                         # same tap order as the kernel
        for dh in range(3):
            tap = prep["dw_w"][dh * 3 + dw].reshape(1, 1, 1, Cp)
            acc = acc + fp[:, dh:dh + H, dw:dw + W, :] * tap
    y = acc.reshape(B * H * W, Cp)

    y = jnp.dot(y.astype(jnp.bfloat16), prep["pw_w"],
                preferred_element_type=jnp.float32) + prep["vec_c"][0:1]
    y = jnp.dot(y.astype(jnp.bfloat16), prep["proj_w"],
                preferred_element_type=jnp.float32) + prep["vec_c"][1:2]
    mu = jnp.mean(y, -1, keepdims=True)
    var = jnp.mean(jnp.square(y - mu), -1, keepdims=True)
    y = (y - mu) * jax.lax.rsqrt(var + 1e-5) * prep["vec_c"][2:3] + prep["vec_c"][3:4]
    c = y * jax.lax.rsqrt(jnp.maximum(jnp.sum(y * y, -1, keepdims=True), 1e-24))
    masks = jnp.dot(c.astype(jnp.bfloat16), prep["protos"],
                    preferred_element_type=jnp.float32)          # (N, K*M)
    M = masks.shape[1] // K
    scores = jnp.max(masks.reshape(-1, K, M), axis=-1)
    mu = jnp.mean(scores, -1, keepdims=True)
    var = jnp.mean(jnp.square(scores - mu), -1, keepdims=True)
    seg = (scores - mu) * jax.lax.rsqrt(var + 1e-5) * prep["vec_k"][0:1] \
        + prep["vec_k"][1:2]
    return jnp.transpose(seg.reshape(B, H, W, K), (0, 3, 1, 2))


# ------------------------------- params ------------------------------------- #

def init_params(key, Cin, Cout, K, M):
    ks = jax.random.split(key, 8)
    f32 = jnp.float32
    return {
        "dw_w": jax.random.normal(ks[0], (9, Cin), f32) * 0.1,
        "dw_b": jax.random.normal(ks[1], (1, Cin), f32) * 0.01,
        "pw_w": jax.random.normal(ks[2], (Cin, Cout), f32) * (Cin ** -0.5),
        "pw_b": jax.random.normal(ks[3], (1, Cout), f32) * 0.01,
        "bn_g": jnp.ones((1, Cout), f32),
        "bn_b": jnp.zeros((1, Cout), f32),
        "bn_m": jnp.zeros((1, Cout), f32),     # PyTorch fresh running stats
        "bn_v": jnp.ones((1, Cout), f32),
        "proj_w": jax.random.normal(ks[4], (Cout, Cout), f32) * (Cout ** -0.5),
        "proj_b": jax.random.normal(ks[5], (1, Cout), f32) * 0.01,
        "ln_g": jnp.ones((1, Cout), f32),
        "ln_b": jnp.zeros((1, Cout), f32),
        # prototypes: trunc_normal_(std=0.02), (K, M, Cout) -> (Cout, K*M)
        "protos_t": jnp.transpose(
            (jax.random.truncated_normal(ks[6], -2.0, 2.0, (K * M, Cout)) * 0.02
             ).astype(f32)),
        "mn_g": jnp.ones((1, K), f32),
        "mn_b": jnp.zeros((1, K), f32),
    }


if __name__ == "__main__":
    key = jax.random.PRNGKey(0)
    B = 2
    chs = [4, 8, 16, 32, 64]        # synthetic backbone channels (scaled down)
    base = 32                       # x[0] spatial size; x[1] is 16x16
    Cin = sum(chs[1:])              # 120 -> padded to 128 inside the wrapper
    Cout = 64                       # scaled-down analogue of out_channels=512
    K, M = 2, 10                    # num_classes, num_prototype

    keys = jax.random.split(key, 6)
    # synthetic backbone outputs x[0..4] (NHWC, spatial halving each stage)
    x_list = [
        jax.random.normal(keys[i], (B, base // (2 ** i), base // (2 ** i), c),
                          jnp.float32)
        for i, c in enumerate(chs)
    ]
    params = init_params(keys[5], Cin, Cout, K, M)

    # tile_h=8 -> 2 row tiles per image (exercises the halo/row-tiling path)
    out_seg = pretrain_forward(x_list, params, tile_h=8)
    out_seg = jax.block_until_ready(out_seg)

    assert out_seg.shape == (B, K, 16, 16), out_seg.shape
    ref = reference_forward(x_list, params)
    max_err = float(jnp.max(jnp.abs(out_seg - ref)))
    if not bool(jnp.allclose(out_seg, ref, atol=1e-2, rtol=1e-2)):
        raise AssertionError(f"kernel/reference mismatch, max abs err = {max_err}")

    print("KERNEL_OK")
</pallas_src>

<mosaic_0001>
module attributes {stable_mosaic.version = 11 : i64} {
  func.func @_pretrain_head_kernel(%arg0: i32, %arg1: i32, %arg2: memref<1x1x10x18x128xbf16, #tpu.memory_space<vmem>>, %arg3: memref<9x128xf32, #tpu.memory_space<vmem>>, %arg4: memref<128x64xbf16, #tpu.memory_space<vmem>>, %arg5: memref<4x64xf32, #tpu.memory_space<vmem>>, %arg6: memref<64x64xbf16, #tpu.memory_space<vmem>>, %arg7: memref<64x20xbf16, #tpu.memory_space<vmem>>, %arg8: memref<2x2xf32, #tpu.memory_space<vmem>>, %arg9: memref<1x128x2xf32, #tpu.memory_space<vmem>>) attributes {dimension_semantics = [#tpu.dimension_semantics<parallel>, #tpu.dimension_semantics<parallel>], iteration_bounds = array<i64: 2, 2>, scalar_prefetch = 0 : i64, scratch_operands = 0 : i64, tpu.core_type = #tpu.core_type<tc>, window_params = [{transform_indices = @transform_0, window_bounds = array<i64: 1, 1, 10, 18, 128>}, {pipeline_mode = #tpu.pipeline_mode<synchronous>, transform_indices = @transform_1, window_bounds = array<i64: 9, 128>}, {pipeline_mode = #tpu.pipeline_mode<synchronous>, transform_indices = @transform_2, window_bounds = array<i64: 128, 64>}, {pipeline_mode = #tpu.pipeline_mode<synchronous>, transform_indices = @transform_3, window_bounds = array<i64: 4, 64>}, {pipeline_mode = #tpu.pipeline_mode<synchronous>, transform_indices = @transform_4, window_bounds = array<i64: 64, 64>}, {pipeline_mode = #tpu.pipeline_mode<synchronous>, transform_indices = @transform_5, window_bounds = array<i64: 64, 20>}, {pipeline_mode = #tpu.pipeline_mode<synchronous>, transform_indices = @transform_6, window_bounds = array<i64: 2, 2>}, {transform_indices = @transform_7, window_bounds = array<i64: 1, 128, 2>}]} {
    %c0 = arith.constant 0 : index
    %c0_0 = arith.constant 0 : index
    %c0_1 = arith.constant 0 : index
    %c0_2 = arith.constant 0 : index
    %c0_3 = arith.constant 0 : index
    %0 = vector.load %arg2[%c0, %c0_0, %c0_1, %c0_2, %c0_3] : memref<1x1x10x18x128xbf16, #tpu.memory_space<vmem>>, vector<1x1x10x18x128xbf16>
    %1 = vector.shape_cast %0 : vector<1x1x10x18x128xbf16> to vector<10x18x128xbf16>
    %cst = arith.constant 0.000000e+00 : f32
    %2 = vector.broadcast %cst : f32 to vector<8x16x128xf32>
    %3 = vector.extract_strided_slice %1 {offsets = [0, 0, 0], sizes = [10, 16, 128], strides = [1, 1, 1]} : vector<10x18x128xbf16> to vector<10x16x128xbf16>
    %c0_4 = arith.constant 0 : index
    %c0_5 = arith.constant 0 : index
    %4 = vector.load %arg3[%c0_4, %c0_5] : memref<9x128xf32, #tpu.memory_space<vmem>>, vector<1x128xf32>
    %5 = vector.shape_cast %4 : vector<1x128xf32> to vector<1x1x128xf32>
    %6 = vector.extract_strided_slice %3 {offsets = [0, 0, 0], sizes = [8, 16, 128], strides = [1, 1, 1]} : vector<10x16x128xbf16> to vector<8x16x128xbf16>
    %7 = arith.extf %6 : vector<8x16x128xbf16> to vector<8x16x128xf32>
    %8 = vector.broadcast %5 : vector<1x1x128xf32> to vector<8x16x128xf32>
    %9 = arith.mulf %7, %8 : vector<8x16x128xf32>
    %10 = arith.addf %2, %9 : vector<8x16x128xf32>
    %c3 = arith.constant 3 : index
    %c0_6 = arith.constant 0 : index
    %11 = vector.load %arg3[%c3, %c0_6] : memref<9x128xf32, #tpu.memory_space<vmem>>, vector<1x128xf32>
    %12 = vector.shape_cast %11 : vector<1x128xf32> to vector<1x1x128xf32>
    %13 = vector.extract_strided_slice %3 {offsets = [1, 0, 0], sizes = [8, 16, 128], strides = [1, 1, 1]} : vector<10x16x128xbf16> to vector<8x16x128xbf16>
    %14 = arith.extf %13 : vector<8x16x128xbf16> to vector<8x16x128xf32>
    %15 = vector.broadcast %12 : vector<1x1x128xf32> to vector<8x16x128xf32>
    %16 = arith.mulf %14, %15 : vector<8x16x128xf32>
    %17 = arith.addf %10, %16 : vector<8x16x128xf32>
    %c6 = arith.constant 6 : index
    %c0_7 = arith.constant 0 : index
    %18 = vector.load %arg3[%c6, %c0_7] : memref<9x128xf32, #tpu.memory_space<vmem>>, vector<1x128xf32>
    %19 = vector.shape_cast %18 : vector<1x128xf32> to vector<1x1x128xf32>
    %20 = vector.extract_strided_slice %3 {offsets = [2, 0, 0], sizes = [8, 16, 128], strides = [1, 1, 1]} : vector<10x16x128xbf16> to vector<8x16x128xbf16>
    %21 = arith.extf %20 : vector<8x16x128xbf16> to vector<8x16x128xf32>
    %22 = vector.broadcast %19 : vector<1x1x128xf32> to vector<8x16x128xf32>
    %23 = arith.mulf %21, %22 : vector<8x16x128xf32>
    %24 = arith.addf %17, %23 : vector<8x16x128xf32>
    %25 = vector.extract_strided_slice %1 {offsets = [0, 1, 0], sizes = [10, 16, 128], strides = [1, 1, 1]} : vector<10x18x128xbf16> to vector<10x16x128xbf16>
    %c1 = arith.constant 1 : index
    %c0_8 = arith.constant 0 : index
    %26 = vector.load %arg3[%c1, %c0_8] : memref<9x128xf32, #tpu.memory_space<vmem>>, vector<1x128xf32>
    %27 = vector.shape_cast %26 : vector<1x128xf32> to vector<1x1x128xf32>
    %28 = vector.extract_strided_slice %25 {offsets = [0, 0, 0], sizes = [8, 16, 128], strides = [1, 1, 1]} : vector<10x16x128xbf16> to vector<8x16x128xbf16>
    %29 = arith.extf %28 : vector<8x16x128xbf16> to vector<8x16x128xf32>
    %30 = vector.broadcast %27 : vector<1x1x128xf32> to vector<8x16x128xf32>
    %31 = arith.mulf %29, %30 : vector<8x16x128xf32>
    %32 = arith.addf %24, %31 : vector<8x16x128xf32>
    %c4 = arith.constant 4 : index
    %c0_9 = arith.constant 0 : index
    %33 = vector.load %arg3[%c4, %c0_9] : memref<9x128xf32, #tpu.memory_space<vmem>>, vector<1x128xf32>
    %34 = vector.shape_cast %33 : vector<1x128xf32> to vector<1x1x128xf32>
    %35 = vector.extract_strided_slice %25 {offsets = [1, 0, 0], sizes = [8, 16, 128], strides = [1, 1, 1]} : vector<10x16x128xbf16> to vector<8x16x128xbf16>
    %36 = arith.extf %35 : vector<8x16x128xbf16> to vector<8x16x128xf32>
    %37 = vector.broadcast %34 : vector<1x1x128xf32> to vector<8x16x128xf32>
    %38 = arith.mulf %36, %37 : vector<8x16x128xf32>
    %39 = arith.addf %32, %38 : vector<8x16x128xf32>
    %c7 = arith.constant 7 : index
    %c0_10 = arith.constant 0 : index
    %40 = vector.load %arg3[%c7, %c0_10] : memref<9x128xf32, #tpu.memory_space<vmem>>, vector<1x128xf32>
    %41 = vector.shape_cast %40 : vector<1x128xf32> to vector<1x1x128xf32>
    %42 = vector.extract_strided_slice %25 {offsets = [2, 0, 0], sizes = [8, 16, 128], strides = [1, 1, 1]} : vector<10x16x128xbf16> to vector<8x16x128xbf16>
    %43 = arith.extf %42 : vector<8x16x128xbf16> to vector<8x16x128xf32>
    %44 = vector.broadcast %41 : vector<1x1x128xf32> to vector<8x16x128xf32>
    %45 = arith.mulf %43, %44 : vector<8x16x128xf32>
    %46 = arith.addf %39, %45 : vector<8x16x128xf32>
    %47 = vector.extract_strided_slice %1 {offsets = [0, 2, 0], sizes = [10, 16, 128], strides = [1, 1, 1]} : vector<10x18x128xbf16> to vector<10x16x128xbf16>
    %c2 = arith.constant 2 : index
    %c0_11 = arith.constant 0 : index
    %48 = vector.load %arg3[%c2, %c0_11] : memref<9x128xf32, #tpu.memory_space<vmem>>, vector<1x128xf32>
    %49 = vector.shape_cast %48 : vector<1x128xf32> to vector<1x1x128xf32>
    %50 = vector.extract_strided_slice %47 {offsets = [0, 0, 0], sizes = [8, 16, 128], strides = [1, 1, 1]} : vector<10x16x128xbf16> to vector<8x16x128xbf16>
    %51 = arith.extf %50 : vector<8x16x128xbf16> to vector<8x16x128xf32>
    %52 = vector.broadcast %49 : vector<1x1x128xf32> to vector<8x16x128xf32>
    %53 = arith.mulf %51, %52 : vector<8x16x128xf32>
    %54 = arith.addf %46, %53 : vector<8x16x128xf32>
    %c5 = arith.constant 5 : index
    %c0_12 = arith.constant 0 : index
    %55 = vector.load %arg3[%c5, %c0_12] : memref<9x128xf32, #tpu.memory_space<vmem>>, vector<1x128xf32>
    %56 = vector.shape_cast %55 : vector<1x128xf32> to vector<1x1x128xf32>
    %57 = vector.extract_strided_slice %47 {offsets = [1, 0, 0], sizes = [8, 16, 128], strides = [1, 1, 1]} : vector<10x16x128xbf16> to vector<8x16x128xbf16>
    %58 = arith.extf %57 : vector<8x16x128xbf16> to vector<8x16x128xf32>
    %59 = vector.broadcast %56 : vector<1x1x128xf32> to vector<8x16x128xf32>
    %60 = arith.mulf %58, %59 : vector<8x16x128xf32>
    %61 = arith.addf %54, %60 : vector<8x16x128xf32>
    %c8 = arith.constant 8 : index
    %c0_13 = arith.constant 0 : index
    %62 = vector.load %arg3[%c8, %c0_13] : memref<9x128xf32, #tpu.memory_space<vmem>>, vector<1x128xf32>
    %63 = vector.shape_cast %62 : vector<1x128xf32> to vector<1x1x128xf32>
    %64 = vector.extract_strided_slice %47 {offsets = [2, 0, 0], sizes = [8, 16, 128], strides = [1, 1, 1]} : vector<10x16x128xbf16> to vector<8x16x128xbf16>
    %65 = arith.extf %64 : vector<8x16x128xbf16> to vector<8x16x128xf32>
    %66 = vector.broadcast %63 : vector<1x1x128xf32> to vector<8x16x128xf32>
    %67 = arith.mulf %65, %66 : vector<8x16x128xf32>
    %68 = arith.addf %61, %67 : vector<8x16x128xf32>
    %69 = vector.shape_cast %68 : vector<8x16x128xf32> to vector<128x128xf32>
    %70 = arith.truncf %69 : vector<128x128xf32> to vector<128x128xbf16>
    %c0_14 = arith.constant 0 : index
    %c0_15 = arith.constant 0 : index
    %71 = vector.load %arg4[%c0_14, %c0_15] : memref<128x64xbf16, #tpu.memory_space<vmem>>, vector<128x64xbf16>
    %cst_16 = arith.constant dense<0.000000e+00> : vector<128x64xf32>
    %72 = tpu.matmul %70, %71, %cst_16 {dimension_numbers = #tpu.dot_dimension_numbers<[1], [0], [0], [1], [0, 0, 1, 1], [], []>} : vector<128x128xbf16>, vector<128x64xbf16>, vector<128x64xf32> -> vector<128x64xf32>
    %c0_17 = arith.constant 0 : index
    %c0_18 = arith.constant 0 : index
    %73 = vector.load %arg5[%c0_17, %c0_18] : memref<4x64xf32, #tpu.memory_space<vmem>>, vector<1x64xf32>
    %74 = vector.broadcast %73 : vector<1x64xf32> to vector<128x64xf32>
    %75 = arith.addf %72, %74 : vector<128x64xf32>
    %76 = arith.truncf %75 : vector<128x64xf32> to vector<128x64xbf16>
    %c0_19 = arith.constant 0 : index
    %c0_20 = arith.constant 0 : index
    %77 = vector.load %arg6[%c0_19, %c0_20] : memref<64x64xbf16, #tpu.memory_space<vmem>>, vector<64x64xbf16>
    %cst_21 = arith.constant dense<0.000000e+00> : vector<128x64xf32>
    %78 = tpu.matmul %76, %77, %cst_21 {dimension_numbers = #tpu.dot_dimension_numbers<[1], [0], [0], [1], [0, 0, 1, 1], [], []>} : vector<128x64xbf16>, vector<64x64xbf16>, vector<128x64xf32> -> vector<128x64xf32>
    %c1_22 = arith.constant 1 : index
    %c0_23 = arith.constant 0 : index
    %79 = vector.load %arg5[%c1_22, %c0_23] : memref<4x64xf32, #tpu.memory_space<vmem>>, vector<1x64xf32>
    %80 = vector.broadcast %79 : vector<1x64xf32> to vector<128x64xf32>
    %81 = arith.addf %78, %80 : vector<128x64xf32>
    %cst_24 = arith.constant dense<0.000000e+00> : vector<128xf32>
    %82 = vector.multi_reduction <add>, %81, %cst_24 [1] : vector<128x64xf32> to vector<128xf32>
    %83 = vector.shape_cast %82 : vector<128xf32> to vector<128x1xf32>
    %cst_25 = arith.constant 6.400000e+01 : f32
    %84 = vector.broadcast %cst_25 : f32 to vector<128x1xf32>
    %85 = arith.divf %83, %84 : vector<128x1xf32>
    %86 = vector.broadcast %85 : vector<128x1xf32> to vector<128x64xf32>
    %87 = arith.subf %81, %86 : vector<128x64xf32>
    %88 = arith.mulf %87, %87 : vector<128x64xf32>
    %cst_26 = arith.constant dense<0.000000e+00> : vector<128xf32>
    %89 = vector.multi_reduction <add>, %88, %cst_26 [1] : vector<128x64xf32> to vector<128xf32>
    %90 = vector.shape_cast %89 : vector<128xf32> to vector<128x1xf32>
    %cst_27 = arith.constant 6.400000e+01 : f32
    %91 = vector.broadcast %cst_27 : f32 to vector<128x1xf32>
    %92 = arith.divf %90, %91 : vector<128x1xf32>
    %93 = vector.broadcast %85 : vector<128x1xf32> to vector<128x64xf32>
    %94 = arith.subf %81, %93 : vector<128x64xf32>
    %cst_28 = arith.constant 9.99999974E-6 : f32
    %95 = vector.broadcast %cst_28 : f32 to vector<128x1xf32>
    %96 = arith.addf %92, %95 : vector<128x1xf32>
    %97 = math.rsqrt %96 : vector<128x1xf32>
    %98 = vector.broadcast %97 : vector<128x1xf32> to vector<128x64xf32>
    %99 = arith.mulf %94, %98 : vector<128x64xf32>
    %c2_29 = arith.constant 2 : index
    %c0_30 = arith.constant 0 : index
    %100 = vector.load %arg5[%c2_29, %c0_30] : memref<4x64xf32, #tpu.memory_space<vmem>>, vector<1x64xf32>
    %101 = vector.broadcast %100 : vector<1x64xf32> to vector<128x64xf32>
    %102 = arith.mulf %99, %101 : vector<128x64xf32>
    %c3_31 = arith.constant 3 : index
    %c0_32 = arith.constant 0 : index
    %103 = vector.load %arg5[%c3_31, %c0_32] : memref<4x64xf32, #tpu.memory_space<vmem>>, vector<1x64xf32>
    %104 = vector.broadcast %103 : vector<1x64xf32> to vector<128x64xf32>
    %105 = arith.addf %102, %104 : vector<128x64xf32>
    %106 = arith.mulf %105, %105 : vector<128x64xf32>
    %cst_33 = arith.constant dense<0.000000e+00> : vector<128xf32>
    %107 = vector.multi_reduction <add>, %106, %cst_33 [1] : vector<128x64xf32> to vector<128xf32>
    %108 = vector.shape_cast %107 : vector<128xf32> to vector<128x1xf32>
    %cst_34 = arith.constant 1.000000e-24 : f32
    %109 = vector.broadcast %cst_34 : f32 to vector<128x1xf32>
    %110 = arith.maximumf %108, %109 : vector<128x1xf32>
    %111 = math.rsqrt %110 : vector<128x1xf32>
    %112 = vector.broadcast %111 : vector<128x1xf32> to vector<128x64xf32>
    %113 = arith.mulf %105, %112 : vector<128x64xf32>
    %114 = arith.truncf %113 : vector<128x64xf32> to vector<128x64xbf16>
    %c0_35 = arith.constant 0 : index
    %c0_36 = arith.constant 0 : index
    %115 = vector.load %arg7[%c0_35, %c0_36] : memref<64x20xbf16, #tpu.memory_space<vmem>>, vector<64x20xbf16>
    %cst_37 = arith.constant dense<0.000000e+00> : vector<128x20xf32>
    %116 = tpu.matmul %114, %115, %cst_37 {dimension_numbers = #tpu.dot_dimension_numbers<[1], [0], [0], [1], [0, 0, 1, 1], [], []>} : vector<128x64xbf16>, vector<64x20xbf16>, vector<128x20xf32> -> vector<128x20xf32>
    %117 = vector.extract_strided_slice %116 {offsets = [0, 0], sizes = [128, 10], strides = [1, 1]} : vector<128x20xf32> to vector<128x10xf32>
    %cst_38 = arith.constant dense<0xFF800000> : vector<128xf32>
    %118 = vector.multi_reduction <maximumf>, %117, %cst_38 [1] : vector<128x10xf32> to vector<128xf32>
    %119 = vector.shape_cast %118 : vector<128xf32> to vector<128x1xf32>
    %120 = vector.extract_strided_slice %116 {offsets = [0, 10], sizes = [128, 10], strides = [1, 1]} : vector<128x20xf32> to vector<128x10xf32>
    %cst_39 = arith.constant dense<0xFF800000> : vector<128xf32>
    %121 = vector.multi_reduction <maximumf>, %120, %cst_39 [1] : vector<128x10xf32> to vector<128xf32>
    %122 = vector.shape_cast %121 : vector<128xf32> to vector<128x1xf32>
    %123 = tpu.concatenate %119, %122 in 1 : vector<128x1xf32>, vector<128x1xf32> -> vector<128x2xf32>
    %cst_40 = arith.constant dense<0.000000e+00> : vector<128xf32>
    %124 = vector.multi_reduction <add>, %123, %cst_40 [1] : vector<128x2xf32> to vector<128xf32>
    %125 = vector.shape_cast %124 : vector<128xf32> to vector<128x1xf32>
    %cst_41 = arith.constant 2.000000e+00 : f32
    %126 = vector.broadcast %cst_41 : f32 to vector<128x1xf32>
    %127 = arith.divf %125, %126 : vector<128x1xf32>
    %128 = vector.broadcast %127 : vector<128x1xf32> to vector<128x2xf32>
    %129 = arith.subf %123, %128 : vector<128x2xf32>
    %130 = arith.mulf %129, %129 : vector<128x2xf32>
    %cst_42 = arith.constant dense<0.000000e+00> : vector<128xf32>
    %131 = vector.multi_reduction <add>, %130, %cst_42 [1] : vector<128x2xf32> to vector<128xf32>
    %132 = vector.shape_cast %131 : vector<128xf32> to vector<128x1xf32>
    %cst_43 = arith.constant 2.000000e+00 : f32
    %133 = vector.broadcast %cst_43 : f32 to vector<128x1xf32>
    %134 = arith.divf %132, %133 : vector<128x1xf32>
    %135 = vector.broadcast %127 : vector<128x1xf32> to vector<128x2xf32>
    %136 = arith.subf %123, %135 : vector<128x2xf32>
    %cst_44 = arith.constant 9.99999974E-6 : f32
    %137 = vector.broadcast %cst_44 : f32 to vector<128x1xf32>
    %138 = arith.addf %134, %137 : vector<128x1xf32>
    %139 = math.rsqrt %138 : vector<128x1xf32>
    %140 = vector.broadcast %139 : vector<128x1xf32> to vector<128x2xf32>
    %141 = arith.mulf %136, %140 : vector<128x2xf32>
    %c0_45 = arith.constant 0 : index
    %c0_46 = arith.constant 0 : index
    %142 = vector.load %arg8[%c0_45, %c0_46] : memref<2x2xf32, #tpu.memory_space<vmem>>, vector<1x2xf32>
    %143 = vector.broadcast %142 : vector<1x2xf32> to vector<128x2xf32>
    %144 = arith.mulf %141, %143 : vector<128x2xf32>
    %c1_47 = arith.constant 1 : index
    %c0_48 = arith.constant 0 : index
    %145 = vector.load %arg8[%c1_47, %c0_48] : memref<2x2xf32, #tpu.memory_space<vmem>>, vector<1x2xf32>
    %146 = vector.broadcast %145 : vector<1x2xf32> to vector<128x2xf32>
    %147 = arith.addf %144, %146 : vector<128x2xf32>
    %c0_49 = arith.constant 0 : index
    %c0_50 = arith.constant 0 : index
    %c0_51 = arith.constant 0 : index
    %148 = vector.load %arg9[%c0_49, %c0_50, %c0_51] : memref<1x128x2xf32, #tpu.memory_space<vmem>>, vector<1x128x2xf32>
    %149 = vector.shape_cast %148 : vector<1x128x2xf32> to vector<128x2xf32>
    %150 = vector.shape_cast %147 : vector<128x2xf32> to vector<1x128x2xf32>
    tpu.vector_store %arg9[%c0_49, %c0_50, %c0_51], %150 {strides = array<i32>} : memref<1x128x2xf32, #tpu.memory_space<vmem>>, vector<1x128x2xf32>,
    return
  }
  func.func @transform_0(%arg0: i32, %arg1: i32) -> (i32, i32, i32, i32, i32) {
    %c0_i32 = arith.constant 0 : i32
    %c0_i32_0 = arith.constant 0 : i32
    %c0_i32_1 = arith.constant 0 : i32
    %c0_i32_2 = arith.constant 0 : i32
    return %arg0, %arg1, %c0_i32, %c0_i32_0, %c0_i32_1 : i32, i32, i32, i32, i32
  }
  func.func @transform_1(%arg0: i32, %arg1: i32) -> (i32, i32) {
    %c0_i32 = arith.constant 0 : i32
    %c0_i32_0 = arith.constant 0 : i32
    %c0_i32_1 = arith.constant 0 : i32
    return %c0_i32, %c0_i32_0 : i32, i32
  }
  func.func @transform_2(%arg0: i32, %arg1: i32) -> (i32, i32) {
    %c0_i32 = arith.constant 0 : i32
    %c0_i32_0 = arith.constant 0 : i32
    %c0_i32_1 = arith.constant 0 : i32
    return %c0_i32, %c0_i32_0 : i32, i32
  }
  func.func @transform_3(%arg0: i32, %arg1: i32) -> (i32, i32) {
    %c0_i32 = arith.constant 0 : i32
    %c0_i32_0 = arith.constant 0 : i32
    %c0_i32_1 = arith.constant 0 : i32
    return %c0_i32, %c0_i32_0 : i32, i32
  }
  func.func @transform_4(%arg0: i32, %arg1: i32) -> (i32, i32) {
    %c0_i32 = arith.constant 0 : i32
    %c0_i32_0 = arith.constant 0 : i32
    %c0_i32_1 = arith.constant 0 : i32
    return %c0_i32, %c0_i32_0 : i32, i32
  }
  func.func @transform_5(%arg0: i32, %arg1: i32) -> (i32, i32) {
    %c0_i32 = arith.constant 0 : i32
    %c0_i32_0 = arith.constant 0 : i32
    %c0_i32_1 = arith.constant 0 : i32
    return %c0_i32, %c0_i32_0 : i32, i32
  }
  func.func @transform_6(%arg0: i32, %arg1: i32) -> (i32, i32) {
    %c0_i32 = arith.constant 0 : i32
    %c0_i32_0 = arith.constant 0 : i32
    %c0_i32_1 = arith.constant 0 : i32
    return %c0_i32, %c0_i32_0 : i32, i32
  }
  func.func @transform_7(%arg0: i32, %arg1: i32) -> (i32, i32, i32) {
    %c0_i32 = arith.constant 0 : i32
    %c0_i32_0 = arith.constant 0 : i32
    return %arg0, %arg1, %c0_i32 : i32, i32, i32
  }
}

</mosaic_0001>

<bundles_post_ra>
// kernel: tpu_custom_call.1
= control target key start
LH: loop header
LB: loop body
LE: loop exit
PB: predicated region body
PF: predicated region fallthrough
CT: control target
= control target key end

     0   :  { %s3233_s24 = smov 0   ;;  %s3235_s25 = smov 0   ;;  %s4812_s0 = inlined_call_operand.vmem [shape: bf16[2,2,10,18,128], index: 0, kind: input, shape index: {}]   ;;  %s4813_s1 = inlined_call_operand.vmem [shape: f32[9,128], index: 1, kind: input, shape index: {}]   ;;  %s4814_s2 = inlined_call_operand.vmem [shape: bf16[128,64], index: 2, kind: input, shape index: {}]   ;;  %s4815_s3 = inlined_call_operand.vmem [shape: f32[4,64], index: 3, kind: input, shape index: {}]   ;;  %s4816_s4 = inlined_call_operand.vmem [shape: bf16[64,64], index: 4, kind: input, shape index: {}]   ;;  %s4817_s5 = inlined_call_operand.vmem [shape: bf16[64,20], index: 5, kind: input, shape index: {}]   ;;  %s4818_s6 = inlined_call_operand.vmem [shape: f32[2,2], index: 6, kind: input, shape index: {}]   ;;  %s4819_s7 = inlined_call_operand.vmem [shape: f32[2,256,2], index: 7, kind: output, shape index: {}]  }
   0x1   :  { %s3237_s26 = smov 0   ;;  %s3239_s27 = smov 0  }
   0x2   :  { %s3241_s28 = smov 0  }
   0x3 LB: > { %s26_s29 = sadd.s32 1, %s3181_s26  ;;  %s29_s30 = sadd.s32 1, %s3185_s27  ;;  %s3189_s28 = sphi %s3241_s28, %s17_s28   ;;  %s3185_s27 = sphi %s3239_s27, %s4829_s27   ;;  %s3181_s26 = sphi %s3237_s26, %s4828_s26   ;;  %s3177_s25 = sphi %s3235_s25, %s4827_s25   ;;  %s3173_s24 = sphi %s3233_s24, %s4826_s24  }
   0x4   : > { %p27_p0 = scmp.ge.s32.totalorder %s26_s29, 2  ;;  %p2840_p1 = scmp.ge.s32.totalorder %s3189_s28, 1 }
   0x5   : > { %p257_p2 = scmp.lt.s32.totalorder %s3189_s28, 5 }
   0x6   : > { %s4831_s29 = smov (%p27_p0, %s26_s29), 0  ;;  %s4833_s30 = smov (!%p27_p0, %s29_s30), %s3185_s27 }
   0x7   : > { %p258_p3 = pnand %p2840_p1, %p257_p2  ;;  %p31_p4 = scmp.ge.s32.totalorder %s4833_s30, 2 }
   0x8   : > { %p297_p5 = scmp.lt.s32.totalorder (!%p258_p3), %s3177_s25, 1  ;;  %p299_p6 = scmp.lt.s32.totalorder (!%p258_p3), %s3173_s24, 1 }
   0x9   : > { %s4835_s30 = smov (%p31_p4, %s4833_s30), 0  ;;  %261 = sbr.rel (%p258_p3) target bundleno = 1572 (0x624), region = 48 }
   0xa   : > { %s2842_s15 = sshll.u32 (!%p258_p3), %s3173_s24, 4 }
   0xb   : > { %p309_p7 = scmp.lt.s32.totalorder (!%p258_p3), %s2842_s15, 31 }
   0xe   : > { %v2934_v0 = vld [vmem:[%s4814_s2 + $0x38] sm:$0xff]  ;;  %v2933_v1 = vld [vmem:[%s4814_s2 + $0x30] sm:$0xff]  ;;  %s4837_s25 = smov (!%p297_p5, %s3177_s25), 1  ;;  %v2932_v2 = vld [vmem:[%s4814_s2 + $0x28] sm:$0xff]  ;;  %vm527_vm0 = vcmask 1046528   ;;  %vm896_vm1 = vcmask 1045504  }
   0xf   : > { %1287 = vmatpush.bf16.msra.mxu0 %v2934_v0  ;;  %2967 = vmatpush.bf16.msra.mxu3 %v2934_v0  ;;  %s300_s12 = scalar_select %p299_p6, %s3173_s24, 1  ;;  %v3282_v3 = vld [vmem:[%s4813_s1] ss:$0 sm:$0xff]  ;;  %v3290_v5 = vld [vmem:[%s4813_s1 + $0x3] ss:$0 sm:$0xff]  ;;  %v2930_v18 = vld [vmem:[%s4814_s2 + $0x18] sm:$0xff] }
  0x10   : > { %s2984_s13 = smul.u32 60, %s4837_s25  ;;  %v2931_v4 = vld [vmem:[%s4814_s2 + $0x20] sm:$0xff]  ;;  %v2929_v46 = vld [vmem:[%s4814_s2 + $0x10] sm:$0xff]  ;;  %v3387_v0 = vld [vmem:[%s4813_s1 + $0x8] ss:$0 sm:$0xff]  ;;  %vm1378_vm2 = vcmask 523264  }
  0x11   : > { %s2983_s14 = smul.u32 30, %s300_s12  ;;  %v3300_v6 = vld [vmem:[%s4813_s1 + $0x6] ss:$0 sm:$0xff]  ;;  %v3305_v7 = vld [vmem:[%s4813_s1 + $0x1] ss:$0 sm:$0xff]  ;;  %s4839_s15 = smov (!%p309_p7, %s2842_s15), 31 }
  0x12   : > { %v3332_v23 = vld [vmem:[%s4813_s1 + $0x4] ss:$0 sm:$0xff]  ;;  %v3350_v32 = vld [vmem:[%s4813_s1 + $0x7] ss:$0 sm:$0xff]  ;;  %v3363_v45 = vld [vmem:[%s4813_s1 + $0x2] ss:$0 sm:$0xff] }
  0x13   : > { %1288 = vmatpush.bf16.msra.mxu0 %v2933_v1  ;;  %2968 = vmatpush.bf16.msra.mxu3 %v2933_v1  ;;  %s303_s17 = sadd.s32 %s2984_s13, %s2983_s14  ;;  %v3379_v55 = vld [vmem:[%s4813_s1 + $0x5] ss:$0 sm:$0xff]  ;;  %v2928_v1 = vld [vmem:[%s4814_s2 + $0x8] sm:$0xff]  ;;  %s2843_s16 = sshll.u32 %s4837_s25, 5 }
  0x14   : > { %s2841_s22 = sshll.u32 %s303_s17, 2  ;;  %s312_s24 = sadd.s32 %s2843_s16, %s4839_s15 }
  0x15   : > { %s3295_s11 = scalar_lea.vmem %s4812_s0, %s2841_s22  ;;  %s2844_s25 = sshll.u32 %s312_s24, 3 }
  0x16   : > { %v2944_v8 = vld [vmem:[%s3295_s11] sm:$0xff]   ;;  %v3309_v9 = vld [vmem:[%s3295_s11 + $0x8] sm:$0x1]  ;;  %v320_v10 = vld [vmem:[%s3295_s11 + $0xc] sm:$0xff]   ;;  %s4688_s22 = scalar_lea.vmem %s4819_s7, %s2844_s25 }
  0x17   : > { %1289 = vmatpush.bf16.msra.mxu0 %v2932_v2  ;;  %2969 = vmatpush.bf16.msra.mxu3 %v2932_v2  ;;  %v2945_v11 = vunpack.c.l.bf16 %v2944_v8  ;;  %v2946_v12 = vunpack.c.h.bf16 %v2944_v8  ;;  %v322_v13 = vld [vmem:[%s3295_s11 + $0x14] sm:$0x1]  ;;  %v2963_v14 = vld [vmem:[%s3295_s11 + $0x18] sm:$0xff]   ;;  %v325_v15 = vld [vmem:[%s3295_s11 + $0x20] sm:$0x1]  ;;  %v3315_v16 = vunpack.c.l.bf16 %v320_v10  ;;  %v3317_v17 = vunpack.c.h.bf16 %v320_v10 }
  0x18   : > { %v3322_v19 = vunpack.c.l.bf16 %v2963_v14  ;;  %v3324_v20 = vunpack.c.h.bf16 %v2963_v14  ;;  %v470_v21 = vunpack.c.l.bf16 %v3309_v9  ;;  %v3327_v22 = vunpack.c.l.bf16 %v322_v13 }
  0x19   : > { %v365_v24 = vmul.f32 %v3282_v3, %v2945_v11  ;;  %v366_v25 = vmul.f32 %v3282_v3, %v2946_v12  ;;  %v401_v26 = vmul.f32 %v3290_v5, %v3315_v16  ;;  %v402_v27 = vmul.f32 %v3290_v5, %v3317_v17 }
  0x1a   : > { %v437_v28 = vmul.f32 %v3300_v6, %v3322_v19  ;;  %v438_v29 = vmul.f32 %v3300_v6, %v3324_v20  ;;  %v3344_v30 = vunpack.c.l.bf16 %v325_v15  ;;  %v479_v31 = vmul.f32 %v3305_v7, %v2945_v11 }
  0x1b   : > { %1290 = vmatpush.bf16.msra.mxu0 %v2931_v4  ;;  %2970 = vmatpush.bf16.msra.mxu3 %v2931_v4  ;;  %v417_v33 = vadd.f32 %v401_v26, %v365_v24  ;;  %v418_v34 = vadd.f32 %v402_v27, %v366_v25  ;;  %v480_v35 = vmul.f32 %v3305_v7, %v2946_v12 }
  0x1c   : > { %v481_v36 = vmul.f32 %v3305_v7, %v470_v21  ;;  %v528_v37 = vrot.slane %v479_v31, 1  ;;  %v603_v38 = vmul.f32 %v3332_v23, %v3315_v16  ;;  %v604_v39 = vmul.f32 %v3332_v23, %v3317_v17 }
  0x1d   : > { %v605_v40 = vmul.f32 %v3332_v23, %v3327_v22  ;;  %v453_v41 = vadd.f32 %v437_v28, %v417_v33  ;;  %v454_v42 = vadd.f32 %v438_v29, %v418_v34  ;;  %v529_v43 = vrot.slane %v480_v35, 1  ;;  %v326_v28 = vld [vmem:[%s3295_s11 + $0x24] sm:$0xff]  }
  0x1e   : > { %v531_v44 = vrot.slane %v481_v36, 1  ;;  %v651_v47 = vrot.slane %v603_v38, 1  ;;  %v652_v48 = vrot.slane %v604_v39, 1  ;;  %v726_v50 = vmul.f32 %v3350_v32, %v3322_v19  ;;  %v2927_v29 = vld [vmem:[%s4814_s2] sm:$0xff] }
  0x1f   : > { %1291 = vmatpush.bf16.msra.mxu0 %v2930_v18  ;;  %v654_v49 = vrot.slane %v605_v40, 1  ;;  %2971 = vmatpush.bf16.msra.mxu3 %v2930_v18  ;;  %v530_v51 = vsel %vm527_vm0, %v528_v37, %v529_v43  ;;  %v727_v53 = vmul.f32 %v3350_v32, %v3324_v20  ;;  %v728_v54 = vmul.f32 %v3350_v32, %v3344_v30 }
  0x20   : > { %v532_v52 = vsel %vm527_vm0, %v529_v43, %v531_v44  ;;  %v584_v56 = vadd.f32 %v530_v51, %v453_v41  ;;  %v653_v58 = vsel %vm527_vm0, %v651_v47, %v652_v48  ;;  %v774_v60 = vrot.slane %v726_v50, 1  ;;  %v328_v47 = vld [vmem:[%s3295_s11 + $0x2c] sm:$0x1] }
  0x21   : > { %v585_v57 = vadd.f32 %v532_v52, %v454_v42  ;;  %v655_v59 = vsel %vm527_vm0, %v652_v48, %v654_v49  ;;  %v775_v61 = vrot.slane %v727_v53, 1  ;;  %v777_v62 = vrot.slane %v728_v54, 1 }
  0x22   : > { %v848_v63 = vmul.f32 %v3363_v45, %v2945_v11  ;;  %v707_v2 = vadd.f32 %v653_v58, %v584_v56  ;;  %v849_v8 = vmul.f32 %v3363_v45, %v2946_v12  ;;  %v850_v9 = vmul.f32 %v3363_v45, %v470_v21 }
  0x23   : > { %1292 = vmatpush.bf16.msra.mxu0 %v2929_v46  ;;  %v708_v4 = vadd.f32 %v655_v59, %v585_v57  ;;  %v776_v10 = vsel %vm527_vm0, %v774_v60, %v775_v61  ;;  %v778_v11 = vsel %vm527_vm0, %v775_v61, %v777_v62  ;;  %v971_v14 = vmul.f32 %v3379_v55, %v3315_v16 }
  0x24   : > { %v897_v13 = vrot.slane %v848_v63, 2  ;;  %2972 = vmatpush.bf16.msra.mxu3 %v2929_v46  ;;  %v830_v15 = vadd.f32 %v776_v10, %v707_v2  ;;  %v898_v24 = vrot.slane %v849_v8, 2  ;;  %v900_v25 = vrot.slane %v850_v9, 2 }
  0x25   : > { %v831_v18 = vadd.f32 %v778_v11, %v708_v4  ;;  %v972_v26 = vmul.f32 %v3379_v55, %v3317_v17  ;;  %v973_v12 = vmul.f32 %v3379_v55, %v3327_v22  ;;  %v1019_v21 = vrot.slane %v971_v14, 2 }
  0x26   : > { %v1093_v27 = vmul.f32 %v3387_v0, %v3322_v19  ;;  %v899_v31 = vsel %vm896_vm1, %v897_v13, %v898_v24  ;;  %v901_v33 = vsel %vm896_vm1, %v898_v24, %v900_v25  ;;  %v1094_v34 = vmul.f32 %v3387_v0, %v3324_v20 }
  0x27   : > { %1293 = vmatpush.bf16.msra.mxu0 %v2928_v1  ;;  %v1095_v35 = vmul.f32 %v3387_v0, %v3344_v30  ;;  %v953_v36 = vadd.f32 %v899_v31, %v830_v15  ;;  %v954_v37 = vadd.f32 %v901_v33, %v831_v18  ;;  %v1020_v38 = vrot.slane %v972_v26, 2 }
  0x28   : > { %v1022_v39 = vrot.slane %v973_v12, 2  ;;  %2973 = vmatpush.bf16.msra.mxu3 %v2928_v1  ;;  %v1141_v40 = vrot.slane %v1093_v27, 2  ;;  %v1142_v41 = vrot.slane %v1094_v34, 2  ;;  %v3414_v43 = vunpack.c.l.bf16 %v326_v28 }
  0x29   : > { %v1144_v42 = vrot.slane %v1095_v35, 2  ;;  %v1021_v44 = vsel %vm896_vm1, %v1019_v21, %v1020_v38  ;;  %v3419_v48 = vunpack.c.h.bf16 %v326_v28  ;;  %v367_v49 = vmul.f32 %v3282_v3, %v3315_v16 }
  0x2a   : > { %v1023_v46 = vsel %vm896_vm1, %v1020_v38, %v1022_v39  ;;  %v1075_v50 = vadd.f32 %v1021_v44, %v953_v36  ;;  %v1143_v52 = vsel %vm896_vm1, %v1141_v40, %v1142_v41  ;;  %v368_v54 = vmul.f32 %v3282_v3, %v3317_v17 }
  0x2b   : > { %1294 = vmatpush.bf16.msra.mxu0 %v2927_v29  ;;  %v1076_v51 = vadd.f32 %v1023_v46, %v954_v37  ;;  %v1145_v53 = vsel %vm896_vm1, %v1142_v41, %v1144_v42  ;;  %v403_v56 = vmul.f32 %v3290_v5, %v3322_v19  ;;  %v404_v57 = vmul.f32 %v3290_v5, %v3324_v20 }
  0x2c   : > { %v439_v58 = vmul.f32 %v3300_v6, %v3414_v43  ;;  %2974 = vmatpush.bf16.msra.mxu3 %v2927_v29  ;;  %v1197_v59 = vadd.f32 %v1143_v52, %v1075_v50  ;;  %v440_v61 = vmul.f32 %v3300_v6, %v3419_v48  ;;  %v3435_v62 = vunpack.c.l.bf16 %v328_v47 }
  0x2d   : > { %v1198_v60 = vadd.f32 %v1145_v53, %v1076_v51  ;;  %v419_v63 = vadd.f32 %v403_v56, %v367_v49  ;;  %v420_v1 = vadd.f32 %v404_v57, %v368_v54  ;;  %v482_v2 = vmul.f32 %v3305_v7, %v3315_v16 }
  0x2e   : > { %v483_v4 = vmul.f32 %v3305_v7, %v3317_v17  ;;  %v484_v9 = vmul.f32 %v3305_v7, %v3327_v22  ;;  %v606_v10 = vmul.f32 %v3332_v23, %v3322_v19  ;;  %v607_v11 = vmul.f32 %v3332_v23, %v3324_v20 }
  0x2f   : > { %v1213_v8 = vpack.c.bf16 %v1198_v60, %v1197_v59  ;;  %v455_v13 = vadd.f32 %v439_v58, %v419_v63  ;;  %v456_v14 = vadd.f32 %v440_v61, %v420_v1  ;;  %v533_v15 = vrot.slane %v482_v2, 1  ;;  %v2964_v61 = vld [vmem:[%s3295_s11 + $0x30] sm:$0xff]  }
  0x30   : > { %v534_v18 = vrot.slane %v483_v4, 1  ;;  %v536_v24 = vrot.slane %v484_v9, 1  ;;  %v608_v25 = vmul.f32 %v3332_v23, %v3344_v30  ;;  %v656_v26 = vrot.slane %v606_v10, 1 }
  0x31   : > { %1295 = vmatmul.bf16.vlgmr.msra.gmra.mxu0 %v1213_v8  ;;  %v657_v12 = vrot.slane %v607_v11, 1  ;;  %v729_v27 = vmul.f32 %v3350_v32, %v3414_v43  ;;  %v730_v28 = vmul.f32 %v3350_v32, %v3419_v48  ;;  %v731_v29 = vmul.f32 %v3350_v32, %v3435_v62 }
  0x32   : > { %v535_v21 = vsel %vm527_vm0, %v533_v15, %v534_v18  ;;  %v537_v31 = vsel %vm527_vm0, %v534_v18, %v536_v24  ;;  %v659_v35 = vrot.slane %v608_v25, 1  ;;  %v851_v42 = vmul.f32 %v3363_v45, %v3315_v16 }
  0x33   : > { %v586_v33 = vadd.f32 %v535_v21, %v455_v13  ;;  %v658_v34 = vsel %vm527_vm0, %v656_v26, %v657_v12  ;;  %v587_v36 = vadd.f32 %v537_v31, %v456_v14  ;;  %v779_v37 = vrot.slane %v729_v27, 1  ;;  %v331_v21 = vld [vmem:[%s3295_s11 + $0x38] sm:$0x1] }
  0x34   : > { %v780_v38 = vrot.slane %v730_v28, 1  ;;  %v782_v39 = vrot.slane %v731_v29, 1  ;;  %v660_v40 = vsel %vm527_vm0, %v657_v12, %v659_v35  ;;  %v852_v44 = vmul.f32 %v3363_v45, %v3317_v17 }
  0x35   : > { %v709_v41 = vadd.f32 %v658_v34, %v586_v33  ;;  %v710_v46 = vadd.f32 %v660_v40, %v587_v36  ;;  %v853_v50 = vmul.f32 %v3363_v45, %v3327_v22  ;;  %v902_v52 = vrot.slane %v851_v42, 2 }
  0x36   : > { %v781_v47 = vsel %vm527_vm0, %v779_v37, %v780_v38  ;;  %v783_v49 = vsel %vm527_vm0, %v780_v38, %v782_v39  ;;  %v903_v53 = vrot.slane %v852_v44, 2  ;;  %v974_v54 = vmul.f32 %v3379_v55, %v3322_v19 }
  0x37   : > { %v832_v51 = vadd.f32 %v781_v47, %v709_v41  ;;  %v833_v56 = vadd.f32 %v783_v49, %v710_v46  ;;  %v905_v16 = vrot.slane %v853_v50, 2  ;;  %v975_v17 = vmul.f32 %v3379_v55, %v3324_v20 }
  0x38   : > { %v976_v57 = vmul.f32 %v3379_v55, %v3344_v30  ;;  %v904_v58 = vsel %vm896_vm1, %v902_v52, %v903_v53  ;;  %v1024_v59 = vrot.slane %v974_v54, 2  ;;  %v1096_v22 = vmul.f32 %v3387_v0, %v3414_v43 }
  0x39   : > { %v1097_v60 = vmul.f32 %v3387_v0, %v3419_v48  ;;  %v906_v63 = vsel %vm896_vm1, %v903_v53, %v905_v16  ;;  %v955_v1 = vadd.f32 %v904_v58, %v832_v51  ;;  %v1025_v2 = vrot.slane %v975_v17, 2 }
  0x3a   : > { %v1027_v4 = vrot.slane %v976_v57, 2  ;;  %v956_v8 = vadd.f32 %v906_v63, %v833_v56  ;;  %v1098_v9 = vmul.f32 %v3387_v0, %v3435_v62  ;;  %v1146_v10 = vrot.slane %v1096_v22, 2 }
  0x3b   : > { %v1147_v11 = vrot.slane %v1097_v60, 2  ;;  %v1026_v13 = vsel %vm896_vm1, %v1024_v59, %v1025_v2  ;;  %v3484_v15 = vunpack.c.l.bf16 %v2964_v61  ;;  %v3486_v18 = vunpack.c.h.bf16 %v2964_v61 }
  0x3c   : > { %v1028_v14 = vsel %vm896_vm1, %v1025_v2, %v1027_v4  ;;  %v1077_v24 = vadd.f32 %v1026_v13, %v955_v1  ;;  %v1149_v12 = vrot.slane %v1098_v9, 2  ;;  %v369_v27 = vmul.f32 %v3282_v3, %v3322_v19 }
  0x3d   : > { %v1078_v25 = vadd.f32 %v1028_v14, %v956_v8  ;;  %v1148_v26 = vsel %vm896_vm1, %v1146_v10, %v1147_v11  ;;  %v370_v28 = vmul.f32 %v3282_v3, %v3324_v20  ;;  %v405_v29 = vmul.f32 %v3290_v5, %v3414_v43 }
  0x3e   : > { %v406_v31 = vmul.f32 %v3290_v5, %v3419_v48  ;;  %v1150_v33 = vsel %vm896_vm1, %v1147_v11, %v1149_v12  ;;  %v1199_v34 = vadd.f32 %v1148_v26, %v1077_v24  ;;  %v441_v35 = vmul.f32 %v3300_v6, %v3484_v15 }
  0x3f   : > { %v442_v36 = vmul.f32 %v3300_v6, %v3486_v18  ;;  %v1200_v37 = vadd.f32 %v1150_v33, %v1078_v25  ;;  %v421_v38 = vadd.f32 %v405_v29, %v369_v27  ;;  %v3503_v40 = vunpack.c.l.bf16 %v331_v21 }
  0x40   : > { %v422_v39 = vadd.f32 %v406_v31, %v370_v28  ;;  %v485_v41 = vmul.f32 %v3305_v7, %v3322_v19  ;;  %v486_v42 = vmul.f32 %v3305_v7, %v3324_v20  ;;  %v487_v44 = vmul.f32 %v3305_v7, %v3344_v30 }
  0x41   : > { %v609_v46 = vmul.f32 %v3332_v23, %v3414_v43  ;;  %v1214_v47 = vpack.c.bf16 %v1200_v37, %v1199_v34  ;;  %v457_v49 = vadd.f32 %v441_v35, %v421_v38  ;;  %v610_v51 = vmul.f32 %v3332_v23, %v3419_v48 }
  0x42   : > { %v458_v50 = vadd.f32 %v442_v36, %v422_v39  ;;  %v538_v52 = vrot.slane %v485_v41, 1  ;;  %v539_v53 = vrot.slane %v486_v42, 1  ;;  %v541_v54 = vrot.slane %v487_v44, 1  ;;  %v332_v36 = vld [vmem:[%s3295_s11 + $0x3c] sm:$0xff]  }
  0x43   : > { %v611_v56 = vmul.f32 %v3332_v23, %v3435_v62  ;;  %1300 = vmatmul.bf16.gmra.mxu0 %v1214_v47  ;;  %v661_v16 = vrot.slane %v609_v46, 1  ;;  %v662_v17 = vrot.slane %v610_v51, 1  ;;  %v732_v57 = vmul.f32 %v3350_v32, %v3484_v15 }
  0x44   : > { %v733_v58 = vmul.f32 %v3350_v32, %v3486_v18  ;;  %v540_v59 = vsel %vm527_vm0, %v538_v52, %v539_v53  ;;  %v542_v22 = vsel %vm527_vm0, %v539_v53, %v541_v54  ;;  %v734_v61 = vmul.f32 %v3350_v32, %v3503_v40 }
  0x45   : > { %v664_v60 = vrot.slane %v611_v56, 1  ;;  %v588_v63 = vadd.f32 %v540_v59, %v457_v49  ;;  %v589_v1 = vadd.f32 %v542_v22, %v458_v50  ;;  %v663_v2 = vsel %vm527_vm0, %v661_v16, %v662_v17  ;;  %v334_v56 = vld [vmem:[%s3295_s11 + $0x44] sm:$0x1] }
  0x46   : > { %v784_v4 = vrot.slane %v732_v57, 1  ;;  %v785_v9 = vrot.slane %v733_v58, 1  ;;  %v787_v10 = vrot.slane %v734_v61, 1  ;;  %v854_v11 = vmul.f32 %v3363_v45, %v3322_v19  ;;  %v2938_v19 = vld [vmem:[%s4816_s4 + $0x18] sm:$0xff] }
  0x47   : > { %v665_v8 = vsel %vm527_vm0, %v662_v17, %v664_v60  ;;  %v711_v13 = vadd.f32 %v663_v2, %v588_v63  ;;  %v855_v24 = vmul.f32 %v3363_v45, %v3324_v20  ;;  %v856_v25 = vmul.f32 %v3363_v45, %v3344_v30  ;;  %1407 = vmatpush.bf16.msra.mxu1 %v2938_v19 }
  0x48   : > { %v712_v14 = vadd.f32 %v665_v8, %v589_v1  ;;  %v786_v26 = vsel %vm527_vm0, %v784_v4, %v785_v9  ;;  %v788_v12 = vsel %vm527_vm0, %v785_v9, %v787_v10  ;;  %v907_v21 = vrot.slane %v854_v11, 2  ;;  %2975 = vmatpush.bf16.msrb.mxu3 %v2938_v19 }
  0x49   : > { %v977_v27 = vmul.f32 %v3379_v55, %v3414_v43  ;;  %v834_v28 = vadd.f32 %v786_v26, %v711_v13  ;;  %v908_v31 = vrot.slane %v855_v24, 2  ;;  %v910_v33 = vrot.slane %v856_v25, 2 }
  0x4a   : > { %v835_v29 = vadd.f32 %v788_v12, %v712_v14  ;;  %v978_v20 = vmul.f32 %v3379_v55, %v3419_v48  ;;  %v979_v30 = vmul.f32 %v3379_v55, %v3435_v62  ;;  %v1099_v35 = vmul.f32 %v3387_v0, %v3484_v15 }
  0x4b   : > { %v1029_v34 = vrot.slane %v977_v27, 2  ;;  %v909_v37 = vsel %vm896_vm1, %v907_v21, %v908_v31  ;;  %v911_v38 = vsel %vm896_vm1, %v908_v31, %v910_v33  ;;  %v1100_v39 = vmul.f32 %v3387_v0, %v3486_v18 }
  0x4c   : > { %v1101_v41 = vmul.f32 %v3387_v0, %v3503_v40  ;;  %v957_v42 = vadd.f32 %v909_v37, %v834_v28  ;;  %v958_v44 = vadd.f32 %v911_v38, %v835_v29  ;;  %v1030_v46 = vrot.slane %v978_v20, 2 }
  0x4d   : > { %v1032_v47 = vrot.slane %v979_v30, 2  ;;  %v1151_v49 = vrot.slane %v1099_v35, 2  ;;  %v1152_v50 = vrot.slane %v1100_v39, 2  ;;  %v3553_v52 = vunpack.c.l.bf16 %v332_v36 }
  0x4e   : > { %v1154_v51 = vrot.slane %v1101_v41, 2  ;;  %v1031_v53 = vsel %vm896_vm1, %v1029_v34, %v1030_v46  ;;  %v3558_v16 = vunpack.c.h.bf16 %v332_v36  ;;  %v371_v17 = vmul.f32 %v3282_v3, %v3414_v43 }
  0x4f   : > { %v1033_v54 = vsel %vm896_vm1, %v1030_v46, %v1032_v47  ;;  %v1079_v57 = vadd.f32 %v1031_v53, %v957_v42  ;;  %v1153_v59 = vsel %vm896_vm1, %v1151_v49, %v1152_v50  ;;  %v372_v60 = vmul.f32 %v3282_v3, %v3419_v48 }
  0x50   : > { %v1080_v58 = vadd.f32 %v1033_v54, %v958_v44  ;;  %v1155_v22 = vsel %vm896_vm1, %v1152_v50, %v1154_v51  ;;  %v407_v61 = vmul.f32 %v3290_v5, %v3484_v15  ;;  %v408_v63 = vmul.f32 %v3290_v5, %v3486_v18 }
  0x51   : > { %v443_v1 = vmul.f32 %v3300_v6, %v3553_v52  ;;  %v1201_v2 = vadd.f32 %v1153_v59, %v1079_v57  ;;  %v444_v8 = vmul.f32 %v3300_v6, %v3558_v16  ;;  %v3574_v9 = vunpack.c.l.bf16 %v334_v56 }
  0x52   : > { %v1202_v4 = vadd.f32 %v1155_v22, %v1080_v58  ;;  %v423_v10 = vadd.f32 %v407_v61, %v371_v17  ;;  %v424_v11 = vadd.f32 %v408_v63, %v372_v60  ;;  %v488_v13 = vmul.f32 %v3305_v7, %v3414_v43 }
  0x53   : > { %v489_v14 = vmul.f32 %v3305_v7, %v3419_v48  ;;  %v490_v25 = vmul.f32 %v3305_v7, %v3435_v62  ;;  %v612_v26 = vmul.f32 %v3332_v23, %v3484_v15  ;;  %v613_v12 = vmul.f32 %v3332_v23, %v3486_v18 }
  0x54   : > { %v1215_v24 = vpack.c.bf16 %v1202_v4, %v1201_v2  ;;  %v459_v21 = vadd.f32 %v443_v1, %v423_v10  ;;  %v460_v27 = vadd.f32 %v444_v8, %v424_v11  ;;  %v543_v19 = vrot.slane %v488_v13, 1 }
  0x55   : > { %v544_v28 = vrot.slane %v489_v14, 1  ;;  %v546_v29 = vrot.slane %v490_v25, 1  ;;  %v614_v31 = vmul.f32 %v3332_v23, %v3503_v40  ;;  %v666_v33 = vrot.slane %v612_v26, 1 }
  0x56   : > { %1305 = vmatmul.bf16.gmra.mxu0 %v1215_v24  ;;  %v667_v20 = vrot.slane %v613_v12, 1  ;;  %v735_v34 = vmul.f32 %v3350_v32, %v3553_v52  ;;  %v736_v35 = vmul.f32 %v3350_v32, %v3558_v16  ;;  %v737_v36 = vmul.f32 %v3350_v32, %v3574_v9 }
  0x57   : > { %v545_v30 = vsel %vm527_vm0, %v543_v19, %v544_v28  ;;  %v547_v37 = vsel %vm527_vm0, %v544_v28, %v546_v29  ;;  %v669_v41 = vrot.slane %v614_v31, 1  ;;  %v857_v51 = vmul.f32 %v3363_v45, %v3414_v43 }
  0x58   : > { %v590_v38 = vadd.f32 %v545_v30, %v459_v21  ;;  %v668_v39 = vsel %vm527_vm0, %v666_v33, %v667_v20  ;;  %v591_v42 = vadd.f32 %v547_v37, %v460_v27  ;;  %v789_v44 = vrot.slane %v735_v34, 1  ;;  %v2937_v34 = vld [vmem:[%s4816_s4 + $0x10] sm:$0xff] }
  0x59   : > { %v790_v46 = vrot.slane %v736_v35, 1  ;;  %v792_v47 = vrot.slane %v737_v36, 1  ;;  %v670_v49 = vsel %vm527_vm0, %v667_v20, %v669_v41  ;;  %v858_v53 = vmul.f32 %v3363_v45, %v3419_v48  ;;  %v2965_v35 = vld [vmem:[%s3295_s11 + $0x48] sm:$0xff]   ;;  %1408 = vmatpush.bf16.msra.mxu1 %v2937_v34  ;;  %2976 = vmatpush.bf16.msrb.mxu3 %v2937_v34 }
  0x5a   : > { %v713_v50 = vadd.f32 %v668_v39, %v590_v38  ;;  %v714_v54 = vadd.f32 %v670_v49, %v591_v42  ;;  %v859_v57 = vmul.f32 %v3363_v45, %v3435_v62  ;;  %v912_v59 = vrot.slane %v857_v51, 2  ;;  %v2936_v41 = vld [vmem:[%s4816_s4 + $0x8] sm:$0xff]  ;;  %v337_v49 = vld [vmem:[%s3295_s11 + $0x50] sm:$0x1] }
  0x5b   : > { %v791_v56 = vsel %vm527_vm0, %v789_v44, %v790_v46  ;;  %v793_v17 = vsel %vm527_vm0, %v790_v46, %v792_v47  ;;  %v913_v22 = vrot.slane %v858_v53, 2  ;;  %v980_v60 = vmul.f32 %v3379_v55, %v3484_v15 }
  0x5c   : > { %v836_v58 = vadd.f32 %v791_v56, %v713_v50  ;;  %v837_v61 = vadd.f32 %v793_v17, %v714_v54  ;;  %v915_v63 = vrot.slane %v859_v57, 2  ;;  %v981_v43 = vmul.f32 %v3379_v55, %v3486_v18 }
  0x5d   : > { %v982_v48 = vmul.f32 %v3379_v55, %v3503_v40  ;;  %v914_v1 = vsel %vm896_vm1, %v912_v59, %v913_v22  ;;  %v1034_v2 = vrot.slane %v980_v60, 2  ;;  %v1102_v62 = vmul.f32 %v3387_v0, %v3553_v52  ;;  %1409 = vmatpush.bf16.msra.mxu1 %v2936_v41  ;;  %2977 = vmatpush.bf16.msrb.mxu3 %v2936_v41 }
  0x5e   : > { %v1103_v4 = vmul.f32 %v3387_v0, %v3558_v16  ;;  %v916_v8 = vsel %vm896_vm1, %v913_v22, %v915_v63  ;;  %v959_v10 = vadd.f32 %v914_v1, %v836_v58  ;;  %v1035_v11 = vrot.slane %v981_v43, 2 }
  0x5f   : > { %v1037_v13 = vrot.slane %v982_v48, 2  ;;  %v960_v14 = vadd.f32 %v916_v8, %v837_v61  ;;  %v1104_v24 = vmul.f32 %v3387_v0, %v3574_v9  ;;  %v1156_v25 = vrot.slane %v1102_v62, 2  ;;  %v338_v8 = vld [vmem:[%s3295_s11 + $0x54] sm:$0xff]  }
  0x60   : > { %v1157_v26 = vrot.slane %v1103_v4, 2  ;;  %v1036_v12 = vsel %vm896_vm1, %v1034_v2, %v1035_v11  ;;  %v3628_v36 = vunpack.c.l.bf16 %v2965_v35  ;;  %v3630_v37 = vunpack.c.h.bf16 %v2965_v35 }
  0x61   : > { %v1038_v21 = vsel %vm896_vm1, %v1035_v11, %v1037_v13  ;;  %v1081_v27 = vadd.f32 %v1036_v12, %v959_v10  ;;  %v1159_v29 = vrot.slane %v1104_v24, 2  ;;  %v373_v38 = vmul.f32 %v3282_v3, %v3484_v15 }
  0x62   : > { %v1082_v19 = vadd.f32 %v1038_v21, %v960_v14  ;;  %v1158_v28 = vsel %vm896_vm1, %v1156_v25, %v1157_v26  ;;  %v374_v39 = vmul.f32 %v3282_v3, %v3486_v18  ;;  %v409_v42 = vmul.f32 %v3290_v5, %v3553_v52  ;;  %v2935_v21 = vld [vmem:[%s4816_s4] sm:$0xff] }
  0x63   : > { %v1160_v31 = vsel %vm896_vm1, %v1157_v26, %v1159_v29  ;;  %v1203_v33 = vadd.f32 %v1158_v28, %v1081_v27  ;;  %v410_v44 = vmul.f32 %v3290_v5, %v3558_v16  ;;  %v491_v46 = vmul.f32 %v3305_v7, %v3484_v15  ;;  %1410 = vmatpush.bf16.msra.mxu1 %v2935_v21 }
  0x64   : > { %v1204_v20 = vadd.f32 %v1160_v31, %v1082_v19  ;;  %v492_v47 = vmul.f32 %v3305_v7, %v3486_v18  ;;  %v445_v50 = vmul.f32 %v3300_v6, %v3628_v36  ;;  %v446_v51 = vmul.f32 %v3300_v6, %v3630_v37  ;;  %2978 = vmatpush.bf16.msrb.mxu3 %v2935_v21 }
  0x65   : > { %v493_v53 = vmul.f32 %v3305_v7, %v3503_v40  ;;  %v425_v54 = vadd.f32 %v409_v42, %v373_v38  ;;  %v426_v56 = vadd.f32 %v410_v44, %v374_v39  ;;  %v3654_v17 = vunpack.c.l.bf16 %v337_v49  ;;  %v2966_v49 = vld [vmem:[%s3295_s11 + $0x60] sm:$0xff]  }
  0x66   : > { %v1216_v30 = vpack.c.bf16 %v1204_v20, %v1203_v33  ;;  %v548_v57 = vrot.slane %v491_v46, 1  ;;  %v549_v58 = vrot.slane %v492_v47, 1  ;;  %v615_v22 = vmul.f32 %v3332_v23, %v3553_v52 }
  0x67   : > { %v551_v59 = vrot.slane %v493_v53, 1  ;;  %v616_v60 = vmul.f32 %v3332_v23, %v3558_v16  ;;  %v461_v61 = vadd.f32 %v445_v50, %v425_v54  ;;  %v462_v63 = vadd.f32 %v446_v51, %v426_v56 }
  0x68   : > { %1310 = vmatmul.bf16.gmra.mxu0 %v1216_v30  ;;  %v617_v43 = vmul.f32 %v3332_v23, %v3574_v9  ;;  %v738_v48 = vmul.f32 %v3350_v32, %v3628_v36  ;;  %v550_v1 = vsel %vm527_vm0, %v548_v57, %v549_v58  ;;  %v671_v62 = vrot.slane %v615_v22, 1 }
  0x69   : > { %v552_v2 = vsel %vm527_vm0, %v549_v58, %v551_v59  ;;  %v672_v4 = vrot.slane %v616_v60, 1  ;;  %v592_v10 = vadd.f32 %v550_v1, %v461_v61  ;;  %v739_v14 = vmul.f32 %v3350_v32, %v3630_v37  ;;  %v340_v1 = vld [vmem:[%s3295_s11 + $0x5c] sm:$0x1] }
  0x6a   : > { %v593_v11 = vadd.f32 %v552_v2, %v462_v63  ;;  %v674_v13 = vrot.slane %v617_v43, 1  ;;  %v740_v25 = vmul.f32 %v3350_v32, %v3654_v17  ;;  %v794_v26 = vrot.slane %v738_v48, 1 }
  0x6b   : > { %v673_v24 = vsel %vm527_vm0, %v671_v62, %v672_v4  ;;  %v860_v12 = vmul.f32 %v3363_v45, %v3484_v15  ;;  %v795_v28 = vrot.slane %v739_v14, 1  ;;  %v3678_v29 = vunpack.c.l.bf16 %v338_v8 }
  0x6c   : > { %v675_v27 = vsel %vm527_vm0, %v672_v4, %v674_v13  ;;  %v715_v19 = vadd.f32 %v673_v24, %v592_v10  ;;  %v797_v33 = vrot.slane %v740_v25, 1  ;;  %v861_v20 = vmul.f32 %v3363_v45, %v3486_v18  ;;  %v343_v24 = vld [vmem:[%s3295_s11 + $0x68] sm:$0x1] }
  0x6d   : > { %v716_v31 = vadd.f32 %v675_v27, %v593_v11  ;;  %v862_v30 = vmul.f32 %v3363_v45, %v3503_v40  ;;  %v796_v15 = vsel %vm527_vm0, %v794_v26, %v795_v28  ;;  %v917_v34 = vrot.slane %v860_v12, 2 }
  0x6e   : > { %v983_v35 = vmul.f32 %v3379_v55, %v3553_v52  ;;  %v984_v38 = vmul.f32 %v3379_v55, %v3558_v16  ;;  %v798_v39 = vsel %vm527_vm0, %v795_v28, %v797_v33  ;;  %v838_v41 = vadd.f32 %v796_v15, %v715_v19 }
  0x6f   : > { %v918_v42 = vrot.slane %v861_v20, 2  ;;  %v920_v18 = vrot.slane %v862_v30, 2  ;;  %v839_v44 = vadd.f32 %v798_v39, %v716_v31  ;;  %v985_v40 = vmul.f32 %v3379_v55, %v3574_v9 }
  0x70   : > { %v1039_v46 = vrot.slane %v983_v35, 2  ;;  %v1040_v47 = vrot.slane %v984_v38, 2  ;;  %v1105_v53 = vmul.f32 %v3387_v0, %v3628_v36  ;;  %v1106_v54 = vmul.f32 %v3387_v0, %v3630_v37 }
  0x71   : > { %v919_v50 = vsel %vm896_vm1, %v917_v34, %v918_v42  ;;  %v921_v51 = vsel %vm896_vm1, %v918_v42, %v920_v18  ;;  %v1042_v59 = vrot.slane %v985_v40, 2  ;;  %v1107_v22 = vmul.f32 %v3387_v0, %v3654_v17 }
  0x72   : > { %v961_v56 = vadd.f32 %v919_v50, %v838_v41  ;;  %v962_v57 = vadd.f32 %v921_v51, %v839_v44  ;;  %v1041_v58 = vsel %vm896_vm1, %v1039_v46, %v1040_v47  ;;  %v1161_v60 = vrot.slane %v1105_v53, 2 }
  0x73   : > { %v1162_v61 = vrot.slane %v1106_v54, 2  ;;  %v3702_v63 = vunpack.c.l.bf16 %v2966_v49  ;;  %v1043_v43 = vsel %vm896_vm1, %v1040_v47, %v1042_v59  ;;  %v3706_v2 = vunpack.c.h.bf16 %v2966_v49 }
  0x74   : > { %v1083_v48 = vadd.f32 %v1041_v58, %v961_v56  ;;  %v3708_v62 = vunpack.c.h.bf16 %v338_v8  ;;  %v1084_v4 = vadd.f32 %v1043_v43, %v962_v57  ;;  %v1164_v11 = vrot.slane %v1107_v22, 2 }
  0x75   : > { %v1163_v10 = vsel %vm896_vm1, %v1161_v60, %v1162_v61  ;;  %v377_v13 = vmul.f32 %v3282_v3, %v3628_v36  ;;  %v378_v25 = vmul.f32 %v3282_v3, %v3630_v37  ;;  %v413_v26 = vmul.f32 %v3290_v5, %v3678_v29 }
  0x76   : > { %v1205_v14 = vadd.f32 %v1163_v10, %v1083_v48  ;;  %v414_v12 = vmul.f32 %v3290_v5, %v3708_v62  ;;  %v1165_v8 = vsel %vm896_vm1, %v1162_v61, %v1164_v11  ;;  %v449_v21 = vmul.f32 %v3300_v6, %v3702_v63 }
  0x77   : > { %v450_v27 = vmul.f32 %v3300_v6, %v3706_v2  ;;  %v3725_v19 = vunpack.c.l.bf16 %v340_v1  ;;  %v1206_v28 = vadd.f32 %v1165_v8, %v1084_v4  ;;  %v429_v31 = vadd.f32 %v413_v26, %v377_v13 }
  0x78   : > { %v430_v33 = vadd.f32 %v414_v12, %v378_v25  ;;  %v497_v3 = vmul.f32 %v3305_v7, %v3628_v36  ;;  %v498_v20 = vmul.f32 %v3305_v7, %v3630_v37  ;;  %v499_v5 = vmul.f32 %v3305_v7, %v3654_v17 }
  0x79   : > { %v3733_v30 = vunpack.c.l.bf16 %v343_v24  ;;  %v621_v15 = vmul.f32 %v3332_v23, %v3678_v29  ;;  %v1217_v6 = vpack.c.bf16 %v1206_v28, %v1205_v14  ;;  %v465_v34 = vadd.f32 %v449_v21, %v429_v31 }
  0x7a   : > { %v466_v35 = vadd.f32 %v450_v27, %v430_v33  ;;  %v558_v38 = vrot.slane %v497_v3, 1  ;;  %v559_v39 = vrot.slane %v498_v20, 1  ;;  %v561_v41 = vrot.slane %v499_v5, 1 }
  0x7b   : > { %v622_v42 = vmul.f32 %v3332_v23, %v3708_v62  ;;  %v623_v18 = vmul.f32 %v3332_v23, %v3725_v19  ;;  %1315 = vmatmul.bf16.gmra.mxu0 %v1217_v6  ;;  %v681_v44 = vrot.slane %v621_v15, 1  ;;  %v744_v7 = vmul.f32 %v3350_v32, %v3702_v63  ;;  %v3752_v23 = vld [vmem:[%s4815_s3] ss:$0 sm:$0xff] }
  0x7c   : > { %v745_v40 = vmul.f32 %v3350_v32, %v3706_v2  ;;  %v746_v46 = vmul.f32 %v3350_v32, %v3733_v30  ;;  %v560_v47 = vsel %vm527_vm0, %v558_v38, %v559_v39  ;;  %v562_v49 = vsel %vm527_vm0, %v559_v39, %v561_v41 }
  0x7d   : > { %v682_v50 = vrot.slane %v622_v42, 1  ;;  %v684_v51 = vrot.slane %v623_v18, 1  ;;  %v596_v53 = vadd.f32 %v560_v47, %v465_v34  ;;  %v597_v54 = vadd.f32 %v562_v49, %v466_v35  ;;  %v3784_v18 = vld [vmem:[%s4813_s1] ss:$0 sm:$0xff] }
  0x7e   : > { %v804_v56 = vrot.slane %v744_v7, 1  ;;  %v805_v57 = vrot.slane %v745_v40, 1  ;;  %v807_v32 = vrot.slane %v746_v46, 1  ;;  %v866_v22 = vmul.f32 %v3363_v45, %v3628_v36 }
  0x7f   : > { %v683_v58 = vsel %vm527_vm0, %v681_v44, %v682_v50  ;;  %v685_v59 = vsel %vm527_vm0, %v682_v50, %v684_v51  ;;  %v867_v48 = vmul.f32 %v3363_v45, %v3630_v37  ;;  %v868_v10 = vmul.f32 %v3363_v45, %v3654_v17  ;;  %v3795_v50 = vld [vmem:[%s4813_s1 + $0x3] ss:$0 sm:$0xff] }
  0x80   : > { %v719_v60 = vadd.f32 %v683_v58, %v596_v53  ;;  %v720_v61 = vadd.f32 %v685_v59, %v597_v54  ;;  %v806_v43 = vsel %vm527_vm0, %v804_v56, %v805_v57  ;;  %v808_v4 = vsel %vm527_vm0, %v805_v57, %v807_v32  ;;  %v3804_v54 = vld [vmem:[%s4813_s1 + $0x6] ss:$0 sm:$0xff] }
  0x81   : > { %v927_v11 = vrot.slane %v866_v22, 2  ;;  %v989_v13 = vmul.f32 %v3379_v55, %v3678_v29  ;;  %v928_v26 = vrot.slane %v867_v48, 2  ;;  %v930_v12 = vrot.slane %v868_v10, 2  ;;  %v3814_v22 = vld [vmem:[%s4813_s1 + $0x1] ss:$0 sm:$0xff] }
  0x82   : > { %v842_v24 = vadd.f32 %v806_v43, %v719_v60  ;;  %v843_v25 = vadd.f32 %v808_v4, %v720_v61  ;;  %v990_v8 = vmul.f32 %v3379_v55, %v3708_v62  ;;  %v991_v21 = vmul.f32 %v3379_v55, %v3725_v19 }
  0x83   : > { %v1049_v27 = vrot.slane %v989_v13, 2  ;;  %v929_v28 = vsel %vm896_vm1, %v927_v11, %v928_v26  ;;  %v1111_v31 = vmul.f32 %v3387_v0, %v3702_v63  ;;  %v1112_v33 = vmul.f32 %v3387_v0, %v3706_v2  ;;  %v3825_v13 = vld [vmem:[%s4813_s1 + $0x4] ss:$0 sm:$0xff] }
  0x84   : > { %v1113_v3 = vmul.f32 %v3387_v0, %v3733_v30  ;;  %v931_v20 = vsel %vm896_vm1, %v928_v26, %v930_v12  ;;  %v965_v5 = vadd.f32 %v929_v28, %v842_v24  ;;  %v1050_v15 = vrot.slane %v990_v8, 2  ;;  %v3837_v28 = vld [vmem:[%s4813_s1 + $0x7] ss:$0 sm:$0xff] }
  0x85   : > { %v1052_v6 = vrot.slane %v991_v21, 2  ;;  %v966_v34 = vadd.f32 %v931_v20, %v843_v25  ;;  %v1171_v35 = vrot.slane %v1111_v31, 2  ;;  %v1172_v38 = vrot.slane %v1112_v33, 2 }
  0x86   : > { %v1174_v39 = vrot.slane %v1113_v3, 2  ;;  %v1051_v41 = vsel %vm896_vm1, %v1049_v27, %v1050_v15  ;;  %v375_v0 = vmul.f32 %v3784_v18, %v3553_v52  ;;  %v376_v44 = vmul.f32 %v3784_v18, %v3558_v16 }
  0x87   : > { %v1053_v42 = vsel %vm896_vm1, %v1050_v15, %v1052_v6  ;;  %v1087_v7 = vadd.f32 %v1051_v41, %v965_v5  ;;  %v1173_v46 = vsel %vm896_vm1, %v1171_v35, %v1172_v38  ;;  %v411_v51 = vmul.f32 %v3795_v50, %v3628_v36 }
  0x88   : > { %v1088_v40 = vadd.f32 %v1053_v42, %v966_v34  ;;  %v1175_v47 = vsel %vm896_vm1, %v1172_v38, %v1174_v39  ;;  %v412_v53 = vmul.f32 %v3795_v50, %v3630_v37  ;;  %v447_v56 = vmul.f32 %v3804_v54, %v3678_v29 }
  0x89   : > { %v448_v57 = vmul.f32 %v3804_v54, %v3708_v62  ;;  %v1209_v59 = vadd.f32 %v1173_v46, %v1087_v7  ;;  %v494_v60 = vmul.f32 %v3814_v22, %v3553_v52  ;;  %v427_v61 = vadd.f32 %v411_v51, %v375_v0  ;;  %v3854_v7 = vld [vmem:[%s4813_s1 + $0x2] ss:$0 sm:$0xff] }
  0x8a   : > { %v1210_v32 = vadd.f32 %v1175_v47, %v1088_v40  ;;  %v428_v43 = vadd.f32 %v412_v53, %v376_v44  ;;  %v495_v48 = vmul.f32 %v3814_v22, %v3558_v16  ;;  %v618_v24 = vmul.f32 %v3825_v13, %v3628_v36 }
  0x8b   : > { %v553_v11 = vrot.slane %v494_v60, 1  ;;  %v463_v25 = vadd.f32 %v447_v56, %v427_v61  ;;  %v620_v21 = vmul.f32 %v3825_v13, %v3654_v17  ;;  %v741_v31 = vmul.f32 %v3837_v28, %v3678_v29 }
  0x8c   : > { %v1219_v10 = vpack.c.bf16 %v1210_v32, %v1209_v59  ;;  %v464_v26 = vadd.f32 %v448_v57, %v428_v43  ;;  %v554_v12 = vrot.slane %v495_v48, 1  ;;  %v676_v27 = vrot.slane %v618_v24, 1 }
  0x8d   : > { %v742_v20 = vmul.f32 %v3837_v28, %v3708_v62  ;;  %v743_v5 = vmul.f32 %v3837_v28, %v3725_v19  ;;  %v679_v35 = vrot.slane %v620_v21, 1  ;;  %v799_v38 = vrot.slane %v741_v31, 1 }
  0x8e   : > { %1325 = vmatmul.bf16.vlgmr.msra.gmra.mxu3 %v1219_v10  ;;  %v555_v33 = vsel %vm527_vm0, %v553_v11, %v554_v12  ;;  %v863_v42 = vmul.f32 %v3363_v45, %v3553_v52  ;;  %v864_v40 = vmul.f32 %v3854_v7, %v3558_v16  ;;  %v865_v46 = vmul.f32 %v3854_v7, %v3574_v9  ;;  %v3879_v10 = vld [vmem:[%s4813_s1 + $0x8] ss:$0 sm:$0xff] }
  0x8f   : > { %v594_v15 = vadd.f32 %v555_v33, %v463_v25  ;;  %v800_v39 = vrot.slane %v742_v20, 1  ;;  %v802_v41 = vrot.slane %v743_v5, 1  ;;  %v1108_v11 = vmul.f32 %v3879_v10, %v3678_v29 }
  0x90   : > { %v922_v53 = vrot.slane %v863_v42, 2  ;;  %v923_v56 = vrot.slane %v864_v40, 2  ;;  %v925_v57 = vrot.slane %v865_v46, 2  ;;  %v1109_v24 = vmul.f32 %v3879_v10, %v3708_v62  ;;  %v346_v40 = vld [vmem:[%s3295_s11 + $0x74] sm:$0x1] }
  0x91   : > { %v801_v51 = vsel %vm527_vm0, %v799_v38, %v800_v39  ;;  %v803_v45 = vsel %vm527_vm0, %v800_v39, %v802_v41  ;;  %v1110_v25 = vmul.f32 %v3879_v10, %v3725_v19  ;;  %v415_v21 = vmul.f32 %v3795_v50, %v3702_v63 }
  0x92   : > { %v924_v61 = vsel %vm896_vm1, %v922_v53, %v923_v56  ;;  %v926_v43 = vsel %vm896_vm1, %v923_v56, %v925_v57  ;;  %v1167_v33 = vrot.slane %v1109_v24, 2  ;;  %v416_v5 = vmul.f32 %v3795_v50, %v3706_v2 }
  0x93   : > { %v500_v39 = vmul.f32 %v3814_v22, %v3678_v29  ;;  %v624_v53 = vmul.f32 %v3825_v13, %v3702_v63  ;;  %v869_v24 = vmul.f32 %v3854_v7, %v3678_v29 }
  0xae   : > { %v1296_v1 = vpop.f32.mrf.mxu0 }
  0xaf   : > { %v1297_v14 = vadd.f32 %v3752_v23, %v1296_v1  ;;  %v496_v1 = vmul.f32 %v3814_v22, %v3574_v9  ;;  %v3868_v9 = vld [vmem:[%s4813_s1 + $0x5] ss:$0 sm:$0xff] }
  0xb0   : > { %v987_v60 = vmul.f32 %v3868_v9, %v3630_v37 }
  0xb1   : > { %v556_v8 = vrot.slane %v496_v1, 1 }
  0xb3   : > { %v557_v3 = vsel %vm527_vm0, %v554_v12, %v556_v8  ;;  %v1166_v8 = vrot.slane %v1108_v11, 2 }
  0xb4   : > { %v595_v6 = vadd.f32 %v557_v3, %v464_v26  ;;  %v379_v26 = vmul.f32 %v3784_v18, %v3678_v29  ;;  %v1169_v3 = vrot.slane %v1110_v25, 2 }
  0xb6   : > { %v1298_v49 = vpop.f32.mrf.mxu0 }
  0xb7   : > { %v1299_v58 = vadd.f32 %v3752_v23, %v1298_v49 }
  0xb9   : > { %v1336_v4 = vpack.c.bf16 %v1299_v58, %v1297_v14  ;;  %v619_v14 = vmul.f32 %v3825_v13, %v3630_v37  ;;  %v986_v58 = vmul.f32 %v3379_v55, %v3628_v36  ;;  %v988_v55 = vmul.f32 %v3868_v9, %v3654_v17  ;;  %v344_v17 = vld [vmem:[%s3295_s11 + $0x6c] sm:$0xff]  }
  0xba   : > { %v3902_v38 = vunpack.c.h.bf16 %v344_v17 }
  0xbb   : > { %2893 = vmatmul.msk.bf16.vlgmr.msra.gmra.mxu1 %vm1378_vm2, %v1336_v4  ;;  %v677_v34 = vrot.slane %v619_v14, 1  ;;  %v1044_v36 = vrot.slane %v986_v58, 2  ;;  %v1045_v4 = vrot.slane %v987_v60, 2  ;;  %v1047_v37 = vrot.slane %v988_v55, 2 }
  0xbc   : > { %v380_v14 = vmul.f32 %v3784_v18, %v3708_v62  ;;  %v1170_v18 = vsel %vm896_vm1, %v1167_v33, %v1169_v3  ;;  %v452_v46 = vmul.f32 %v3804_v54, %v3902_v38  ;;  %v748_v55 = vmul.f32 %v3837_v28, %v3902_v38 }
  0xbd   : > { %v678_v0 = vsel %vm527_vm0, %v676_v27, %v677_v34  ;;  %v680_v44 = vsel %vm527_vm0, %v677_v34, %v679_v35  ;;  %v1046_v12 = vsel %vm896_vm1, %v1044_v36, %v1045_v4  ;;  %v1048_v27 = vsel %vm896_vm1, %v1045_v4, %v1047_v37 }
  0xbe   : > { %v717_v47 = vadd.f32 %v678_v0, %v594_v15  ;;  %v718_v49 = vadd.f32 %v680_v44, %v595_v6  ;;  %v431_v15 = vadd.f32 %v415_v21, %v379_v26  ;;  %v3898_v6 = vunpack.c.l.bf16 %v344_v17 }
  0xbf   : > { %v1168_v35 = vsel %vm896_vm1, %v1166_v8, %v1167_v33  ;;  %v432_v44 = vadd.f32 %v416_v5, %v380_v14  ;;  %v870_v26 = vmul.f32 %v3854_v7, %v3708_v62  ;;  %v992_v5 = vmul.f32 %v3868_v9, %v3702_v63 }
  0xc0   : > { %v1301_v52 = vpop.f32.mrf.mxu0  ;;  %v840_v32 = vadd.f32 %v801_v51, %v717_v47  ;;  %v841_v16 = vadd.f32 %v803_v45, %v718_v49  ;;  %v451_v50 = vmul.f32 %v3804_v54, %v3898_v6  ;;  %v501_v47 = vmul.f32 %v3814_v22, %v3708_v62 }
  0xc1   : > { %v1302_v59 = vadd.f32 %v3752_v23, %v1301_v52  ;;  %v502_v49 = vmul.f32 %v3814_v22, %v3725_v19  ;;  %v563_v52 = vrot.slane %v500_v39, 1  ;;  %v468_v57 = vadd.f32 %v452_v46, %v432_v44 }
  0xc2   : > { %v963_v48 = vadd.f32 %v924_v61, %v840_v32  ;;  %v964_v1 = vadd.f32 %v926_v43, %v841_v16  ;;  %v467_v56 = vadd.f32 %v451_v50, %v431_v15  ;;  %v564_v58 = vrot.slane %v501_v47, 1 }
  0xc3   : > { %v566_v32 = vrot.slane %v502_v49, 1  ;;  %v625_v54 = vmul.f32 %v3825_v13, %v3706_v2  ;;  %v626_v16 = vmul.f32 %v3825_v13, %v3733_v30  ;;  %v686_v22 = vrot.slane %v624_v53, 1 }
  0xc4   : > { %v1085_v31 = vadd.f32 %v1046_v12, %v963_v48  ;;  %v1086_v20 = vadd.f32 %v1048_v27, %v964_v1  ;;  %v565_v60 = vsel %vm527_vm0, %v563_v52, %v564_v58  ;;  %v747_v43 = vmul.f32 %v3837_v28, %v3898_v6 }
  0xc5   : > { %v567_v61 = vsel %vm527_vm0, %v564_v58, %v566_v32  ;;  %v598_v36 = vadd.f32 %v565_v60, %v467_v56  ;;  %v687_v1 = vrot.slane %v625_v54, 1  ;;  %v689_v4 = vrot.slane %v626_v16, 1 }
  0xc6   : > { %v1207_v42 = vadd.f32 %v1168_v35, %v1085_v31  ;;  %v1208_v0 = vadd.f32 %v1170_v18, %v1086_v20  ;;  %v599_v48 = vadd.f32 %v567_v61, %v468_v57  ;;  %v809_v37 = vrot.slane %v747_v43, 1 }
  0xc7   : > { %v810_v13 = vrot.slane %v748_v55, 1  ;;  %v688_v25 = vsel %vm527_vm0, %v686_v22, %v687_v1  ;;  %v690_v17 = vsel %vm527_vm0, %v687_v1, %v689_v4  ;;  %v871_v12 = vmul.f32 %v3854_v7, %v3725_v19  ;;  %v3969_v55 = vld [vmem:[%s4815_s3 + $0x1] ss:$0 sm:$0xff] }
  0xc8   : > { %v1303_v34 = vpop.f32.mrf.mxu0  ;;  %v1218_v45 = vpack.c.bf16 %v1208_v0, %v1207_v42  ;;  %v721_v14 = vadd.f32 %v688_v25, %v598_v36  ;;  %v722_v21 = vadd.f32 %v690_v17, %v599_v48  ;;  %v932_v31 = vrot.slane %v869_v24, 2 }
  0xc9   : > { %v1304_v41 = vadd.f32 %v3752_v23, %v1303_v34  ;;  %v933_v33 = vrot.slane %v870_v26, 2  ;;  %v935_v3 = vrot.slane %v871_v12, 2  ;;  %v993_v62 = vmul.f32 %v3868_v9, %v3706_v2 }
  0xca   : > { %1320 = vmatmul.bf16.gmra.mxu0 %v1218_v45  ;;  %v994_v34 = vmul.f32 %v3868_v9, %v3733_v30  ;;  %v1054_v18 = vrot.slane %v992_v5, 2  ;;  %v1115_v63 = vmul.f32 %v3879_v10, %v3902_v38 }
  0xcb   : > { %v1337_v51 = vpack.c.bf16 %v1304_v41, %v1302_v59  ;;  %v724_v59 = vunpack.c.l.bf16 %v346_v40  ;;  %v934_v19 = vsel %vm896_vm1, %v932_v31, %v933_v33  ;;  %v936_v7 = vsel %vm896_vm1, %v933_v33, %v935_v3 }
  0xcc   : > { %v1055_v39 = vrot.slane %v993_v62, 2  ;;  %v1114_v41 = vmul.f32 %v3879_v10, %v3898_v6  ;;  %v1057_v0 = vrot.slane %v994_v34, 2  ;;  %v1177_v46 = vrot.slane %v1115_v63, 2 }
  0xcd   : > { %2894 = vmatmul.msk.bf16.gmra.mxu1 %vm1378_vm2, %v1337_v51  ;;  %v749_v11 = vmul.f32 %v3837_v28, %v724_v59  ;;  %v811_v28 = vsel %vm527_vm0, %v809_v37, %v810_v13  ;;  %v1116_v2 = vmul.f32 %v3879_v10, %v724_v59 }
  0xce   : > { %v844_v20 = vadd.f32 %v811_v28, %v721_v14  ;;  %v1056_v40 = vsel %vm896_vm1, %v1054_v18, %v1055_v39  ;;  %v1176_v50 = vrot.slane %v1114_v41, 2  ;;  %v1058_v30 = vsel %vm896_vm1, %v1055_v39, %v1057_v0 }
  0xcf   : > { %v812_v27 = vrot.slane %v749_v11, 1  ;;  %v1179_v47 = vrot.slane %v1116_v2, 2 }
  0xd0   : > { %v967_v35 = vadd.f32 %v934_v19, %v844_v20  ;;  %v1178_v6 = vsel %vm896_vm1, %v1176_v50, %v1177_v46 }
  0xd1   : > { %v813_v29 = vsel %vm527_vm0, %v810_v13, %v812_v27  ;;  %v1180_v45 = vsel %vm896_vm1, %v1177_v46, %v1179_v47 }
  0xd2   : > { %v845_v15 = vadd.f32 %v813_v29, %v722_v21  ;;  %v1089_v9 = vadd.f32 %v1056_v40, %v967_v35 }
  0xd3   : > { %v1306_v8 = vpop.f32.mrf.mxu0 }
  0xd4   : > { %v968_v42 = vadd.f32 %v936_v7, %v845_v15  ;;  %v1307_v44 = vadd.f32 %v3752_v23, %v1306_v8  ;;  %v1211_v52 = vadd.f32 %v1178_v6, %v1089_v9 }
  0xd6   : > { %v1090_v49 = vadd.f32 %v1058_v30, %v968_v42 }
  0xd8   : > { %v1212_v10 = vadd.f32 %v1180_v45, %v1090_v49 }
  0xda   : > { %v1220_v56 = vpack.c.bf16 %v1212_v10, %v1211_v52 }
  0xdb   : > { %v1308_v51 = vpop.f32.mrf.mxu0 }
  0xdc   : > { %v1309_v38 = vadd.f32 %v3752_v23, %v1308_v51  ;;  %1330 = vmatmul.bf16.gmra.mxu3 %v1220_v56 }
  0xde   : > { %v1338_v53 = vpack.c.bf16 %v1309_v38, %v1307_v44  ;;  %v3191_v44 = vmov 64.0  }
  0xdf   : > { %3042 = vrcp.f32 %v3191_v44 }
  0xe0   : > { %2895 = vmatmul.msk.bf16.gmra.mxu1 %vm1378_vm2, %v1338_v53 }
  0xe5   : > { %v1311_v57 = vpop.f32.mrf.mxu0  ;;  %v3043_v40 = vpop.eup %3042 }
  0xe6   : > { %v1312_v58 = vadd.f32 %v3752_v23, %v1311_v57  ;;  %v1501_v50 = vmul.f32 64.0, %v3043_v40  ;;  %vm1505_vm3 = vweird.f32 %v3043_v40 }
  0xe8   : > { %v1502_v30 = vsub.f32 1.0, %v1501_v50 }
  0xea   : > { %v1503_v9 = vmul.f32 %v3043_v40, %v1502_v30 }
  0xec   : > { %v1504_v46 = vadd.f32 %v3043_v40, %v1503_v9 }
  0xed   : > { %v1313_v32 = vpop.f32.mrf.mxu0 }
  0xee   : > { %v1314_v54 = vadd.f32 %v3752_v23, %v1313_v32 }
  0xf0   : > { %v1339_v16 = vpack.c.bf16 %v1314_v54, %v1312_v58 }
  0xf2   : > { %2896 = vmatmul.msk.bf16.gmra.mxu1 %vm1378_vm2, %v1339_v16 }
  0xf8   : > { %v1316_v22 = vpop.f32.mrf.mxu0 }
  0xf9   : > { %v1317_v59 = vadd.f32 %v3752_v23, %v1316_v22 }
 0x100   : > { %v1318_v60 = vpop.f32.mrf.mxu0 }
 0x101   : > { %v1319_v61 = vadd.f32 %v3752_v23, %v1318_v60 }
 0x103   : > { %v1340_v43 = vpack.c.bf16 %v1319_v61, %v1317_v59 }
 0x105   : > { %2897 = vmatmul.msk.bf16.gmra.mxu1 %vm1378_vm2, %v1340_v43 }
 0x111   : > { %v1326_v26 = vpop.f32.mrf.mxu3 }
 0x112   : > { %v1327_v20 = vadd.f32 %v3752_v23, %v1326_v26 }
 0x119   : > { %v1328_v33 = vpop.f32.mrf.mxu3 }
 0x11a   : > { %v1329_v5 = vadd.f32 %v3752_v23, %v1328_v33 }
 0x11c   : > { %v1342_v15 = vpack.c.bf16 %v1329_v5, %v1327_v20 }
 0x138   : > { %v1412_v36 = vpop.f32.mrf.mxu1 }
 0x139   : > { %v1413_v48 = vadd.f32 %v3969_v55, %v1412_v36 }
 0x13b   : > { %v1452_v1 = vsel %vm1378_vm2, %v1413_v48, 0.0 }
 0x13c   : > { %1453 = vadd.xlane.f32.xlu0 %v1452_v1 }
 0x140   : > { %v1414_v4 = vpop.f32.mrf.mxu1 }
 0x141   : > { %v1415_v11 = vadd.f32 %v3969_v55, %v1414_v4 }
 0x143   : > { %v1455_v37 = vsel %vm1378_vm2, %v1415_v11, 0.0 }
 0x144   : > { %1456 = vadd.xlane.f32.xlu0 %v1455_v37 }
 0x147   : > { %v1321_v24 = vpop.f32.mrf.mxu0 }
 0x148   : > { %v1322_v12 = vadd.f32 %v3752_v23, %v1321_v24 }
 0x14a   : > { %v1417_v13 = vpop.f32.mrf.mxu1 }
 0x14b   : > { %v3976_v25 = vadd.f32 %v3969_v55, %v1417_v13 }
 0x14d   : > { %v1458_v17 = vsel %vm1378_vm2, %v3976_v25, 0.0 }
 0x14e   : > { %1459 = vadd.xlane.f32.xlu1 %v1458_v17 }
 0x14f   : > { %v1323_v14 = vpop.f32.mrf.mxu0 }
 0x150   : > { %v1324_v28 = vadd.f32 %v3752_v23, %v1323_v14 }
 0x152   : > { %v1419_v8 = vpop.f32.mrf.mxu1  ;;  %v1341_v27 = vpack.c.bf16 %v1324_v28, %v1322_v12 }
 0x153   : > { %v3982_v21 = vadd.f32 %v3969_v55, %v1419_v8 }
 0x154   : > { %2898 = vmatmul.msk.bf16.gmra.mxu1 %vm1378_vm2, %v1341_v27 }
 0x155   : > { %v1461_v31 = vsel %vm1378_vm2, %v3982_v21, 0.0 }
 0x156   : > { %1462 = vadd.xlane.f32.xlu1 %v1461_v31 }
 0x15d   : > { %v1422_v3 = vpop.f32.mrf.mxu1 }
 0x15e   : > { %v3989_v29 = vadd.f32 %v3969_v55, %v1422_v3 }
 0x15f   : > { %v1331_v19 = vpop.f32.mrf.mxu3 }
 0x160   : > { %v1464_v62 = vsel %vm1378_vm2, %v3989_v29, 0.0  ;;  %v1332_v18 = vadd.f32 %v3752_v23, %v1331_v19 }
 0x161   : > { %1465 = vadd.xlane.f32.xlu2 %v1464_v62 }
 0x164   : > { %2899 = vmatmul.msk.bf16.gmra.mxu1 %vm1378_vm2, %v1342_v15 }
 0x165   : > { %v1424_v7 = vpop.f32.mrf.mxu1 }
 0x166   : > { %v3996_v34 = vadd.f32 %v3969_v55, %v1424_v7 }
 0x167   : > { %v1333_v39 = vpop.f32.mrf.mxu3 }
 0x168   : > { %v1467_v35 = vsel %vm1378_vm2, %v3996_v34, 0.0  ;;  %v1334_v41 = vadd.f32 %v3752_v23, %v1333_v39  ;;  %v4009_v23 = vsel %vm1505_vm3, %v3043_v40, %v1504_v46 }
 0x169   : > { %1468 = vadd.xlane.f32.xlu2 %v1467_v35 }
 0x16a   : > { %v1343_v42 = vpack.c.bf16 %v1334_v41, %v1332_v18 }
 0x16c   : > { %2900 = vmatmul.msk.bf16.vlgmr.msrb.gmra.mxu3 %vm1378_vm2, %v1343_v42 }
 0x16f   : > { %v1427_v0 = vpop.f32.mrf.mxu1 }
 0x170   : > { %v4005_v63 = vadd.f32 %v3969_v55, %v1427_v0 }
 0x172   : > { %v1470_v2 = vsel %vm1378_vm2, %v4005_v63, 0.0 }
 0x173   : > { %1471 = vadd.xlane.f32.xlu2 %v1470_v2 }
 0x177   : > { %v1429_v45 = vpop.f32.mrf.mxu1 }
 0x178   : > { %v4019_v53 = vadd.f32 %v3969_v55, %v1429_v45 }
 0x17a   : > { %v1473_v32 = vsel %vm1378_vm2, %v4019_v53, 0.0 }
 0x182   : > { %v1432_v58 = vpop.f32.mrf.mxu1 }
 0x183   : > { %v4029_v16 = vadd.f32 %v3969_v55, %v1432_v58 }
 0x185   : > { %v1476_v60 = vsel %vm1378_vm2, %v4029_v16, 0.0 }
 0x18a   : > { %v1434_v36 = vpop.f32.mrf.mxu1 }
 0x1af   : > { %v1454_v47 = vpop.xlane.xlu0 %1453 }
 0x1b0   : > { %v1507_v49 = vmul.f32 %v4009_v23, %v1454_v47 }
 0x1b2   : > { %v4012_v51 = vsub.f32 %v1413_v48, %v1507_v49 }
 0x1b4   : > { %v1539_v6 = vmul.f32 %v4012_v51, %v4012_v51 }
 0x1b6   : > { %v1555_v38 = vsel %vm1378_vm2, %v1539_v6, 0.0 }
 0x1b7   : > { %1556 = vadd.xlane.f32.xlu0 %v1555_v38  ;;  %v1457_v52 = vpop.xlane.xlu0 %1456 }
 0x1b8   : > { %v1508_v10 = vmul.f32 %v4009_v23, %v1457_v52 }
 0x1ba   : > { %v4021_v56 = vsub.f32 %v1415_v11, %v1508_v10  ;;  %v4042_v11 = vadd.f32 %v3969_v55, %v1434_v36 }
 0x1bc   : > { %v1540_v57 = vmul.f32 %v4021_v56, %v4021_v56  ;;  %v1479_v24 = vsel %vm1378_vm2, %v4042_v11, 0.0 }
 0x1be   : > { %v1558_v54 = vsel %vm1378_vm2, %v1540_v57, 0.0 }
 0x1bf   : > { %1474 = vadd.xlane.f32.xlu0 %v1473_v32  ;;  %1559 = vadd.xlane.f32.xlu1 %v1558_v54 }
 0x1c1   : > { %v1460_v22 = vpop.xlane.xlu1 %1459 }
 0x1c2   : > { %v1509_v59 = vmul.f32 %v4009_v23, %v1460_v22 }
 0x1c4   : > { %v4035_v61 = vsub.f32 %v3976_v25, %v1509_v59 }
 0x1c6   : > { %v1541_v43 = vmul.f32 %v4035_v61, %v4035_v61 }
 0x1c7   : > { %1477 = vadd.xlane.f32.xlu0 %v1476_v60 }
 0x1c8   : > { %v1561_v48 = vsel %vm1378_vm2, %v1541_v43, 0.0 }
 0x1c9   : > { %v1463_v1 = vpop.xlane.xlu1 %1462  ;;  %1562 = vadd.xlane.f32.xlu1 %v1561_v48 }
 0x1ca   : > { %v1510_v4 = vmul.f32 %v4009_v23, %v1463_v1 }
 0x1cc   : > { %v4045_v37 = vsub.f32 %v3982_v21, %v1510_v4 }
 0x1ce   : > { %v1542_v13 = vmul.f32 %v4045_v37, %v4045_v37 }
 0x1d0   : > { %v1564_v25 = vsel %vm1378_vm2, %v1542_v13, 0.0 }
 0x1d1   : > { %1565 = vadd.xlane.f32.xlu2 %v1564_v25  ;;  %1480 = vadd.xlane.f32.xlu1 %v1479_v24  ;;  %v1437_v12 = vpop.f32.mrf.mxu1 }
 0x1d2   : > { %v4054_v8 = vadd.f32 %v3969_v55, %v1437_v12 }
 0x1d4   : > { %v1466_v17 = vpop.xlane.xlu2 %1465  ;;  %v1482_v21 = vsel %vm1378_vm2, %v4054_v8, 0.0 }
 0x1d5   : > { %v1511_v26 = vmul.f32 %v4009_v23, %v1466_v17 }
 0x1d7   : > { %v4057_v14 = vsub.f32 %v3989_v29, %v1511_v26  ;;  %v4120_v26 = vld [vmem:[%s4815_s3 + $0x2] ss:$0 sm:$0xff] }
 0x1d9   : > { %v1543_v28 = vmul.f32 %v4057_v14, %v4057_v14  ;;  %1483 = vadd.xlane.f32.xlu1 %v1482_v21  ;;  %v1439_v3 = vpop.f32.mrf.mxu1 }
 0x1da   : > { %v4066_v20 = vadd.f32 %v3969_v55, %v1439_v3 }
 0x1db   : > { %v1567_v27 = vsel %vm1378_vm2, %v1543_v28, 0.0 }
 0x1dc   : > { %v1469_v31 = vpop.xlane.xlu2 %1468  ;;  %1568 = vadd.xlane.f32.xlu2 %v1567_v27  ;;  %v1485_v5 = vsel %vm1378_vm2, %v4066_v20, 0.0 }
 0x1dd   : > { %v1512_v33 = vmul.f32 %v4009_v23, %v1469_v31  ;;  %v4129_v31 = vld [vmem:[%s4815_s3 + $0x3] ss:$0 sm:$0xff] }
 0x1df   : > { %v4069_v29 = vsub.f32 %v3996_v34, %v1512_v33 }
 0x1e1   : > { %v1544_v62 = vmul.f32 %v4069_v29, %v4069_v29  ;;  %v1442_v19 = vpop.f32.mrf.mxu1 }
 0x1e2   : > { %v4077_v7 = vadd.f32 %v3969_v55, %v1442_v19 }
 0x1e3   : > { %v1570_v15 = vsel %vm1378_vm2, %v1544_v62, 0.0 }
 0x1e4   : > { %1486 = vadd.xlane.f32.xlu2 %v1485_v5  ;;  %1571 = vadd.xlane.f32.xlu0 %v1570_v15  ;;  %v1488_v34 = vsel %vm1378_vm2, %v4077_v7, 0.0 }
 0x1e6   : > { %v1472_v35 = vpop.xlane.xlu2 %1471 }
 0x1e7   : > { %v1513_v18 = vmul.f32 %v4009_v23, %v1472_v35 }
 0x1e9   : > { %v4083_v39 = vsub.f32 %v4005_v63, %v1513_v18  ;;  %v1444_v42 = vpop.f32.mrf.mxu1 }
 0x1ea   : > { %v4089_v2 = vadd.f32 %v3969_v55, %v1444_v42 }
 0x1eb   : > { %v1545_v41 = vmul.f32 %v4083_v39, %v4083_v39 }
 0x1ec   : > { %1489 = vadd.xlane.f32.xlu2 %v1488_v34  ;;  %v1491_v40 = vsel %vm1378_vm2, %v4089_v2, 0.0 }
 0x1ed   : > { %v1573_v0 = vsel %vm1378_vm2, %v1545_v41, 0.0 }
 0x1ee   : > { %1574 = vadd.xlane.f32.xlu0 %v1573_v0 }
 0x1ef   : > { %v1447_v44 = vpop.f32.mrf.mxu3 }
 0x1f0   : > { %v4109_v1 = vadd.f32 %v3969_v55, %v1447_v44 }
 0x1f6   : > { %1492 = vadd.xlane.f32.xlu0 %v1491_v40 }
 0x1f7   : > { %v1449_v50 = vpop.f32.mrf.mxu3 }
 0x1f8   : > { %v4094_v63 = vadd.f32 %v3969_v55, %v1449_v50 }
 0x1fa   : > { %v1497_v30 = vsel %vm1378_vm2, %v4094_v63, 0.0 }
 0x1fb   : > { %1498 = vadd.xlane.f32.xlu2 %v1497_v30 }
 0x22a   : > { %v1557_v9 = vpop.xlane.xlu0 %1556 }
 0x22b   : > { %v1603_v46 = vmul.f32 %v1557_v9, %v4009_v23 }
 0x22d   : > { %v1619_v47 = vadd.f32 1e-05, %v1603_v46 }
 0x22f   : > { %3044 = vrsqrt.f32 %v1619_v47  ;;  %vm1641_vm5 = vweird.f32 %v1619_v47 }
 0x232   : > { %v1560_v49 = vpop.xlane.xlu1 %1559  ;;  %v1475_v6 = vpop.xlane.xlu0 %1474 }
 0x233   : > { %v1604_v45 = vmul.f32 %v1560_v49, %v4009_v23  ;;  %v1514_v38 = vmul.f32 %v4009_v23, %v1475_v6 }
 0x235   : > { %v3045_v52 = vpop.eup %3044  ;;  %v1620_v10 = vadd.f32 1e-05, %v1604_v45  ;;  %v4102_v57 = vsub.f32 %v4019_v53, %v1514_v38 }
 0x236   : > { %v1636_v58 = vmul.f32 %v3045_v52, %v1619_v47  ;;  %vm1642_vm4 = vweird.f32 %v3045_v52 }
 0x237   : > { %3046 = vrsqrt.f32 %v1620_v10  ;;  %v1546_v32 = vmul.f32 %v4102_v57, %v4102_v57  ;;  %vm1643_vm6 = vmor %vm1641_vm5, %vm1642_vm4  ;;  %vm1651_vm8 = vweird.f32 %v1620_v10 }
 0x238   : > { %v1637_v54 = vmul.f32 %v3045_v52, %v1636_v58 }
 0x239   : > { %v1576_v22 = vsel %vm1378_vm2, %v1546_v32, 0.0 }
 0x23a   : > { %v1638_v59 = vmul.f32 0.5, %v1637_v54  ;;  %1577 = vadd.xlane.f32.xlu1 %v1576_v22  ;;  %v1478_v60 = vpop.xlane.xlu0 %1477 }
 0x23b   : > { %v1515_v43 = vmul.f32 %v4009_v23, %v1478_v60 }
 0x23c   : > { %v1639_v36 = vsub.f32 1.5, %v1638_v59  ;;  %v1563_v53 = vpop.xlane.xlu1 %1562 }
 0x23d   : > { %v3047_v48 = vpop.eup %3046  ;;  %v4112_v4 = vsub.f32 %v4029_v16, %v1515_v43  ;;  %v1605_v25 = vmul.f32 %v1563_v53, %v4009_v23  ;;  %v1494_v16 = vsel %vm1378_vm2, %v4109_v1, 0.0 }
 0x23e   : > { %v1640_v13 = vmul.f32 %v3045_v52, %v1639_v36  ;;  %v1646_v24 = vmul.f32 %v3047_v48, %v1620_v10  ;;  %vm1652_vm7 = vweird.f32 %v3047_v48 }
 0x23f   : > { %v1547_v17 = vmul.f32 %v4112_v4, %v4112_v4  ;;  %v1621_v21 = vadd.f32 1e-05, %v1605_v25  ;;  %vm1653_vm9 = vmor %vm1651_vm8, %vm1652_vm7 }
 0x240   : > { %v1644_v55 = vsel %vm1643_vm6, %v3045_v52, %v1640_v13  ;;  %v1647_v12 = vmul.f32 %v3047_v48, %v1646_v24 }
 0x241   : > { %v1579_v28 = vsel %vm1378_vm2, %v1547_v17, 0.0  ;;  %v1795_v27 = vmul.f32 %v1644_v55, %v4012_v51  ;;  %3048 = vrsqrt.f32 %v1621_v21  ;;  %vm1661_vm11 = vweird.f32 %v1621_v21 }
 0x242   : > { %v1648_v33 = vmul.f32 0.5, %v1647_v12  ;;  %1495 = vadd.xlane.f32.xlu1 %v1494_v16  ;;  %1580 = vadd.xlane.f32.xlu0 %v1579_v28 }
 0x243   : > { %v1813_v3 = vmul.f32 %v4120_v26, %v1795_v27 }
 0x244   : > { %v1649_v5 = vsub.f32 1.5, %v1648_v33  ;;  %v1566_v62 = vpop.xlane.xlu2 %1565  ;;  %v1481_v15 = vpop.xlane.xlu1 %1480 }
 0x245   : > { %v4133_v19 = vadd.f32 %v4129_v31, %v1813_v3  ;;  %v1606_v51 = vmul.f32 %v1566_v62, %v4009_v23  ;;  %v1516_v18 = vmul.f32 %v4009_v23, %v1481_v15 }
 0x246   : > { %v1650_v35 = vmul.f32 %v3047_v48, %v1649_v5 }
 0x247   : > { %v1847_v34 = vmul.f32 %v4133_v19, %v4133_v19  ;;  %v3049_v41 = vpop.eup %3048  ;;  %v1622_v0 = vadd.f32 1e-05, %v1606_v51  ;;  %v4140_v44 = vsub.f32 %v4042_v11, %v1516_v18 }
 0x248   : > { %v1654_v42 = vsel %vm1653_vm9, %v3047_v48, %v1650_v35  ;;  %v1656_v40 = vmul.f32 %v3049_v41, %v1621_v21  ;;  %vm1662_vm10 = vweird.f32 %v3049_v41 }
 0x249   : > { %v1863_v50 = vsel %vm1378_vm2, %v1847_v34, 0.0  ;;  %v1796_v30 = vmul.f32 %v1654_v42, %v4021_v56  ;;  %3050 = vrsqrt.f32 %v1622_v0  ;;  %v1548_v9 = vmul.f32 %v4140_v44, %v4140_v44  ;;  %vm1663_vm12 = vmor %vm1661_vm11, %vm1662_vm10 }
 0x24a   : > { %1864 = vadd.xlane.f32.xlu2 %v1863_v50  ;;  %v1657_v46 = vmul.f32 %v3049_v41, %v1656_v40  ;;  %vm1671_vm14 = vweird.f32 %v1622_v0 }
 0x24b   : > { %v1814_v47 = vmul.f32 %v4120_v26, %v1796_v30  ;;  %v1582_v49 = vsel %vm1378_vm2, %v1548_v9, 0.0 }
 0x24c   : > { %v1658_v6 = vmul.f32 0.5, %v1657_v46  ;;  %v1484_v45 = vpop.xlane.xlu1 %1483  ;;  %1583 = vadd.xlane.f32.xlu1 %v1582_v49 }
 0x24d   : > { %v4149_v11 = vadd.f32 %v4129_v31, %v1814_v47  ;;  %v1517_v38 = vmul.f32 %v4009_v23, %v1484_v45 }
 0x24e   : > { %v1659_v52 = vsub.f32 1.5, %v1658_v6 }
 0x24f   : > { %v1569_v56 = vpop.xlane.xlu2 %1568  ;;  %v1848_v10 = vmul.f32 %v4149_v11, %v4149_v11  ;;  %v3051_v58 = vpop.eup %3050  ;;  %v4156_v54 = vsub.f32 %v4054_v8, %v1517_v38 }
 0x250   : > { %v1607_v32 = vmul.f32 %v1569_v56, %v4009_v23  ;;  %v1660_v22 = vmul.f32 %v3049_v41, %v1659_v52  ;;  %v1666_v59 = vmul.f32 %v3051_v58, %v1622_v0  ;;  %vm1672_vm13 = vweird.f32 %v3051_v58 }
 0x251   : > { %v1866_v60 = vsel %vm1378_vm2, %v1848_v10, 0.0  ;;  %v1549_v36 = vmul.f32 %v4156_v54, %v4156_v54  ;;  %vm1673_vm15 = vmor %vm1671_vm14, %vm1672_vm13 }
 0x252   : > { %v1623_v43 = vadd.f32 1e-05, %v1607_v32  ;;  %1867 = vadd.xlane.f32.xlu0 %v1866_v60  ;;  %v1664_v48 = vsel %vm1663_vm12, %v3049_v41, %v1660_v22  ;;  %v1667_v53 = vmul.f32 %v3051_v58, %v1666_v59 }
 0x253   : > { %v1585_v13 = vsel %vm1378_vm2, %v1549_v36, 0.0  ;;  %v1797_v24 = vmul.f32 %v1664_v48, %v4035_v61 }
 0x254   : > { %3052 = vrsqrt.f32 %v1623_v43  ;;  %v1668_v8 = vmul.f32 0.5, %v1667_v53  ;;  %1586 = vadd.xlane.f32.xlu1 %v1585_v13  ;;  %vm1681_vm1 = vweird.f32 %v1623_v43 }
 0x255   : > { %v1815_v25 = vmul.f32 %v4120_v26, %v1797_v24 }
 0x256   : > { %v1669_v17 = vsub.f32 1.5, %v1668_v8 }
 0x257   : > { %v1487_v55 = vpop.xlane.xlu2 %1486  ;;  %v4165_v21 = vpop.xlane.xlu0 %1571  ;;  %v4168_v16 = vadd.f32 %v4129_v31, %v1815_v25 }
 0x258   : > { %v1518_v12 = vmul.f32 %v4009_v23, %v1487_v55  ;;  %v1670_v28 = vmul.f32 %v3051_v58, %v1669_v17 }
 0x259   : > { %v1849_v33 = vmul.f32 %v4168_v16, %v4168_v16 }
 0x25a   : > { %v3053_v27 = vpop.eup %3052  ;;  %v4171_v61 = vsub.f32 %v4066_v20, %v1518_v12  ;;  %v1674_v3 = vsel %vm1673_vm15, %v3051_v58, %v1670_v28 }
 0x25b   : > { %v1676_v5 = vmul.f32 %v3053_v27, %v1623_v43  ;;  %v1869_v15 = vsel %vm1378_vm2, %v1849_v33, 0.0  ;;  %v1798_v51 = vmul.f32 %v1674_v3, %v4045_v37  ;;  %vm1682_vm0 = vweird.f32 %v3053_v27 }
 0x25c   : > { %v1550_v62 = vmul.f32 %v4171_v61, %v4171_v61  ;;  %1870 = vadd.xlane.f32.xlu0 %v1869_v15  ;;  %vm1683_vm3 = vmor %vm1681_vm1, %vm1682_vm0 }
 0x25d   : > { %v1677_v35 = vmul.f32 %v3053_v27, %v1676_v5  ;;  %v1816_v20 = vmul.f32 %v4120_v26, %v1798_v51  ;;  %v1608_v5 = vmul.f32 %v4165_v21, %v4009_v23 }
 0x25e   : > { %v1588_v18 = vsel %vm1378_vm2, %v1550_v62, 0.0 }
 0x25f   : > { %v1678_v34 = vmul.f32 0.5, %v1677_v35  ;;  %v1490_v41 = vpop.xlane.xlu2 %1489  ;;  %1589 = vadd.xlane.f32.xlu2 %v1588_v18  ;;  %v4183_v40 = vadd.f32 %v4129_v31, %v1816_v20  ;;  %v1624_v62 = vadd.f32 1e-05, %v1608_v5 }
 0x260   : > { %v1519_v42 = vmul.f32 %v4009_v23, %v1490_v41 }
 0x261   : > { %v1679_v0 = vsub.f32 1.5, %v1678_v34  ;;  %v1575_v30 = vpop.xlane.xlu0 %1574  ;;  %v1850_v47 = vmul.f32 %v4183_v40, %v4183_v40  ;;  %vm1691_vm8 = vweird.f32 %v1624_v62 }
 0x262   : > { %v4186_v50 = vsub.f32 %v4077_v7, %v1519_v42  ;;  %v1609_v37 = vmul.f32 %v1575_v30, %v4009_v23 }
 0x263   : > { %v1680_v9 = vmul.f32 %v3053_v27, %v1679_v0  ;;  %v1872_v38 = vsel %vm1378_vm2, %v1850_v47, 0.0 }
 0x264   : > { %v1551_v46 = vmul.f32 %v4186_v50, %v4186_v50  ;;  %v1625_v49 = vadd.f32 1e-05, %v1609_v37  ;;  %1873 = vadd.xlane.f32.xlu1 %v1872_v38 }
 0x265   : > { %v1684_v6 = vsel %vm1683_vm3, %v3053_v27, %v1680_v9 }
 0x266   : > { %v1591_v45 = vsel %vm1378_vm2, %v1551_v46, 0.0  ;;  %3054 = vrsqrt.f32 %v1625_v49  ;;  %v1799_v7 = vmul.f32 %v1684_v6, %v4057_v14  ;;  %vm1701_vm5 = vweird.f32 %v1625_v49 }
 0x267   : > { %1592 = vadd.xlane.f32.xlu2 %v1591_v45  ;;  %3056 = vrsqrt.f32 %v1624_v62 }
 0x268   : > { %v1817_v32 = vmul.f32 %v4120_v26, %v1799_v7 }
 0x269   : > { %v1493_v52 = vpop.xlane.xlu0 %1492 }
 0x26a   : > { %v1520_v56 = vmul.f32 %v4009_v23, %v1493_v52  ;;  %v4205_v36 = vadd.f32 %v4129_v31, %v1817_v32 }
 0x26c   : > { %v3055_v10 = vpop.eup %3054  ;;  %v4198_v58 = vsub.f32 %v4089_v2, %v1520_v56  ;;  %v1851_v13 = vmul.f32 %v4205_v36, %v4205_v36 }
 0x26d   : > { %v1696_v22 = vmul.f32 %v3055_v10, %v1625_v49  ;;  %vm1702_vm4 = vweird.f32 %v3055_v10 }
 0x26e   : > { %v1552_v59 = vmul.f32 %v4198_v58, %v4198_v58  ;;  %v1499_v48 = vpop.xlane.xlu2 %1498  ;;  %vm1703_vm6 = vmor %vm1701_vm5, %vm1702_vm4  ;;  %v1875_v55 = vsel %vm1378_vm2, %v1851_v13, 0.0  ;;  %v2941_v13 = vld [vmem:[%s4817_s5 + $0x10] sm:$0xff] }
 0x26f   : > { %v1697_v60 = vmul.f32 %v3055_v10, %v1696_v22  ;;  %v1522_v2 = vmul.f32 %v4009_v23, %v1499_v48 }
 0x270   : > { %v1594_v43 = vsel %vm1378_vm2, %v1552_v59, 0.0 }
 0x271   : > { %v1698_v14 = vmul.f32 0.5, %v1697_v60  ;;  %1595 = vadd.xlane.f32.xlu0 %v1594_v43  ;;  %v4211_v8 = vsub.f32 %v4094_v63, %v1522_v2 }
 0x273   : > { %v1699_v53 = vsub.f32 1.5, %v1698_v14  ;;  %v1554_v17 = vmul.f32 %v4211_v8, %v4211_v8 }
 0x275   : > { %v1700_v24 = vmul.f32 %v3055_v10, %v1699_v53  ;;  %v1600_v28 = vsel %vm1378_vm2, %v1554_v17, 0.0 }
 0x276   : > { %1601 = vadd.xlane.f32.xlu2 %v1600_v28 }
 0x277   : > { %v1704_v25 = vsel %vm1703_vm6, %v3055_v10, %v1700_v24 }
 0x278   : > { %v1801_v12 = vmul.f32 %v1704_v25, %v4083_v39  ;;  %v3057_v39 = vpop.eup %3056 }
 0x279   : > { %1876 = vadd.xlane.f32.xlu0 %v1875_v55  ;;  %v1686_v15 = vmul.f32 %v3057_v39, %v1624_v62  ;;  %vm1692_vm7 = vweird.f32 %v3057_v39  ;;  %v2940_v62 = vld [vmem:[%s4817_s5 + $0x8] sm:$0xff] }
 0x27a   : > { %v1819_v27 = vmul.f32 %v4120_v26, %v1801_v12  ;;  %vm1693_vm9 = vmor %vm1691_vm8, %vm1692_vm7 }
 0x27b   : > { %v1687_v35 = vmul.f32 %v3057_v39, %v1686_v15 }
 0x27c   : > { %v4220_v33 = vadd.f32 %v4129_v31, %v1819_v27 }
 0x27d   : > { %v1688_v51 = vmul.f32 0.5, %v1687_v35 }
 0x27e   : > { %v1853_v63 = vmul.f32 %v4220_v33, %v4220_v33 }
 0x27f   : > { %v1689_v18 = vsub.f32 1.5, %v1688_v51 }
 0x280   : > { %v1881_v3 = vsel %vm1378_vm2, %v1853_v63, 0.0 }
 0x281   : > { %1882 = vadd.xlane.f32.xlu2 %v1881_v3  ;;  %v1690_v34 = vmul.f32 %v3057_v39, %v1689_v18 }
 0x283   : > { %v1694_v0 = vsel %vm1693_vm9, %v3057_v39, %v1690_v34 }
 0x284   : > { %v1800_v30 = vmul.f32 %v1694_v0, %v4069_v29 }
 0x286   : > { %v1818_v45 = vmul.f32 %v4120_v26, %v1800_v30 }
 0x288   : > { %v4239_v56 = vadd.f32 %v4129_v31, %v1818_v45 }
 0x28a   : > { %v1852_v14 = vmul.f32 %v4239_v56, %v4239_v56 }
 0x28c   : > { %v1878_v55 = vsel %vm1378_vm2, %v1852_v14, 0.0 }
 0x2ad   : > { %v1578_v41 = vpop.xlane.xlu1 %1577 }
 0x2ae   : > { %v1610_v20 = vmul.f32 %v1578_v41, %v4009_v23 }
 0x2b0   : > { %v1626_v42 = vadd.f32 1e-05, %v1610_v20  ;;  %v2939_v20 = vld [vmem:[%s4817_s5] sm:$0xff] }
 0x2b2   : > { %3058 = vrsqrt.f32 %v1626_v42  ;;  %vm1711_vm11 = vweird.f32 %v1626_v42 }
 0x2b5   : > { %v1496_v21 = vpop.xlane.xlu1 %1495  ;;  %v1581_v9 = vpop.xlane.xlu0 %1580 }
 0x2b6   : > { %v1521_v37 = vmul.f32 %v4009_v23, %v1496_v21  ;;  %v1611_v46 = vmul.f32 %v1581_v9, %v4009_v23 }
 0x2b8   : > { %v3059_v47 = vpop.eup %3058  ;;  %v4232_v49 = vsub.f32 %v4109_v1, %v1521_v37  ;;  %v1627_v6 = vadd.f32 1e-05, %v1611_v46  ;;  %v2942_v1 = vld [vmem:[%s4817_s5 + $0x18] sm:$0xff] }
 0x2b9   : > { %v1706_v38 = vmul.f32 %v3059_v47, %v1626_v42  ;;  %vm1712_vm10 = vweird.f32 %v3059_v47  ;;  %2171 = vmatpush.bf16.msra.mxu2 %v2942_v1  ;;  %2979 = vmatpush.bf16.msra.mxu3 %v2942_v1 }
 0x2ba   : > { %3060 = vrsqrt.f32 %v1627_v6  ;;  %v1553_v7 = vmul.f32 %v4232_v49, %v4232_v49  ;;  %vm1713_vm12 = vmor %vm1711_vm11, %vm1712_vm10  ;;  %vm1721_vm14 = vweird.f32 %v1627_v6 }
 0x2bb   : > { %v1707_v52 = vmul.f32 %v3059_v47, %v1706_v38 }
 0x2bc   : > { %v1597_v29 = vsel %vm1378_vm2, %v1553_v7, 0.0 }
 0x2bd   : > { %v1708_v10 = vmul.f32 0.5, %v1707_v52  ;;  %v1865_v32 = vpop.xlane.xlu2 %1864  ;;  %1598 = vadd.xlane.f32.xlu1 %v1597_v29  ;;  %2172 = vmatpush.bf16.msra.mxu2 %v2941_v13 }
 0x2be   : > { %v4241_v22 = vmax.f32 %v1865_v32, 1e-24  ;;  %2980 = vmatpush.bf16.msra.mxu3 %v2941_v13 }
 0x2bf   : > { %v1709_v59 = vsub.f32 1.5, %v1708_v10  ;;  %v1584_v43 = vpop.xlane.xlu1 %1583 }
 0x2c0   : > { %v3061_v60 = vpop.eup %3060  ;;  %3062 = vrsqrt.f32 %v4241_v22  ;;  %v1612_v2 = vmul.f32 %v1584_v43, %v4009_v23  ;;  %vm1933_vm3 = vweird.f32 %v4241_v22 }
 0x2c1   : > { %v1710_v48 = vmul.f32 %v3059_v47, %v1709_v59  ;;  %v1716_v53 = vmul.f32 %v3061_v60, %v1627_v6  ;;  %vm1722_vm13 = vweird.f32 %v3061_v60  ;;  %2173 = vmatpush.bf16.msra.mxu2 %v2940_v62 }
 0x2c2   : > { %v4253_v17 = vadd.f32 1e-05, %v1612_v2  ;;  %2981 = vmatpush.bf16.msra.mxu3 %v2940_v62  ;;  %vm1723_vm15 = vmor %vm1721_vm14, %vm1722_vm13 }
 0x2c3   : > { %v1714_v24 = vsel %vm1713_vm12, %v3059_v47, %v1710_v48  ;;  %v1717_v25 = vmul.f32 %v3061_v60, %v1716_v53 }
 0x2c4   : > { %v1802_v12 = vmul.f32 %v1714_v24, %v4102_v57  ;;  %3064 = vrsqrt.f32 %v4253_v17  ;;  %vm1731_vm5 = vweird.f32 %v4253_v17 }
 0x2c5   : > { %v1718_v28 = vmul.f32 0.5, %v1717_v25  ;;  %1879 = vadd.xlane.f32.xlu1 %v1878_v55  ;;  %v1868_v27 = vpop.xlane.xlu0 %1867  ;;  %2174 = vmatpush.bf16.msra.mxu2 %v2939_v20 }
 0x2c6   : > { %v4258_v63 = vpop.eup %3062  ;;  %v4260_v3 = vmax.f32 %v1868_v27, 1e-24  ;;  %v1820_v5 = vmul.f32 %v4120_v26, %v1802_v12  ;;  %2982 = vmatpush.bf16.msra.mxu3 %v2939_v20 }
 0x2c7   : > { %v1719_v39 = vsub.f32 1.5, %v1718_v28  ;;  %v1928_v57 = vmul.f32 %v4258_v63, %v4241_v22  ;;  %v1587_v15 = vpop.xlane.xlu1 %1586  ;;  %vm1934_vm0 = vweird.f32 %v4258_v63 }
 0x2c8   : > { %3066 = vrsqrt.f32 %v4260_v3  ;;  %v4270_v35 = vadd.f32 %v4129_v31, %v1820_v5  ;;  %v1613_v34 = vmul.f32 %v1587_v15, %v4009_v23  ;;  %vm4299_vm4 = vmor %vm1933_vm3, %vm1934_vm0  ;;  %vm1943_vm8 = vweird.f32 %v4260_v3 }
 0x2c9   : > { %v1720_v51 = vmul.f32 %v3061_v60, %v1719_v39  ;;  %v1929_v18 = vmul.f32 %v4258_v63, %v1928_v57 }
 0x2ca   : > { %v1854_v41 = vmul.f32 %v4270_v35, %v4270_v35  ;;  %v3065_v42 = vpop.eup %3064  ;;  %v4279_v21 = vadd.f32 1e-05, %v1613_v34 }
 0x2cb   : > { %v1724_v0 = vsel %vm1723_vm15, %v3061_v60, %v1720_v51  ;;  %v1930_v30 = vmul.f32 0.5, %v1929_v18  ;;  %v1726_v9 = vmul.f32 %v3065_v42, %v4253_v17  ;;  %vm1732_vm1 = vweird.f32 %v3065_v42 }
 0x2cc   : > { %v1884_v37 = vsel %vm1378_vm2, %v1854_v41, 0.0  ;;  %v1803_v46 = vmul.f32 %v1724_v0, %v4112_v4  ;;  %3068 = vrsqrt.f32 %v4279_v21  ;;  %vm1733_vm6 = vmor %vm1731_vm5, %vm1732_vm1  ;;  %vm1741_vm11 = vweird.f32 %v4279_v21 }
 0x2cd   : > { %1885 = vadd.xlane.f32.xlu0 %v1884_v37  ;;  %v1931_v6 = vsub.f32 1.5, %v1930_v30  ;;  %v1727_v45 = vmul.f32 %v3065_v42, %v1726_v9 }
 0x2ce   : > { %v3067_v47 = vpop.eup %3066  ;;  %v1821_v38 = vmul.f32 %v4120_v26, %v1803_v46 }
 0x2cf   : > { %v1938_v7 = vmul.f32 %v3067_v47, %v4260_v3  ;;  %v1728_v52 = vmul.f32 0.5, %v1727_v45  ;;  %v1871_v29 = vpop.xlane.xlu0 %1870  ;;  %v1932_v1 = vmul.f32 %v4258_v63, %v1931_v6  ;;  %vm1944_vm7 = vweird.f32 %v3067_v47 }
 0x2d0   : > { %v4288_v10 = vadd.f32 %v4129_v31, %v1821_v38  ;;  %v4291_v32 = vmax.f32 %v1871_v29, 1e-24  ;;  %vm1945_vm9 = vmor %vm1943_vm8, %vm1944_vm7 }
 0x2d1   : > { %v1939_v4 = vmul.f32 %v3067_v47, %v1938_v7  ;;  %v1729_v59 = vsub.f32 1.5, %v1728_v52  ;;  %v1936_v27 = vsel %vm4299_vm4, %v4258_v63, %v1932_v1 }
 0x2d2   : > { %v1590_v60 = vpop.xlane.xlu2 %1589  ;;  %v1855_v43 = vmul.f32 %v4288_v10, %v4288_v10  ;;  %v3069_v14 = vpop.eup %3068  ;;  %3070 = vrsqrt.f32 %v4291_v32  ;;  %v2087_v51 = vmul.f32 %v1936_v27, %v4133_v19  ;;  %vm1953_vm1 = vweird.f32 %v4291_v32 }
 0x2d3   : > { %v1940_v48 = vmul.f32 0.5, %v1939_v4  ;;  %v1614_v53 = vmul.f32 %v1590_v60, %v4009_v23  ;;  %v1730_v13 = vmul.f32 %v3065_v42, %v1729_v59  ;;  %v1736_v24 = vmul.f32 %v3069_v14, %v4279_v21 }
 0x2d4   : > { %v1887_v25 = vsel %vm1378_vm2, %v1855_v43, 0.0  ;;  %vm1742_vm10 = vweird.f32 %v3069_v14 }
 0x2d5   : > { %v1941_v55 = vsub.f32 1.5, %v1940_v48  ;;  %v1630_v22 = vadd.f32 1e-05, %v1614_v53  ;;  %1888 = vadd.xlane.f32.xlu1 %v1887_v25  ;;  %v1734_v12 = vsel %vm1733_vm6, %v3065_v42, %v1730_v13  ;;  %v1737_v28 = vmul.f32 %v3069_v14, %v1736_v24  ;;  %vm1743_vm12 = vmor %vm1741_vm11, %vm1742_vm10 }
 0x2d6   : > { %v1804_v17 = vmul.f32 %v1734_v12, %v4140_v44 }
 0x2d7   : > { %v1942_v5 = vmul.f32 %v3067_v47, %v1941_v55  ;;  %3072 = vrsqrt.f32 %v1630_v22  ;;  %v1738_v62 = vmul.f32 0.5, %v1737_v28  ;;  %v1874_v41 = vpop.xlane.xlu1 %1873  ;;  %vm1751_vm14 = vweird.f32 %v1630_v22 }
 0x2d8   : > { %v4311_v39 = vpop.eup %3070  ;;  %v1822_v57 = vmul.f32 %v4120_v26, %v1804_v17  ;;  %v1914_v20 = vmax.f32 %v1874_v41, 1e-24 }
 0x2d9   : > { %v1946_v15 = vsel %vm1945_vm9, %v3067_v47, %v1942_v5  ;;  %v1739_v18 = vsub.f32 1.5, %v1738_v62  ;;  %v1948_v63 = vmul.f32 %v4311_v39, %v4291_v32  ;;  %vm1954_vm0 = vweird.f32 %v4311_v39 }
 0x2da   : > { %v1593_v34 = vpop.xlane.xlu2 %1592  ;;  %v2088_v3 = vmul.f32 %v1946_v15, %v4149_v11  ;;  %v4320_v42 = vadd.f32 %v4129_v31, %v1822_v57  ;;  %3074 = vrsqrt.f32 %v1914_v20  ;;  %vm4341_vm4 = vmor %vm1953_vm1, %vm1954_vm0  ;;  %vm1963_vm5 = vweird.f32 %v1914_v20 }
 0x2db   : > { %v1615_v44 = vmul.f32 %v1593_v34, %v4009_v23  ;;  %v1740_v0 = vmul.f32 %v3069_v14, %v1739_v18  ;;  %v1949_v19 = vmul.f32 %v4311_v39, %v1948_v63 }
 0x2dc   : > { %v2103_v30 = vpack.c.bf16 %v2088_v3, %v2087_v51  ;;  %v1856_v46 = vmul.f32 %v4320_v42, %v4320_v42 }
 0x2dd   : > { %v3073_v9 = vpop.eup %3072  ;;  %v1631_v37 = vadd.f32 1e-05, %v1615_v44  ;;  %v1744_v11 = vsel %vm1743_vm12, %v3069_v14, %v1740_v0  ;;  %v1950_v38 = vmul.f32 0.5, %v1949_v19 }
 0x2de   : > { %v1746_v47 = vmul.f32 %v3073_v9, %v1630_v22  ;;  %2917 = vmatmul.msk.bf16.vlgmr.msra.gmra.mxu2 %vm1378_vm2, %v2103_v30  ;;  %v1890_v6 = vsel %vm1378_vm2, %v1856_v46, 0.0  ;;  %v1805_v45 = vmul.f32 %v1744_v11, %v4156_v54  ;;  %vm1752_vm13 = vweird.f32 %v3073_v9 }
 0x2df   : > { %3076 = vrsqrt.f32 %v1631_v37  ;;  %1891 = vadd.xlane.f32.xlu2 %v1890_v6  ;;  %v1951_v59 = vsub.f32 1.5, %v1950_v38  ;;  %vm1753_vm15 = vmor %vm1751_vm14, %vm1752_vm13  ;;  %vm1761_vm8 = vweird.f32 %v1631_v37 }
 0x2e0   : > { %v1747_v21 = vmul.f32 %v3073_v9, %v1746_v47  ;;  %v1823_v7 = vmul.f32 %v4120_v26, %v1805_v45  ;;  %v3075_v29 = vpop.eup %3074 }
 0x2e1   : > { %v1958_v60 = vmul.f32 %v3075_v29, %v1914_v20  ;;  %v1952_v55 = vmul.f32 %v4311_v39, %v1951_v59  ;;  %vm1964_vm3 = vweird.f32 %v3075_v29 }
 0x2e2   : > { %v1748_v52 = vmul.f32 0.5, %v1747_v21  ;;  %v4331_v4 = vadd.f32 %v4129_v31, %v1823_v7  ;;  %vm1965_vm7 = vmor %vm1963_vm5, %vm1964_vm3 }
 0x2e3   : > { %v1959_v2 = vmul.f32 %v3075_v29, %v1958_v60 }
 0x2e4   : > { %v1749_v1 = vsub.f32 1.5, %v1748_v52  ;;  %v1596_v14 = vpop.xlane.xlu0 %1595  ;;  %v1857_v48 = vmul.f32 %v4331_v4, %v4331_v4 }
 0x2e5   : > { %v3077_v43 = vpop.eup %3076  ;;  %v1616_v13 = vmul.f32 %v1596_v14, %v4009_v23  ;;  %v1960_v28 = vmul.f32 0.5, %v1959_v2 }
 0x2e6   : > { %v1750_v54 = vmul.f32 %v3073_v9, %v1749_v1  ;;  %v1756_v53 = vmul.f32 %v3077_v43, %v1631_v37  ;;  %v1893_v24 = vsel %vm1378_vm2, %v1857_v48, 0.0  ;;  %vm1762_vm6 = vweird.f32 %v3077_v43 }
 0x2e7   : > { %1894 = vadd.xlane.f32.xlu0 %v1893_v24  ;;  %v1632_v27 = vadd.f32 1e-05, %v1616_v13  ;;  %v1961_v17 = vsub.f32 1.5, %v1960_v28  ;;  %vm1763_vm9 = vmor %vm1761_vm8, %vm1762_vm6 }
 0x2e8   : > { %v1754_v25 = vsel %vm1753_vm15, %v3073_v9, %v1750_v54  ;;  %v1757_v12 = vmul.f32 %v3077_v43, %v1756_v53 }
 0x2e9   : > { %v1806_v5 = vmul.f32 %v1754_v25, %v4171_v61  ;;  %3078 = vrsqrt.f32 %v1632_v27  ;;  %v1962_v51 = vmul.f32 %v3075_v29, %v1961_v17  ;;  %v1956_v61 = vsel %vm4341_vm4, %v4311_v39, %v1952_v55  ;;  %v1602_v63 = vpop.xlane.xlu2 %1601 }
 0x2ea   : > { %v1758_v22 = vmul.f32 0.5, %v1757_v12  ;;  %v1618_v41 = vmul.f32 %v1602_v63, %v4009_v23  ;;  %v2089_v44 = vmul.f32 %v1956_v61, %v4168_v16  ;;  %vm1771_vm11 = vweird.f32 %v1632_v27 }
 0x2eb   : > { %v1824_v57 = vmul.f32 %v4120_v26, %v1806_v5  ;;  %v1966_v34 = vsel %vm1965_vm7, %v3075_v29, %v1962_v51 }
 0x2ec   : > { %v1759_v15 = vsub.f32 1.5, %v1758_v22  ;;  %v2090_v20 = vmul.f32 %v1966_v34, %v4183_v40  ;;  %v1634_v19 = vadd.f32 1e-05, %v1618_v41  ;;  %v1877_v12 = vpop.xlane.xlu0 %1876 }
 0x2ed   : > { %v4350_v32 = vadd.f32 %v4129_v31, %v1824_v57  ;;  %v1915_v28 = vmax.f32 %v1877_v12, 1e-24 }
 0x2ee   : > { %v1760_v18 = vmul.f32 %v3077_v43, %v1759_v15  ;;  %v2104_v9 = vpack.c.bf16 %v2090_v20, %v2089_v44  ;;  %3080 = vrsqrt.f32 %v1634_v19  ;;  %vm1791_vm14 = vweird.f32 %v1634_v19 }
 0x2ef   : > { %v1858_v3 = vmul.f32 %v4350_v32, %v4350_v32  ;;  %v3079_v39 = vpop.eup %3078  ;;  %3082 = vrsqrt.f32 %v1915_v28  ;;  %vm1973_vm5 = vweird.f32 %v1915_v28 }
 0x2f0   : > { %v1764_v0 = vsel %vm1763_vm9, %v3077_v43, %v1760_v18  ;;  %v1766_v46 = vmul.f32 %v3079_v39, %v1632_v27  ;;  %2918 = vmatmul.msk.bf16.gmra.mxu2 %vm1378_vm2, %v2104_v9  ;;  %vm1772_vm10 = vweird.f32 %v3079_v39 }
 0x2f1   : > { %v1896_v30 = vsel %vm1378_vm2, %v1858_v3, 0.0  ;;  %v1807_v37 = vmul.f32 %v1764_v0, %v4186_v50  ;;  %vm1773_vm12 = vmor %vm1771_vm11, %vm1772_vm10 }
 0x2f2   : > { %1897 = vadd.xlane.f32.xlu1 %v1896_v30  ;;  %v1767_v47 = vmul.f32 %v3079_v39, %v1766_v46 }
 0x2f3   : > { %v1825_v11 = vmul.f32 %v4120_v26, %v1807_v37 }
 0x2f4   : > { %v1768_v40 = vmul.f32 0.5, %v1767_v47  ;;  %v3081_v21 = vpop.eup %3080  ;;  %v1883_v62 = vpop.xlane.xlu2 %1882 }
 0x2f5   : > { %v4362_v16 = vadd.f32 %v4129_v31, %v1825_v11  ;;  %v1786_v38 = vmul.f32 %v3081_v21, %v1634_v19  ;;  %vm1792_vm13 = vweird.f32 %v3081_v21  ;;  %v3083_v5 = vpop.eup %3082  ;;  %v4384_v51 = vmax.f32 %v1883_v62, 1e-24 }
 0x2f6   : > { %v1769_v45 = vsub.f32 1.5, %v1768_v40  ;;  %vm1793_vm15 = vmor %vm1791_vm14, %vm1792_vm13  ;;  %v1968_v17 = vmul.f32 %v3083_v5, %v1915_v28  ;;  %vm1974_vm3 = vweird.f32 %v3083_v5 }
 0x2f7   : > { %v1859_v6 = vmul.f32 %v4362_v16, %v4362_v16  ;;  %v1787_v52 = vmul.f32 %v3081_v21, %v1786_v38  ;;  %vm4392_vm6 = vmor %vm1973_vm5, %vm1974_vm3  ;;  %vm1993_vm14 = vweird.f32 %v4384_v51 }
 0x2f8   : > { %v1770_v7 = vmul.f32 %v3079_v39, %v1769_v45  ;;  %v1969_v15 = vmul.f32 %v3083_v5, %v1968_v17 }
 0x2f9   : > { %v1899_v50 = vsel %vm1378_vm2, %v1859_v6, 0.0  ;;  %v1788_v59 = vmul.f32 0.5, %v1787_v52 }
 0x2fa   : > { %1900 = vadd.xlane.f32.xlu2 %v1899_v50  ;;  %v1774_v29 = vsel %vm1773_vm12, %v3079_v39, %v1770_v7  ;;  %v1970_v34 = vmul.f32 0.5, %v1969_v15 }
 0x2fb   : > { %v1808_v1 = vmul.f32 %v1774_v29, %v4198_v58  ;;  %v1789_v43 = vsub.f32 1.5, %v1788_v59 }
 0x2fc   : > { %v1971_v20 = vsub.f32 1.5, %v1970_v34 }
 0x2fd   : > { %v1826_v60 = vmul.f32 %v4120_v26, %v1808_v1  ;;  %v1790_v48 = vmul.f32 %v3081_v21, %v1789_v43 }
 0x2fe   : > { %v1972_v46 = vmul.f32 %v3083_v5, %v1971_v20 }
 0x2ff   : > { %v4370_v14 = vadd.f32 %v4129_v31, %v1826_v60  ;;  %v1794_v53 = vsel %vm1793_vm15, %v3081_v21, %v1790_v48 }
 0x300   : > { %v1810_v2 = vmul.f32 %v1794_v53, %v4211_v8  ;;  %v1976_v29 = vsel %vm4392_vm6, %v3083_v5, %v1972_v46 }
 0x301   : > { %v1860_v54 = vmul.f32 %v4370_v14, %v4370_v14 }
 0x302   : > { %v1828_v58 = vmul.f32 %v4120_v26, %v1810_v2 }
 0x303   : > { %v1902_v13 = vsel %vm1378_vm2, %v1860_v54, 0.0 }
 0x304   : > { %1903 = vadd.xlane.f32.xlu0 %v1902_v13  ;;  %v4378_v24 = vadd.f32 %v4129_v31, %v1828_v58 }
 0x306   : > { %v1862_v25 = vmul.f32 %v4378_v24, %v4378_v24 }
 0x308   : > { %v1908_v55 = vsel %vm1378_vm2, %v1862_v25, 0.0 }
 0x309   : > { %1909 = vadd.xlane.f32.xlu2 %v1908_v55 }
 0x330   : > { %v1599_v27 = vpop.xlane.xlu1 %1598 }
 0x331   : > { %v1617_v8 = vmul.f32 %v1599_v27, %v4009_v23 }
 0x333   : > { %v1633_v22 = vadd.f32 1e-05, %v1617_v8 }
 0x335   : > { %3084 = vrsqrt.f32 %v1633_v22  ;;  %vm1781_vm1 = vweird.f32 %v1633_v22 }
 0x338   : > { %v1880_v57 = vpop.xlane.xlu1 %1879 }
 0x339   : > { %v1916_v61 = vmax.f32 %v1880_v57, 1e-24 }
 0x33b   : > { %v3085_v18 = vpop.eup %3084  ;;  %3086 = vrsqrt.f32 %v1916_v61  ;;  %vm1983_vm8 = vweird.f32 %v1916_v61 }
 0x33c   : > { %v1776_v63 = vmul.f32 %v3085_v18, %v1633_v22  ;;  %3088 = vrsqrt.f32 %v4384_v51  ;;  %vm1782_vm0 = vweird.f32 %v3085_v18 }
 0x33d   : > { %vm1783_vm4 = vmor %vm1781_vm1, %vm1782_vm0  ;;  %vm2265_vm0 = vcmask 162896   ;;  %vm2216_vm1 = vcmask 80896  }
 0x33e   : > { %v1777_v41 = vmul.f32 %v3085_v18, %v1776_v63 }
 0x340   : > { %v1778_v3 = vmul.f32 0.5, %v1777_v41  ;;  %v1886_v44 = vpop.xlane.xlu0 %1885 }
 0x341   : > { %v3087_v23 = vpop.eup %3086  ;;  %v1918_v0 = vmax.f32 %v1886_v44, 1e-24 }
 0x342   : > { %v1779_v39 = vsub.f32 1.5, %v1778_v3  ;;  %v1978_v19 = vmul.f32 %v3087_v23, %v1916_v61  ;;  %v4387_v30 = vpop.eup %3088  ;;  %vm1984_vm7 = vweird.f32 %v3087_v23 }
 0x343   : > { %3090 = vrsqrt.f32 %v1918_v0  ;;  %v1988_v11 = vmul.f32 %v4387_v30, %v4384_v51  ;;  %vm1985_vm9 = vmor %vm1983_vm8, %vm1984_vm7  ;;  %vm1994_vm11 = vweird.f32 %v4387_v30  ;;  %vm2003_vm12 = vweird.f32 %v1918_v0 }
 0x344   : > { %v1780_v9 = vmul.f32 %v3085_v18, %v1779_v39  ;;  %v1979_v37 = vmul.f32 %v3087_v23, %v1978_v19  ;;  %vm1995_vm15 = vmor %vm1993_vm14, %vm1994_vm11 }
 0x345   : > { %v1989_v1 = vmul.f32 %v4387_v30, %v1988_v11 }
 0x346   : > { %v1784_v47 = vsel %vm1783_vm4, %v3085_v18, %v1780_v9  ;;  %v1980_v40 = vmul.f32 0.5, %v1979_v37 }
 0x347   : > { %v1809_v6 = vmul.f32 %v1784_v47, %v4232_v49  ;;  %v1990_v2 = vmul.f32 0.5, %v1989_v1 }
 0x348   : > { %v1981_v21 = vsub.f32 1.5, %v1980_v40  ;;  %v1889_v50 = vpop.xlane.xlu1 %1888 }
 0x349   : > { %v3091_v38 = vpop.eup %3090  ;;  %v4396_v7 = vmax.f32 %v1889_v50, 1e-24  ;;  %v1827_v52 = vmul.f32 %v4120_v26, %v1809_v6  ;;  %v2091_v26 = vmul.f32 %v1976_v29, %v4205_v36 }
 0x34a   : > { %v1982_v59 = vmul.f32 %v3087_v23, %v1981_v21  ;;  %v1998_v49 = vmul.f32 %v3091_v38, %v1918_v0  ;;  %vm2004_vm10 = vweird.f32 %v3091_v38 }
 0x34b   : > { %v4403_v60 = vadd.f32 %v4129_v31, %v1827_v52  ;;  %3092 = vrsqrt.f32 %v4396_v7  ;;  %v1991_v31 = vsub.f32 1.5, %v1990_v2  ;;  %vm2005_vm13 = vmor %vm2003_vm12, %vm2004_vm10  ;;  %vm2013_vm7 = vweird.f32 %v4396_v7 }
 0x34c   : > { %v1999_v43 = vmul.f32 %v3091_v38, %v1998_v49  ;;  %v1986_v48 = vsel %vm1985_vm9, %v3087_v23, %v1982_v59 }
 0x34d   : > { %v1861_v54 = vmul.f32 %v4403_v60, %v4403_v60  ;;  %v2092_v53 = vmul.f32 %v1986_v48, %v4239_v56  ;;  %v1992_v36 = vmul.f32 %v4387_v30, %v1991_v31 }
 0x34e   : > { %v2000_v13 = vmul.f32 0.5, %v1999_v43 }
 0x34f   : > { %v1905_v58 = vsel %vm1378_vm2, %v1861_v54, 0.0  ;;  %v2105_v25 = vpack.c.bf16 %v2092_v53, %v2091_v26  ;;  %v1996_v17 = vsel %vm1995_vm15, %v4387_v30, %v1992_v36 }
 0x350   : > { %v2001_v55 = vsub.f32 1.5, %v2000_v13  ;;  %1906 = vadd.xlane.f32.xlu1 %v1905_v58  ;;  %v2093_v63 = vmul.f32 %v1996_v17, %v4220_v33 }
 0x351   : > { %2919 = vmatmul.msk.bf16.gmra.mxu2 %vm1378_vm2, %v2105_v25  ;;  %v3093_v12 = vpop.eup %3092 }
 0x352   : > { %v1892_v28 = vpop.xlane.xlu2 %1891  ;;  %v2002_v27 = vmul.f32 %v3091_v38, %v2001_v55  ;;  %v2008_v56 = vmul.f32 %v3093_v12, %v4396_v7  ;;  %vm2014_vm4 = vweird.f32 %v3093_v12 }
 0x353   : > { %v1920_v8 = vmax.f32 %v1892_v28, 1e-24  ;;  %vm2015_vm8 = vmor %vm2013_vm7, %vm2014_vm4 }
 0x354   : > { %v2006_v5 = vsel %vm2005_vm13, %v3091_v38, %v2002_v27  ;;  %v2009_v22 = vmul.f32 %v3093_v12, %v2008_v56 }
 0x355   : > { %3094 = vrsqrt.f32 %v1920_v8  ;;  %v2094_v57 = vmul.f32 %v2006_v5, %v4270_v35  ;;  %vm2023_vm5 = vweird.f32 %v1920_v8 }
 0x356   : > { %v2010_v34 = vmul.f32 0.5, %v2009_v22 }
 0x357   : > { %v2106_v3 = vpack.c.bf16 %v2094_v57, %v2093_v63 }
 0x358   : > { %v2011_v23 = vsub.f32 1.5, %v2010_v34 }
 0x35a   : > { %v1895_v62 = vpop.xlane.xlu0 %1894  ;;  %v2012_v30 = vmul.f32 %v3093_v12, %v2011_v23 }
 0x35b   : > { %v3095_v15 = vpop.eup %3094  ;;  %v4418_v61 = vmax.f32 %v1895_v62, 1e-24 }
 0x35c   : > { %v2018_v18 = vmul.f32 %v3095_v15, %v1920_v8  ;;  %vm2024_vm3 = vweird.f32 %v3095_v15  ;;  %v2016_v45 = vsel %vm2015_vm8, %v3093_v12, %v2012_v30 }
 0x35d   : > { %3096 = vrsqrt.f32 %v4418_v61  ;;  %vm2025_vm6 = vmor %vm2023_vm5, %vm2024_vm3  ;;  %v2095_v38 = vmul.f32 %v2016_v45, %v4288_v10  ;;  %vm2033_vm12 = vweird.f32 %v4418_v61 }
 0x35e   : > { %v2019_v41 = vmul.f32 %v3095_v15, %v2018_v18 }
 0x360   : > { %v2020_v51 = vmul.f32 0.5, %v2019_v41 }
 0x361   : > { %v2176_v44 = vpop.f32.mrf.mxu2  ;;  %2920 = vmatmul.msk.bf16.gmra.mxu2 %vm1378_vm2, %v2106_v3 }
 0x362   : > { %v2266_v35 = vsel %vm2265_vm0, %v2176_v44, -inf  ;;  %v2217_v20 = vsel %vm2216_vm1, %v2176_v44, -inf  ;;  %v2021_v0 = vsub.f32 1.5, %v2020_v51 }
 0x363   : > { %2267 = vmax.xlane.f32.xlu1 %v2266_v35  ;;  %2218 = vmax.xlane.f32.xlu0 %v2217_v20  ;;  %v3097_v33 = vpop.eup %3096 }
 0x364   : > { %v2022_v39 = vmul.f32 %v3095_v15, %v2021_v0  ;;  %v2028_v9 = vmul.f32 %v3097_v33, %v4418_v61  ;;  %vm2034_vm10 = vweird.f32 %v3097_v33 }
 0x365   : > { %v1898_v19 = vpop.xlane.xlu1 %1897  ;;  %vm2035_vm14 = vmor %vm2033_vm12, %vm2034_vm10 }
 0x366   : > { %v1922_v37 = vmax.f32 %v1898_v19, 1e-24  ;;  %v2026_v46 = vsel %vm2025_vm6, %v3095_v15, %v2022_v39  ;;  %v2029_v47 = vmul.f32 %v3097_v33, %v2028_v9 }
 0x367   : > { %v2096_v21 = vmul.f32 %v2026_v46, %v4320_v42 }
 0x368   : > { %3098 = vrsqrt.f32 %v1922_v37  ;;  %v2030_v29 = vmul.f32 0.5, %v2029_v47  ;;  %vm2043_vm11 = vweird.f32 %v1922_v37 }
 0x369   : > { %v2178_v11 = vpop.f32.mrf.mxu2  ;;  %v2107_v59 = vpack.c.bf16 %v2096_v21, %v2095_v38 }
 0x36a   : > { %v2269_v40 = vsel %vm2265_vm0, %v2178_v11, -inf  ;;  %v2220_v6 = vsel %vm2216_vm1, %v2178_v11, -inf  ;;  %v2031_v43 = vsub.f32 1.5, %v2030_v29 }
 0x36b   : > { %2270 = vmax.xlane.f32.xlu2 %v2269_v40  ;;  %2221 = vmax.xlane.f32.xlu1 %v2220_v6 }
 0x36c   : > { %v2032_v53 = vmul.f32 %v3097_v33, %v2031_v43 }
 0x36d   : > { %v1901_v50 = vpop.xlane.xlu2 %1900 }
 0x36e   : > { %v3099_v52 = vpop.eup %3098  ;;  %v1923_v7 = vmax.f32 %v1901_v50, 1e-24  ;;  %v2036_v12 = vsel %vm2035_vm14, %v3097_v33, %v2032_v53  ;;  %vm2331_vm14 = vcmask 15360  }
 0x36f   : > { %v2038_v1 = vmul.f32 %v3099_v52, %v1922_v37  ;;  %vm2044_vm9 = vweird.f32 %v3099_v52  ;;  %v2097_v8 = vmul.f32 %v2036_v12, %v4331_v4 }
 0x370   : > { %3100 = vrsqrt.f32 %v1923_v7  ;;  %vm2045_vm13 = vmor %vm2043_vm11, %vm2044_vm9  ;;  %vm2053_vm3 = vweird.f32 %v1923_v7 }
 0x371   : > { %v2039_v49 = vmul.f32 %v3099_v52, %v2038_v1  ;;  %2921 = vmatmul.msk.bf16.gmra.mxu2 %vm1378_vm2, %v2107_v59 }
 0x373   : > { %v2040_v48 = vmul.f32 0.5, %v2039_v49  ;;  %v2181_v42 = vpop.f32.mrf.mxu2 }
 0x374   : > { %v2223_v13 = vsel %vm2216_vm1, %v2181_v42, -inf  ;;  %v2272_v58 = vsel %vm2265_vm0, %v2181_v42, -inf }
 0x375   : > { %v2041_v54 = vsub.f32 1.5, %v2040_v48  ;;  %2224 = vmax.xlane.f32.xlu2 %v2223_v13  ;;  %2273 = vmax.xlane.f32.xlu0 %v2272_v58 }
 0x376   : > { %v3101_v26 = vpop.eup %3100 }
 0x377   : > { %v2042_v2 = vmul.f32 %v3099_v52, %v2041_v54  ;;  %v2048_v10 = vmul.f32 %v3101_v26, %v1923_v7  ;;  %v1904_v25 = vpop.xlane.xlu0 %1903  ;;  %vm2054_vm15 = vweird.f32 %v3101_v26 }
 0x378   : > { %v1924_v31 = vmax.f32 %v1904_v25, 1e-24  ;;  %vm2055_vm5 = vmor %vm2053_vm3, %vm2054_vm15 }
 0x379   : > { %v2046_v55 = vsel %vm2045_vm13, %v3099_v52, %v2042_v2  ;;  %v2049_v28 = vmul.f32 %v3101_v26, %v2048_v10 }
 0x37a   : > { %v2098_v27 = vmul.f32 %v2046_v55, %v4350_v32  ;;  %3102 = vrsqrt.f32 %v1924_v31  ;;  %vm2063_vm6 = vweird.f32 %v1924_v31 }
 0x37b   : > { %v2183_v36 = vpop.f32.mrf.mxu2  ;;  %v2050_v56 = vmul.f32 0.5, %v2049_v28 }
 0x37c   : > { %v2275_v5 = vsel %vm2265_vm0, %v2183_v36, -inf  ;;  %v2226_v22 = vsel %vm2216_vm1, %v2183_v36, -inf  ;;  %v2108_v17 = vpack.c.bf16 %v2098_v27, %v2097_v8  ;;  %v1910_v23 = vpop.xlane.xlu2 %1909 }
 0x37d   : > { %2276 = vmax.xlane.f32.xlu1 %v2275_v5  ;;  %2227 = vmax.xlane.f32.xlu0 %v2226_v22  ;;  %v2051_v57 = vsub.f32 1.5, %v2050_v56  ;;  %v1926_v35 = vmax.f32 %v1910_v23, 1e-24 }
 0x37f   : > { %v2052_v18 = vmul.f32 %v3101_v26, %v2051_v57  ;;  %3104 = vrsqrt.f32 %v1926_v35  ;;  %vm2083_vm9 = vweird.f32 %v1926_v35 }
 0x380   : > { %v3103_v62 = vpop.eup %3102 }
 0x381   : > { %2922 = vmatmul.msk.bf16.gmra.mxu2 %vm1378_vm2, %v2108_v17  ;;  %v2058_v15 = vmul.f32 %v3103_v62, %v1924_v31  ;;  %vm2064_vm4 = vweird.f32 %v3103_v62  ;;  %v2056_v34 = vsel %vm2055_vm5, %v3101_v26, %v2052_v18 }
 0x382   : > { %vm2065_vm7 = vmor %vm2063_vm6, %vm2064_vm4  ;;  %v2099_v3 = vmul.f32 %v2056_v34, %v4362_v16 }
 0x383   : > { %v2059_v61 = vmul.f32 %v3103_v62, %v2058_v15 }
 0x385   : > { %v2060_v32 = vmul.f32 0.5, %v2059_v61  ;;  %v3105_v20 = vpop.eup %3104 }
 0x386   : > { %v2078_v0 = vmul.f32 %v3105_v20, %v1926_v35  ;;  %vm2084_vm8 = vweird.f32 %v3105_v20 }
 0x387   : > { %v2061_v4 = vsub.f32 1.5, %v2060_v32  ;;  %vm2085_vm11 = vmor %vm2083_vm9, %vm2084_vm8 }
 0x388   : > { %v2079_v19 = vmul.f32 %v3105_v20, %v2078_v0 }
 0x389   : > { %v2062_v63 = vmul.f32 %v3103_v62, %v2061_v4 }
 0x38a   : > { %v2080_v30 = vmul.f32 0.5, %v2079_v19 }
 0x38b   : > { %v2066_v41 = vsel %vm2065_vm7, %v3103_v62, %v2062_v63 }
 0x38c   : > { %v2100_v51 = vmul.f32 %v2066_v41, %v4370_v14  ;;  %v2081_v37 = vsub.f32 1.5, %v2080_v30 }
 0x38e   : > { %v2109_v44 = vpack.c.bf16 %v2100_v51, %v2099_v3  ;;  %v2082_v16 = vmul.f32 %v3105_v20, %v2081_v37 }
 0x390   : > { %v2086_v6 = vsel %vm2085_vm11, %v3105_v20, %v2082_v16 }
 0x391   : > { %2923 = vmatmul.msk.bf16.gmra.mxu2 %vm1378_vm2, %v2109_v44  ;;  %v2102_v38 = vmul.f32 %v2086_v6, %v4378_v24 }
 0x3c3   : > { %v1907_v33 = vpop.xlane.xlu1 %1906 }
 0x3c4   : > { %v1925_v39 = vmax.f32 %v1907_v33, 1e-24 }
 0x3c6   : > { %3106 = vrsqrt.f32 %v1925_v39  ;;  %vm2073_vm12 = vweird.f32 %v1925_v39 }
 0x3cc   : > { %v3107_v9 = vpop.eup %3106 }
 0x3cd   : > { %v2068_v46 = vmul.f32 %v3107_v9, %v1925_v39  ;;  %vm2074_vm10 = vweird.f32 %v3107_v9 }
 0x3ce   : > { %vm2075_vm13 = vmor %vm2073_vm12, %vm2074_vm10 }
 0x3cf   : > { %v2069_v11 = vmul.f32 %v3107_v9, %v2068_v46 }
 0x3d1   : > { %v2070_v14 = vmul.f32 0.5, %v2069_v11 }
 0x3d3   : > { %v2071_v47 = vsub.f32 1.5, %v2070_v14 }
 0x3d4   : > { %v2186_v40 = vpop.f32.mrf.mxu2 }
 0x3d5   : > { %v2072_v45 = vmul.f32 %v3107_v9, %v2071_v47  ;;  %v2229_v21 = vsel %vm2216_vm1, %v2186_v40, -inf  ;;  %v2278_v27 = vsel %vm2265_vm0, %v2186_v40, -inf }
 0x3d6   : > { %2230 = vmax.xlane.f32.xlu1 %v2229_v21  ;;  %v2219_v31 = vpop.xlane.xlu0 %2218  ;;  %v2268_v63 = vpop.xlane.xlu1 %2267 }
 0x3d7   : > { %v2076_v50 = vsel %vm2075_vm13, %v3107_v9, %v2072_v45 }
 0x3d8   : > { %v2101_v52 = vmul.f32 %v2076_v50, %v4403_v60 }
 0x3da   : > { %v2110_v29 = vpack.c.bf16 %v2102_v38, %v2101_v52 }
 0x3dc   : > { %v2188_v7 = vpop.f32.mrf.mxu2  ;;  %2924 = vmatmul.msk.bf16.vlgmr.msra.gmra.mxu3 %vm1378_vm2, %v2110_v29  ;;  %vm2314_vm2 = vcmask 7168  }
 0x3dd   : > { %v2281_v22 = vsel %vm2265_vm0, %v2188_v7, -inf  ;;  %v2232_v17 = vsel %vm2216_vm1, %v2188_v7, -inf  ;;  %v4475_v23 = vsel %vm2314_vm2, %v2219_v31, %v2268_v63 }
 0x3de   : > { %v2271_v55 = vpop.xlane.xlu2 %2270  ;;  %v2222_v44 = vpop.xlane.xlu1 %2221  ;;  %v2332_v20 = vsel %vm2331_vm14, %v4475_v23, 0.0 }
 0x3df   : > { %v4481_v39 = vsel %vm2314_vm2, %v2222_v44, %v2271_v55 }
 0x3e0   : > { %v2335_v30 = vsel %vm2331_vm14, %v4481_v39, 0.0 }
 0x3e4   : > { %v2191_v1 = vpop.f32.mrf.mxu2 }
 0x3e5   : > { %v2284_v59 = vsel %vm2265_vm0, %v2191_v1, -inf  ;;  %v2235_v57 = vsel %vm2216_vm1, %v2191_v1, -inf }
 0x3e6   : > { %2285 = vmax.xlane.f32.xlu1 %v2284_v59 }
 0x3e8   : > { %v2225_v36 = vpop.xlane.xlu2 %2224  ;;  %v2274_v56 = vpop.xlane.xlu0 %2273 }
 0x3e9   : > { %v4458_v5 = vsel %vm2314_vm2, %v2225_v36, %v2274_v56 }
 0x3ea   : > { %v2338_v62 = vsel %vm2331_vm14, %v4458_v5, 0.0 }
 0x3ec   : > { %v2193_v49 = vpop.f32.mrf.mxu2 }
 0x3ed   : > { %v2238_v43 = vsel %vm2216_vm1, %v2193_v49, -inf  ;;  %v2287_v15 = vsel %vm2265_vm0, %v2193_v49, -inf }
 0x3ee   : > { %2239 = vmax.xlane.f32.xlu1 %v2238_v43 }
 0x3f0   : > { %v2277_v0 = vpop.xlane.xlu1 %2276  ;;  %v2228_v33 = vpop.xlane.xlu0 %2227 }
 0x3f1   : > { %v4484_v19 = vsel %vm2314_vm2, %v2228_v33, %v2277_v0 }
 0x3f2   : > { %v2341_v9 = vsel %vm2331_vm14, %v4484_v19, 0.0 }
 0x3f4   : > { %v2196_v48 = vpop.f32.mrf.mxu2 }
 0x3f5   : > { %v2290_v61 = vsel %vm2265_vm0, %v2196_v48, -inf  ;;  %v2241_v18 = vsel %vm2216_vm1, %v2196_v48, -inf }
 0x3fc   : > { %v2198_v54 = vpop.f32.mrf.mxu2 }
 0x3fd   : > { %v2293_v26 = vsel %vm2265_vm0, %v2198_v54, -inf  ;;  %v2244_v32 = vsel %vm2216_vm1, %v2198_v54, -inf }
 0x3fe   : > { %2294 = vmax.xlane.f32.xlu1 %v2293_v26 }
 0x404   : > { %v2201_v24 = vpop.f32.mrf.mxu2 }
 0x405   : > { %v2247_v60 = vsel %vm2216_vm1, %v2201_v24, -inf  ;;  %v2296_v4 = vsel %vm2265_vm0, %v2201_v24, -inf }
 0x406   : > { %2248 = vmax.xlane.f32.xlu1 %v2247_v60 }
 0x40c   : > { %v2203_v53 = vpop.f32.mrf.mxu2 }
 0x40d   : > { %v2299_v34 = vsel %vm2265_vm0, %v2203_v53, -inf  ;;  %v2250_v41 = vsel %vm2216_vm1, %v2203_v53, -inf  ;;  %v3192_v53 = vmov 2.0  }
 0x40e   : > { %3108 = vrcp.f32 %v3192_v53 }
 0x414   : > { %v2206_v42 = vpop.f32.mrf.mxu2 }
 0x415   : > { %v2302_v2 = vsel %vm2265_vm0, %v2206_v42, -inf  ;;  %v2253_v3 = vsel %vm2216_vm1, %v2206_v42, -inf }
 0x416   : > { %2303 = vmax.xlane.f32.xlu1 %v2302_v2  ;;  %v3109_v2 = vpop.eup %3108 }
 0x41c   : > { %v2208_v10 = vpop.f32.mrf.mxu2 }
 0x41d   : > { %v2256_v13 = vsel %vm2216_vm1, %v2208_v10, -inf  ;;  %v2305_v51 = vsel %vm2265_vm0, %v2208_v10, -inf }
 0x41e   : > { %2257 = vmax.xlane.f32.xlu1 %v2256_v13 }
 0x449   : > { %v2231_v37 = vpop.xlane.xlu1 %2230 }
 0x459   : > { %v2286_v46 = vpop.xlane.xlu1 %2285 }
 0x45f   : > { %v2211_v58 = vpop.f32.mrf.mxu3 }
 0x460   : > { %v2259_v25 = vsel %vm2216_vm1, %v2211_v58, -inf  ;;  %v2308_v35 = vsel %vm2265_vm0, %v2211_v58, -inf }
 0x461   : > { %2260 = vmax.xlane.f32.xlu2 %v2259_v25  ;;  %v2240_v16 = vpop.xlane.xlu1 %2239 }
 0x467   : > { %v2213_v12 = vpop.f32.mrf.mxu3 }
 0x468   : > { %v2262_v28 = vsel %vm2216_vm1, %v2213_v12, -inf  ;;  %v2311_v8 = vsel %vm2265_vm0, %v2213_v12, -inf  ;;  %vm2385_vm0 = vweird.f32 %v3109_v2 }
 0x469   : > { %2263 = vmax.xlane.f32.xlu0 %v2262_v28  ;;  %2279 = vmax.xlane.f32.xlu2 %v2278_v27  ;;  %v2381_v28 = vmul.f32 2.0, %v3109_v2 }
 0x46a   : > { %2312 = vmax.xlane.f32.xlu1 %v2311_v8 }
 0x46b   : > { %v2382_v27 = vsub.f32 1.0, %v2381_v28 }
 0x471   : > { %2282 = vmax.xlane.f32.xlu0 %v2281_v22  ;;  %2233 = vmax.xlane.f32.xlu2 %v2232_v17  ;;  %v2295_v45 = vpop.xlane.xlu1 %2294 }
 0x472   : > { %2339 = vadd.xlane.f32.xlu1 %v2338_v62  ;;  %v2383_v62 = vmul.f32 %v3109_v2, %v2382_v27 }
 0x479   : > { %2236 = vmax.xlane.f32.xlu0 %v2235_v57  ;;  %2288 = vmax.xlane.f32.xlu2 %v2287_v15  ;;  %v2249_v29 = vpop.xlane.xlu1 %2248  ;;  %v2384_v57 = vadd.f32 %v3109_v2, %v2383_v62 }
 0x481   : > { %2291 = vmax.xlane.f32.xlu0 %v2290_v61  ;;  %2242 = vmax.xlane.f32.xlu2 %v2241_v18 }
 0x489   : > { %2245 = vmax.xlane.f32.xlu0 %v2244_v32  ;;  %2297 = vmax.xlane.f32.xlu2 %v2296_v4  ;;  %v2304_v54 = vpop.xlane.xlu1 %2303 }
 0x491   : > { %2300 = vmax.xlane.f32.xlu0 %v2299_v34  ;;  %2251 = vmax.xlane.f32.xlu2 %v2250_v41  ;;  %v2258_v58 = vpop.xlane.xlu1 %2257  ;;  %v4542_v34 = vsel %vm2385_vm0, %v3109_v2, %v2384_v57 }
 0x499   : > { %2254 = vmax.xlane.f32.xlu0 %v2253_v3  ;;  %2306 = vmax.xlane.f32.xlu2 %v2305_v51 }
 0x4a1   : > { %2309 = vmax.xlane.f32.xlu0 %v2308_v35  ;;  %2333 = vadd.xlane.f32.xlu2 %v2332_v20 }
 0x4a9   : > { %2336 = vadd.xlane.f32.xlu0 %v2335_v30  ;;  %2342 = vadd.xlane.f32.xlu2 %v2341_v9 }
 0x4d4   : > { %v4490_v11 = vpop.xlane.xlu2 %2260 }
 0x4dc   : > { %v2280_v14 = vpop.xlane.xlu2 %2279  ;;  %v2264_v47 = vpop.xlane.xlu0 %2263 }
 0x4dd   : > { %v4493_v40 = vsel %vm2314_vm2, %v2231_v37, %v2280_v14  ;;  %v2313_v56 = vpop.xlane.xlu1 %2312 }
 0x4de   : > { %v2344_v6 = vsel %vm2331_vm14, %v4493_v40, 0.0  ;;  %v4546_v51 = vsel %vm2314_vm2, %v2264_v47, %v2313_v56 }
 0x4df   : > { %2345 = vadd.xlane.f32.xlu0 %v2344_v6  ;;  %v2377_v30 = vsel %vm2331_vm14, %v4546_v51, 0.0 }
 0x4e4   : > { %v2234_v21 = vpop.xlane.xlu2 %2233  ;;  %v2283_v50 = vpop.xlane.xlu0 %2282 }
 0x4e5   : > { %v4498_v38 = vsel %vm2314_vm2, %v2234_v21, %v2283_v50  ;;  %v2340_v41 = vpop.xlane.xlu1 %2339 }
 0x4e6   : > { %v2347_v52 = vsel %vm2331_vm14, %v4498_v38, 0.0  ;;  %v2389_v3 = vmul.f32 %v4542_v34, %v2340_v41 }
 0x4e7   : > { %2348 = vadd.xlane.f32.xlu1 %v2347_v52 }
 0x4e8   : > { %v4554_v33 = vsub.f32 %v4458_v5, %v2389_v3 }
 0x4ec   : > { %v2289_v7 = vpop.xlane.xlu2 %2288  ;;  %v2237_v1 = vpop.xlane.xlu0 %2236 }
 0x4ed   : > { %v4503_v59 = vsel %vm2314_vm2, %v2240_v16, %v2289_v7  ;;  %v4506_v49 = vsel %vm2314_vm2, %v2237_v1, %v2286_v46 }
 0x4ee   : > { %v2353_v43 = vsel %vm2331_vm14, %v4503_v59, 0.0  ;;  %v2350_v48 = vsel %vm2331_vm14, %v4506_v49, 0.0 }
 0x4ef   : > { %2354 = vadd.xlane.f32.xlu0 %v2353_v43  ;;  %2351 = vadd.xlane.f32.xlu2 %v2350_v48 }
 0x4f4   : > { %v2243_v26 = vpop.xlane.xlu2 %2242  ;;  %v2292_v24 = vpop.xlane.xlu0 %2291 }
 0x4f5   : > { %v4513_v60 = vsel %vm2314_vm2, %v2243_v26, %v2292_v24 }
 0x4f6   : > { %v2356_v42 = vsel %vm2331_vm14, %v4513_v60, 0.0 }
 0x4f7   : > { %2357 = vadd.xlane.f32.xlu1 %v2356_v42 }
 0x4fc   : > { %v2298_v10 = vpop.xlane.xlu2 %2297  ;;  %v2246_v13 = vpop.xlane.xlu0 %2245 }
 0x4fd   : > { %v4518_v25 = vsel %vm2314_vm2, %v2249_v29, %v2298_v10  ;;  %v4521_v55 = vsel %vm2314_vm2, %v2246_v13, %v2295_v45 }
 0x4fe   : > { %v2362_v31 = vsel %vm2331_vm14, %v4518_v25, 0.0  ;;  %v2359_v12 = vsel %vm2331_vm14, %v4521_v55, 0.0 }
 0x4ff   : > { %2363 = vadd.xlane.f32.xlu0 %v2362_v31  ;;  %2360 = vadd.xlane.f32.xlu2 %v2359_v12 }
 0x504   : > { %v2252_v8 = vpop.xlane.xlu2 %2251  ;;  %v2301_v36 = vpop.xlane.xlu0 %2300 }
 0x505   : > { %v4528_v22 = vsel %vm2314_vm2, %v2252_v8, %v2301_v36 }
 0x506   : > { %v2365_v17 = vsel %vm2331_vm14, %v4528_v22, 0.0 }
 0x507   : > { %2366 = vadd.xlane.f32.xlu1 %v2365_v17 }
 0x50c   : > { %v2307_v15 = vpop.xlane.xlu2 %2306  ;;  %v2255_v61 = vpop.xlane.xlu0 %2254 }
 0x50d   : > { %v4533_v18 = vsel %vm2314_vm2, %v2258_v58, %v2307_v15  ;;  %v4536_v32 = vsel %vm2314_vm2, %v2255_v61, %v2304_v54 }
 0x50e   : > { %v2371_v4 = vsel %vm2331_vm14, %v4533_v18, 0.0  ;;  %v2368_v63 = vsel %vm2331_vm14, %v4536_v32, 0.0 }
 0x50f   : > { %2372 = vadd.xlane.f32.xlu0 %v2371_v4  ;;  %2369 = vadd.xlane.f32.xlu2 %v2368_v63 }
 0x514   : > { %v2334_v44 = vpop.xlane.xlu2 %2333  ;;  %v2310_v35 = vpop.xlane.xlu0 %2309 }
 0x515   : > { %v2387_v20 = vmul.f32 %v4542_v34, %v2334_v44  ;;  %v4551_v0 = vsel %vm2314_vm2, %v4490_v11, %v2310_v35  ;;  %v2421_v11 = vmul.f32 %v4554_v33, %v4554_v33 }
 0x516   : > { %v2374_v9 = vsel %vm2331_vm14, %v4551_v0, 0.0 }
 0x517   : > { %v4561_v37 = vsub.f32 %v4475_v23, %v2387_v20  ;;  %2378 = vadd.xlane.f32.xlu2 %v2377_v30  ;;  %2375 = vadd.xlane.f32.xlu1 %v2374_v9  ;;  %v2441_v23 = vsel %vm2331_vm14, %v2421_v11, 0.0 }
 0x519   : > { %v2419_v46 = vmul.f32 %v4561_v37, %v4561_v37 }
 0x51b   : > { %v2435_v5 = vsel %vm2331_vm14, %v2419_v46, 0.0 }
 0x51c   : > { %2436 = vadd.xlane.f32.xlu0 %v2435_v5  ;;  %v2343_v16 = vpop.xlane.xlu2 %2342  ;;  %v2337_v14 = vpop.xlane.xlu0 %2336 }
 0x51d   : > { %v2390_v47 = vmul.f32 %v4542_v34, %v2343_v16  ;;  %v2388_v6 = vmul.f32 %v4542_v34, %v2337_v14 }
 0x51f   : > { %v4572_v45 = vsub.f32 %v4484_v19, %v2390_v47  ;;  %v4575_v21 = vsub.f32 %v4481_v39, %v2388_v6  ;;  %2442 = vadd.xlane.f32.xlu2 %v2441_v23 }
 0x521   : > { %v2422_v50 = vmul.f32 %v4572_v45, %v4572_v45  ;;  %v2420_v52 = vmul.f32 %v4575_v21, %v4575_v21 }
 0x523   : > { %v2444_v29 = vsel %vm2331_vm14, %v2422_v50, 0.0  ;;  %v2438_v7 = vsel %vm2331_vm14, %v2420_v52, 0.0 }
 0x524   : > { %2445 = vadd.xlane.f32.xlu0 %v2444_v29  ;;  %2439 = vadd.xlane.f32.xlu1 %v2438_v7 }
 0x552   : > { %v2346_v1 = vpop.xlane.xlu0 %2345 }
 0x553   : > { %v2391_v19 = vmul.f32 %v4542_v34, %v2346_v1 }
 0x555   : > { %v4585_v43 = vsub.f32 %v4493_v40, %v2391_v19 }
 0x557   : > { %v2423_v39 = vmul.f32 %v4585_v43, %v4585_v43 }
 0x559   : > { %v2447_v48 = vsel %vm2331_vm14, %v2423_v39, 0.0 }
 0x55a   : > { %v2349_v54 = vpop.xlane.xlu1 %2348  ;;  %2448 = vadd.xlane.f32.xlu1 %v2447_v48 }
 0x55b   : > { %v2392_v26 = vmul.f32 %v4542_v34, %v2349_v54 }
 0x55d   : > { %v4592_v24 = vsub.f32 %v4498_v38, %v2392_v26 }
 0x55f   : > { %v2424_v53 = vmul.f32 %v4592_v24, %v4592_v24 }
 0x561   : > { %v2450_v42 = vsel %vm2331_vm14, %v2424_v53, 0.0 }
 0x562   : > { %v2352_v2 = vpop.xlane.xlu2 %2351  ;;  %2451 = vadd.xlane.f32.xlu2 %v2450_v42  ;;  %v2355_v40 = vpop.xlane.xlu0 %2354 }
 0x563   : > { %v2393_v10 = vmul.f32 %v4542_v34, %v2352_v2  ;;  %v2394_v13 = vmul.f32 %v4542_v34, %v2355_v40 }
 0x565   : > { %v4600_v58 = vsub.f32 %v4506_v49, %v2393_v10  ;;  %v4603_v31 = vsub.f32 %v4503_v59, %v2394_v13 }
 0x567   : > { %v2425_v38 = vmul.f32 %v4600_v58, %v4600_v58  ;;  %v2426_v12 = vmul.f32 %v4603_v31, %v4603_v31 }
 0x569   : > { %v2453_v28 = vsel %vm2331_vm14, %v2425_v38, 0.0  ;;  %v2456_v27 = vsel %vm2331_vm14, %v2426_v12, 0.0 }
 0x56a   : > { %2454 = vadd.xlane.f32.xlu0 %v2453_v28  ;;  %v2358_v8 = vpop.xlane.xlu1 %2357  ;;  %2457 = vadd.xlane.f32.xlu1 %v2456_v27 }
 0x56b   : > { %v2395_v36 = vmul.f32 %v4542_v34, %v2358_v8 }
 0x56d   : > { %v4613_v49 = vsub.f32 %v4513_v60, %v2395_v36 }
 0x56f   : > { %v2427_v59 = vmul.f32 %v4613_v49, %v4613_v49 }
 0x571   : > { %v2459_v56 = vsel %vm2331_vm14, %v2427_v59, 0.0 }
 0x572   : > { %v2361_v17 = vpop.xlane.xlu2 %2360  ;;  %2460 = vadd.xlane.f32.xlu2 %v2459_v56  ;;  %v2364_v62 = vpop.xlane.xlu0 %2363 }
 0x573   : > { %v2396_v57 = vmul.f32 %v4542_v34, %v2361_v17  ;;  %v2397_v15 = vmul.f32 %v4542_v34, %v2364_v62 }
 0x575   : > { %v4621_v61 = vsub.f32 %v4521_v55, %v2396_v57  ;;  %v4624_v4 = vsub.f32 %v4518_v25, %v2397_v15 }
 0x577   : > { %v2428_v60 = vmul.f32 %v4621_v61, %v4621_v61  ;;  %v2429_v63 = vmul.f32 %v4624_v4, %v4624_v4 }
 0x579   : > { %v2462_v41 = vsel %vm2331_vm14, %v2428_v60, 0.0  ;;  %v2465_v3 = vsel %vm2331_vm14, %v2429_v63, 0.0 }
 0x57a   : > { %2463 = vadd.xlane.f32.xlu0 %v2462_v41  ;;  %v2367_v44 = vpop.xlane.xlu1 %2366  ;;  %2466 = vadd.xlane.f32.xlu1 %v2465_v3  ;;  %v4676_v41 = vld [vmem:[%s4818_s6] ss:$0 sm:$0xff] }
 0x57b   : > { %v2398_v35 = vmul.f32 %v4542_v34, %v2367_v44 }
 0x57d   : > { %v4634_v55 = vsub.f32 %v4528_v22, %v2398_v35 }
 0x57f   : > { %v2430_v25 = vmul.f32 %v4634_v55, %v4634_v55 }
 0x581   : > { %v2468_v20 = vsel %vm2331_vm14, %v2430_v25, 0.0 }
 0x582   : > { %2469 = vadd.xlane.f32.xlu2 %v2468_v20  ;;  %v2370_v30 = vpop.xlane.xlu2 %2369  ;;  %v2373_v9 = vpop.xlane.xlu0 %2372  ;;  %v4681_v20 = vld [vmem:[%s4818_s6 + $0x1] ss:$0 sm:$0xff] }
 0x583   : > { %v2399_v46 = vmul.f32 %v4542_v34, %v2370_v30  ;;  %v2400_v11 = vmul.f32 %v4542_v34, %v2373_v9 }
 0x585   : > { %v4642_v5 = vsub.f32 %v4536_v32, %v2399_v46  ;;  %v4645_v16 = vsub.f32 %v4533_v18, %v2400_v11 }
 0x587   : > { %v2431_v22 = vmul.f32 %v4642_v5, %v4642_v5  ;;  %v2432_v14 = vmul.f32 %v4645_v16, %v4645_v16 }
 0x589   : > { %v2471_v47 = vsel %vm2331_vm14, %v2431_v22, 0.0  ;;  %v2474_v6 = vsel %vm2331_vm14, %v2432_v14, 0.0 }
 0x58a   : > { %2472 = vadd.xlane.f32.xlu0 %v2471_v47  ;;  %v2379_v23 = vpop.xlane.xlu2 %2378  ;;  %v2376_v50 = vpop.xlane.xlu1 %2375  ;;  %2475 = vadd.xlane.f32.xlu1 %v2474_v6 }
 0x58b   : > { %v2402_v32 = vmul.f32 %v4542_v34, %v2379_v23  ;;  %v2401_v52 = vmul.f32 %v4542_v34, %v2376_v50 }
 0x58d   : > { %v4656_v18 = vsub.f32 %v4546_v51, %v2402_v32  ;;  %v4659_v29 = vsub.f32 %v4551_v0, %v2401_v52 }
 0x58f   : > { %v2437_v7 = vpop.xlane.xlu0 %2436  ;;  %v2434_v1 = vmul.f32 %v4656_v18, %v4656_v18  ;;  %v2433_v19 = vmul.f32 %v4659_v29, %v4659_v29 }
 0x590   : > { %v2483_v39 = vmul.f32 %v2437_v7, %v4542_v34 }
 0x591   : > { %v2480_v48 = vsel %vm2331_vm14, %v2434_v1, 0.0  ;;  %v2477_v54 = vsel %vm2331_vm14, %v2433_v19, 0.0 }
 0x592   : > { %v2499_v26 = vadd.f32 1e-05, %v2483_v39  ;;  %2481 = vadd.xlane.f32.xlu0 %v2480_v48  ;;  %v2443_v51 = vpop.xlane.xlu2 %2442  ;;  %2478 = vadd.xlane.f32.xlu2 %v2477_v54 }
 0x593   : > { %v2485_v0 = vmul.f32 %v2443_v51, %v4542_v34 }
 0x594   : > { %3110 = vrsqrt.f32 %v2499_v26  ;;  %vm2521_vm15 = vweird.f32 %v2499_v26 }
 0x595   : > { %v2501_v53 = vadd.f32 1e-05, %v2485_v0 }
 0x597   : > { %3112 = vrsqrt.f32 %v2501_v53  ;;  %v2440_v42 = vpop.xlane.xlu1 %2439  ;;  %v2446_v2 = vpop.xlane.xlu0 %2445  ;;  %vm2541_vm5 = vweird.f32 %v2501_v53 }
 0x598   : > { %v2484_v40 = vmul.f32 %v2440_v42, %v4542_v34  ;;  %v2486_v10 = vmul.f32 %v2446_v2, %v4542_v34 }
 0x59a   : > { %v3111_v13 = vpop.eup %3110  ;;  %v2500_v38 = vadd.f32 1e-05, %v2484_v40  ;;  %v2502_v12 = vadd.f32 1e-05, %v2486_v10 }
 0x59b   : > { %v2516_v28 = vmul.f32 %v3111_v13, %v2499_v26  ;;  %vm2522_vm1 = vweird.f32 %v3111_v13 }
 0x59c   : > { %3114 = vrsqrt.f32 %v2500_v38  ;;  %vm2523_vm3 = vmor %vm2521_vm15, %vm2522_vm1  ;;  %vm2531_vm9 = vweird.f32 %v2500_v38  ;;  %vm2551_vm11 = vweird.f32 %v2502_v12 }
 0x59d   : > { %v3113_v27 = vpop.eup %3112  ;;  %v2517_v8 = vmul.f32 %v3111_v13, %v2516_v28  ;;  %3116 = vrsqrt.f32 %v2502_v12 }
 0x59e   : > { %v2536_v36 = vmul.f32 %v3113_v27, %v2501_v53  ;;  %vm2542_vm4 = vweird.f32 %v3113_v27 }
 0x59f   : > { %v2518_v59 = vmul.f32 0.5, %v2517_v8  ;;  %vm2543_vm6 = vmor %vm2541_vm5, %vm2542_vm4 }
 0x5a0   : > { %v2537_v56 = vmul.f32 %v3113_v27, %v2536_v36 }
 0x5a1   : > { %v2519_v17 = vsub.f32 1.5, %v2518_v59 }
 0x5a2   : > { %v3115_v62 = vpop.eup %3114  ;;  %v2538_v57 = vmul.f32 0.5, %v2537_v56 }
 0x5a3   : > { %v3117_v15 = vpop.eup %3116  ;;  %v2520_v60 = vmul.f32 %v3111_v13, %v2519_v17  ;;  %v2526_v63 = vmul.f32 %v3115_v62, %v2500_v38  ;;  %vm2532_vm7 = vweird.f32 %v3115_v62 }
 0x5a4   : > { %v2539_v3 = vsub.f32 1.5, %v2538_v57  ;;  %v2546_v44 = vmul.f32 %v3117_v15, %v2502_v12  ;;  %vm2552_vm8 = vweird.f32 %v3117_v15  ;;  %vm2533_vm10 = vmor %vm2531_vm9, %vm2532_vm7 }
 0x5a5   : > { %v2524_v35 = vsel %vm2523_vm3, %v3111_v13, %v2520_v60  ;;  %v2527_v25 = vmul.f32 %v3115_v62, %v2526_v63  ;;  %vm2553_vm12 = vmor %vm2551_vm11, %vm2552_vm8 }
 0x5a6   : > { %v2675_v30 = vmul.f32 %v2524_v35, %v4561_v37  ;;  %v2540_v9 = vmul.f32 %v3113_v27, %v2539_v3  ;;  %v2547_v46 = vmul.f32 %v3117_v15, %v2546_v44 }
 0x5a7   : > { %v2528_v11 = vmul.f32 0.5, %v2527_v25 }
 0x5a8   : > { %v2693_v22 = vmul.f32 %v4676_v41, %v2675_v30  ;;  %v2544_v14 = vsel %vm2543_vm6, %v3113_v27, %v2540_v9  ;;  %v2548_v47 = vmul.f32 0.5, %v2547_v46 }
 0x5a9   : > { %v2677_v6 = vmul.f32 %v2544_v14, %v4554_v33  ;;  %v2529_v23 = vsub.f32 1.5, %v2528_v11 }
 0x5aa   : > { %v2711_v37 = vadd.f32 %v4681_v20, %v2693_v22  ;;  %v2549_v50 = vsub.f32 1.5, %v2548_v47 }
 0x5ab   : > { %v2695_v32 = vmul.f32 %v4676_v41, %v2677_v6  ;;  %v2530_v52 = vmul.f32 %v3115_v62, %v2529_v23 }
 0x5ac   : > { %2727 = vst.msk [vmem:[%s4688_s22] sm:$0xff] %vm2331_vm14, %v2711_v37  ;;  %v2550_v7 = vmul.f32 %v3117_v15, %v2549_v50 }
 0x5ad   : > { %v2713_v33 = vadd.f32 %v4681_v20, %v2695_v32  ;;  %v2534_v1 = vsel %vm2533_vm10, %v3115_v62, %v2530_v52 }
 0x5ae   : > { %v2676_v19 = vmul.f32 %v2534_v1, %v4575_v21  ;;  %v2554_v39 = vsel %vm2553_vm12, %v3117_v15, %v2550_v7 }
 0x5af   : > { %2729 = vst.msk [vmem:[%s4688_s22 + $0x10] sm:$0xff] %vm2331_vm14, %v2713_v33  ;;  %v2678_v48 = vmul.f32 %v2554_v39, %v4572_v45 }
 0x5b0   : > { %v2694_v54 = vmul.f32 %v4676_v41, %v2676_v19 }
 0x5b1   : > { %v2696_v26 = vmul.f32 %v4676_v41, %v2678_v48 }
 0x5b2   : > { %v2712_v51 = vadd.f32 %v4681_v20, %v2694_v54 }
 0x5b3   : > { %v2714_v0 = vadd.f32 %v4681_v20, %v2696_v26 }
 0x5b4   : > { %2728 = vst.msk [vmem:[%s4688_s22 + $0x8] sm:$0xff] %vm2331_vm14, %v2712_v51 }
 0x5b5   : > { %2730 = vst.msk [vmem:[%s4688_s22 + $0x18] sm:$0xff] %vm2331_vm14, %v2714_v0 }
 0x5cd   : > { %v2449_v53 = vpop.xlane.xlu1 %2448 }
 0x5ce   : > { %v2487_v21 = vmul.f32 %v2449_v53, %v4542_v34 }
 0x5d0   : > { %v2503_v42 = vadd.f32 1e-05, %v2487_v21 }
 0x5d2   : > { %3118 = vrsqrt.f32 %v2503_v42  ;;  %vm2561_vm2 = vweird.f32 %v2503_v42 }
 0x5d5   : > { %v2452_v2 = vpop.xlane.xlu2 %2451 }
 0x5d6   : > { %v2488_v45 = vmul.f32 %v2452_v2, %v4542_v34 }
 0x5d8   : > { %v3119_v40 = vpop.eup %3118  ;;  %v2504_v10 = vadd.f32 1e-05, %v2488_v45 }
 0x5d9   : > { %v2556_v13 = vmul.f32 %v3119_v40, %v2503_v42  ;;  %vm2562_vm13 = vweird.f32 %v3119_v40 }
 0x5da   : > { %3120 = vrsqrt.f32 %v2504_v10  ;;  %vm2563_vm0 = vmor %vm2561_vm2, %vm2562_vm13  ;;  %vm2571_vm15 = vweird.f32 %v2504_v10 }
 0x5db   : > { %v2557_v38 = vmul.f32 %v3119_v40, %v2556_v13 }
 0x5dd   : > { %v2558_v12 = vmul.f32 0.5, %v2557_v38  ;;  %v2458_v28 = vpop.xlane.xlu1 %2457  ;;  %v2455_v27 = vpop.xlane.xlu0 %2454 }
 0x5de   : > { %v2490_v8 = vmul.f32 %v2458_v28, %v4542_v34  ;;  %v2489_v36 = vmul.f32 %v2455_v27, %v4542_v34 }
 0x5df   : > { %v2559_v59 = vsub.f32 1.5, %v2558_v12 }
 0x5e0   : > { %v3121_v56 = vpop.eup %3120  ;;  %v2506_v17 = vadd.f32 1e-05, %v2490_v8  ;;  %v2505_v62 = vadd.f32 1e-05, %v2489_v36 }
 0x5e1   : > { %v2560_v57 = vmul.f32 %v3119_v40, %v2559_v59  ;;  %v2566_v15 = vmul.f32 %v3121_v56, %v2504_v10  ;;  %vm2572_vm1 = vweird.f32 %v3121_v56 }
 0x5e2   : > { %3122 = vrsqrt.f32 %v2506_v17  ;;  %vm2573_vm3 = vmor %vm2571_vm15, %vm2572_vm1  ;;  %vm2591_vm6 = vweird.f32 %v2506_v17  ;;  %vm2581_vm8 = vweird.f32 %v2505_v62 }
 0x5e3   : > { %v2564_v60 = vsel %vm2563_vm0, %v3119_v40, %v2560_v57  ;;  %v2567_v63 = vmul.f32 %v3121_v56, %v2566_v15  ;;  %3124 = vrsqrt.f32 %v2505_v62 }
 0x5e4   : > { %v2679_v3 = vmul.f32 %v2564_v60, %v4585_v43 }
 0x5e5   : > { %v2568_v44 = vmul.f32 0.5, %v2567_v63  ;;  %v2461_v35 = vpop.xlane.xlu2 %2460 }
 0x5e6   : > { %v2697_v25 = vmul.f32 %v4676_v41, %v2679_v3  ;;  %v2491_v30 = vmul.f32 %v2461_v35, %v4542_v34 }
 0x5e7   : > { %v2569_v9 = vsub.f32 1.5, %v2568_v44 }
 0x5e8   : > { %v3123_v46 = vpop.eup %3122  ;;  %v2715_v11 = vadd.f32 %v4681_v20, %v2697_v25  ;;  %v2507_v22 = vadd.f32 1e-05, %v2491_v30 }
 0x5e9   : > { %v3125_v14 = vpop.eup %3124  ;;  %v2570_v47 = vmul.f32 %v3121_v56, %v2569_v9  ;;  %v2586_v6 = vmul.f32 %v3123_v46, %v2506_v17  ;;  %vm2592_vm4 = vweird.f32 %v3123_v46 }
 0x5ea   : > { %2731 = vst.msk [vmem:[%s4688_s22 + $0x20] sm:$0xff] %vm2331_vm14, %v2715_v11  ;;  %v2576_v43 = vmul.f32 %v3125_v14, %v2505_v62  ;;  %3126 = vrsqrt.f32 %v2507_v22  ;;  %vm2582_vm5 = vweird.f32 %v3125_v14  ;;  %vm2593_vm7 = vmor %vm2591_vm6, %vm2592_vm4  ;;  %vm2601_vm11 = vweird.f32 %v2507_v22 }
 0x5eb   : > { %v2574_v23 = vsel %vm2573_vm3, %v3121_v56, %v2570_v47  ;;  %v2587_v37 = vmul.f32 %v3123_v46, %v2586_v6  ;;  %vm2583_vm9 = vmor %vm2581_vm8, %vm2582_vm5 }
 0x5ec   : > { %v2680_v50 = vmul.f32 %v2574_v23, %v4592_v24  ;;  %v2577_v32 = vmul.f32 %v3125_v14, %v2576_v43 }
 0x5ed   : > { %v2588_v52 = vmul.f32 0.5, %v2587_v37  ;;  %v2467_v7 = vpop.xlane.xlu1 %2466  ;;  %v2464_v33 = vpop.xlane.xlu0 %2463 }
 0x5ee   : > { %v2698_v1 = vmul.f32 %v4676_v41, %v2680_v50  ;;  %v2578_v19 = vmul.f32 0.5, %v2577_v32  ;;  %v2493_v39 = vmul.f32 %v2467_v7, %v4542_v34  ;;  %v2492_v48 = vmul.f32 %v2464_v33, %v4542_v34 }
 0x5ef   : > { %v2589_v54 = vsub.f32 1.5, %v2588_v52 }
 0x5f0   : > { %v3127_v26 = vpop.eup %3126  ;;  %v2716_v51 = vadd.f32 %v4681_v20, %v2698_v1  ;;  %v2579_v0 = vsub.f32 1.5, %v2578_v19  ;;  %v2509_v24 = vadd.f32 1e-05, %v2493_v39  ;;  %v4723_v53 = vadd.f32 1e-05, %v2492_v48 }
 0x5f1   : > { %v2590_v21 = vmul.f32 %v3123_v46, %v2589_v54  ;;  %v2596_v42 = vmul.f32 %v3127_v26, %v2507_v22  ;;  %vm2602_vm10 = vweird.f32 %v3127_v26 }
 0x5f2   : > { %2732 = vst.msk [vmem:[%s4688_s22 + $0x28] sm:$0xff] %vm2331_vm14, %v2716_v51  ;;  %v2580_v2 = vmul.f32 %v3125_v14, %v2579_v0  ;;  %3128 = vrsqrt.f32 %v2509_v24  ;;  %vm2603_vm12 = vmor %vm2601_vm11, %vm2602_vm10  ;;  %vm2621_vm0 = vweird.f32 %v2509_v24  ;;  %vm2611_vm15 = vweird.f32 %v4723_v53 }
 0x5f3   : > { %v2594_v45 = vsel %vm2593_vm7, %v3123_v46, %v2590_v21  ;;  %v2597_v40 = vmul.f32 %v3127_v26, %v2596_v42  ;;  %3130 = vrsqrt.f32 %v4723_v53 }
 0x5f4   : > { %v2682_v10 = vmul.f32 %v2594_v45, %v4603_v31  ;;  %v2584_v13 = vsel %vm2583_vm9, %v3125_v14, %v2580_v2 }
 0x5f5   : > { %v2681_v38 = vmul.f32 %v2584_v13, %v4600_v58  ;;  %v2598_v12 = vmul.f32 0.5, %v2597_v40  ;;  %v2470_v28 = vpop.xlane.xlu2 %2469 }
 0x5f6   : > { %v2700_v27 = vmul.f32 %v4676_v41, %v2682_v10  ;;  %v2494_v8 = vmul.f32 %v2470_v28, %v4542_v34 }
 0x5f7   : > { %v2699_v36 = vmul.f32 %v4676_v41, %v2681_v38  ;;  %v2599_v59 = vsub.f32 1.5, %v2598_v12 }
 0x5f8   : > { %v3129_v56 = vpop.eup %3128  ;;  %v2718_v17 = vadd.f32 %v4681_v20, %v2700_v27  ;;  %v4735_v62 = vadd.f32 1e-05, %v2494_v8 }
 0x5f9   : > { %v3131_v31 = vpop.eup %3130  ;;  %v2717_v58 = vadd.f32 %v4681_v20, %v2699_v36  ;;  %v2600_v57 = vmul.f32 %v3127_v26, %v2599_v59  ;;  %v2616_v15 = vmul.f32 %v3129_v56, %v2509_v24  ;;  %vm2622_vm13 = vweird.f32 %v3129_v56 }
 0x5fa   : > { %2734 = vst.msk [vmem:[%s4688_s22 + $0x38] sm:$0xff] %vm2331_vm14, %v2718_v17  ;;  %v2606_v60 = vmul.f32 %v3131_v31, %v4723_v53  ;;  %3132 = vrsqrt.f32 %v4735_v62  ;;  %vm2612_vm2 = vweird.f32 %v3131_v31  ;;  %vm2623_vm1 = vmor %vm2621_vm0, %vm2622_vm13  ;;  %vm2631_vm5 = vweird.f32 %v4735_v62 }
 0x5fb   : > { %2733 = vst.msk [vmem:[%s4688_s22 + $0x30] sm:$0xff] %vm2331_vm14, %v2717_v58  ;;  %v2604_v63 = vsel %vm2603_vm12, %v3127_v26, %v2600_v57  ;;  %v2617_v3 = vmul.f32 %v3129_v56, %v2616_v15  ;;  %vm2613_vm3 = vmor %vm2611_vm15, %vm2612_vm2 }
 0x5fc   : > { %v2683_v44 = vmul.f32 %v2604_v63, %v4613_v49  ;;  %v2607_v35 = vmul.f32 %v3131_v31, %v2606_v60 }
 0x5fd   : > { %v2618_v25 = vmul.f32 0.5, %v2617_v3  ;;  %v2476_v30 = vpop.xlane.xlu1 %2475  ;;  %v2473_v9 = vpop.xlane.xlu0 %2472 }
 0x5fe   : > { %v2701_v46 = vmul.f32 %v4676_v41, %v2683_v44  ;;  %v2608_v11 = vmul.f32 0.5, %v2607_v35  ;;  %v2496_v22 = vmul.f32 %v2476_v30, %v4542_v34  ;;  %v2495_v14 = vmul.f32 %v2473_v9, %v4542_v34 }
 0x5ff   : > { %v2619_v47 = vsub.f32 1.5, %v2618_v25 }
 0x600   : > { %v3133_v6 = vpop.eup %3132  ;;  %v2719_v43 = vadd.f32 %v4681_v20, %v2701_v46  ;;  %v2609_v23 = vsub.f32 1.5, %v2608_v11  ;;  %v2512_v49 = vadd.f32 1e-05, %v2496_v22  ;;  %v4749_v37 = vadd.f32 1e-05, %v2495_v14 }
 0x601   : > { %v2620_v50 = vmul.f32 %v3129_v56, %v2619_v47  ;;  %v2626_v32 = vmul.f32 %v3133_v6, %v4735_v62  ;;  %vm2632_vm4 = vweird.f32 %v3133_v6 }
 0x602   : > { %2735 = vst.msk [vmem:[%s4688_s22 + $0x40] sm:$0xff] %vm2331_vm14, %v2719_v43  ;;  %v2610_v52 = vmul.f32 %v3131_v31, %v2609_v23  ;;  %3134 = vrsqrt.f32 %v2512_v49  ;;  %vm2633_vm6 = vmor %vm2631_vm5, %vm2632_vm4  ;;  %vm2651_vm9 = vweird.f32 %v2512_v49  ;;  %vm2641_vm11 = vweird.f32 %v4749_v37 }
 0x603   : > { %v2624_v7 = vsel %vm2623_vm1, %v3129_v56, %v2620_v50  ;;  %v2627_v33 = vmul.f32 %v3133_v6, %v2626_v32  ;;  %3136 = vrsqrt.f32 %v4749_v37 }
 0x604   : > { %v2685_v1 = vmul.f32 %v2624_v7, %v4624_v4  ;;  %v2614_v19 = vsel %vm2613_vm3, %v3131_v31, %v2610_v52 }
 0x605   : > { %v2684_v39 = vmul.f32 %v2614_v19, %v4621_v61  ;;  %v2628_v48 = vmul.f32 0.5, %v2627_v33  ;;  %v2479_v54 = vpop.xlane.xlu2 %2478  ;;  %v2482_v26 = vpop.xlane.xlu0 %2481 }
 0x606   : > { %v2703_v51 = vmul.f32 %v4676_v41, %v2685_v1  ;;  %v2497_v0 = vmul.f32 %v2479_v54, %v4542_v34  ;;  %v2498_v24 = vmul.f32 %v2482_v26, %v4542_v34 }
 0x607   : > { %v2702_v53 = vmul.f32 %v4676_v41, %v2684_v39  ;;  %v2629_v21 = vsub.f32 1.5, %v2628_v48 }
 0x608   : > { %v3135_v42 = vpop.eup %3134  ;;  %v2721_v4 = vadd.f32 %v4681_v20, %v2703_v51  ;;  %v2513_v2 = vadd.f32 1e-05, %v2497_v0  ;;  %v2514_v61 = vadd.f32 1e-05, %v2498_v24 }
 0x609   : > { %v3137_v45 = vpop.eup %3136  ;;  %v2720_v40 = vadd.f32 %v4681_v20, %v2702_v53  ;;  %v2630_v10 = vmul.f32 %v3133_v6, %v2629_v21  ;;  %v2646_v13 = vmul.f32 %v3135_v42, %v2512_v49  ;;  %vm2652_vm7 = vweird.f32 %v3135_v42 }
 0x60a   : > { %2737 = vst.msk [vmem:[%s4688_s22 + $0x50] sm:$0xff] %vm2331_vm14, %v2721_v4  ;;  %v2636_v34 = vmul.f32 %v3137_v45, %v4749_v37  ;;  %3138 = vrsqrt.f32 %v2513_v2  ;;  %vm2642_vm8 = vweird.f32 %v3137_v45  ;;  %vm2653_vm10 = vmor %vm2651_vm9, %vm2652_vm7  ;;  %vm2661_vm0 = vweird.f32 %v2513_v2 }
 0x60b   : > { %2736 = vst.msk [vmem:[%s4688_s22 + $0x48] sm:$0xff] %vm2331_vm14, %v2720_v40  ;;  %v2634_v38 = vsel %vm2633_vm6, %v3133_v6, %v2630_v10  ;;  %v2647_v12 = vmul.f32 %v3135_v42, %v2646_v13  ;;  %3140 = vrsqrt.f32 %v2514_v61  ;;  %vm2643_vm12 = vmor %vm2641_vm11, %vm2642_vm8  ;;  %vm2671_vm15 = vweird.f32 %v2514_v61 }
 0x60c   : > { %v2686_v28 = vmul.f32 %v2634_v38, %v4634_v55  ;;  %v2637_v27 = vmul.f32 %v3137_v45, %v2636_v34 }
 0x60d   : > { %v2648_v8 = vmul.f32 0.5, %v2647_v12 }
 0x60e   : > { %v2704_v36 = vmul.f32 %v4676_v41, %v2686_v28  ;;  %v2638_v59 = vmul.f32 0.5, %v2637_v27 }
 0x60f   : > { %v2649_v56 = vsub.f32 1.5, %v2648_v8 }
 0x610   : > { %v3139_v17 = vpop.eup %3138  ;;  %v2722_v62 = vadd.f32 %v4681_v20, %v2704_v36  ;;  %v2639_v31 = vsub.f32 1.5, %v2638_v59 }
 0x611   : > { %v3141_v58 = vpop.eup %3140  ;;  %v2650_v57 = vmul.f32 %v3135_v42, %v2649_v56  ;;  %v2656_v15 = vmul.f32 %v3139_v17, %v2513_v2  ;;  %vm2662_vm13 = vweird.f32 %v3139_v17 }
 0x612   : > { %2738 = vst.msk [vmem:[%s4688_s22 + $0x58] sm:$0xff] %vm2331_vm14, %v2722_v62  ;;  %v2640_v55 = vmul.f32 %v3137_v45, %v2639_v31  ;;  %v2666_v60 = vmul.f32 %v3141_v58, %v2514_v61  ;;  %vm2672_vm2 = vweird.f32 %v3141_v58  ;;  %vm2663_vm1 = vmor %vm2661_vm0, %vm2662_vm13 }
 0x613   : > { %v2654_v63 = vsel %vm2653_vm10, %v3135_v42, %v2650_v57  ;;  %v2657_v3 = vmul.f32 %v3139_v17, %v2656_v15  ;;  %vm2673_vm3 = vmor %vm2671_vm15, %vm2672_vm2 }
 0x614   : > { %v2688_v44 = vmul.f32 %v2654_v63, %v4645_v16  ;;  %v2644_v35 = vsel %vm2643_vm12, %v3137_v45, %v2640_v55  ;;  %v2667_v25 = vmul.f32 %v3141_v58, %v2666_v60 }
 0x615   : > { %v2687_v30 = vmul.f32 %v2644_v35, %v4642_v5  ;;  %v2658_v9 = vmul.f32 0.5, %v2657_v3 }
 0x616   : > { %v2706_v46 = vmul.f32 %v4676_v41, %v2688_v44  ;;  %v2668_v11 = vmul.f32 0.5, %v2667_v25 }
 0x617   : > { %v2705_v22 = vmul.f32 %v4676_v41, %v2687_v30  ;;  %v2659_v14 = vsub.f32 1.5, %v2658_v9 }
 0x618   : > { %v2724_v47 = vadd.f32 %v4681_v20, %v2706_v46  ;;  %v2669_v6 = vsub.f32 1.5, %v2668_v11 }
 0x619   : > { %v2723_v16 = vadd.f32 %v4681_v20, %v2705_v22  ;;  %v2660_v43 = vmul.f32 %v3139_v17, %v2659_v14 }
 0x61a   : > { %2740 = vst.msk [vmem:[%s4688_s22 + $0x68] sm:$0xff] %vm2331_vm14, %v2724_v47  ;;  %v2670_v5 = vmul.f32 %v3141_v58, %v2669_v6 }
 0x61b   : > { %2739 = vst.msk [vmem:[%s4688_s22 + $0x60] sm:$0xff] %vm2331_vm14, %v2723_v16  ;;  %v2664_v23 = vsel %vm2663_vm1, %v3139_v17, %v2660_v43 }
 0x61c   : > { %v2689_v49 = vmul.f32 %v2664_v23, %v4659_v29  ;;  %v2674_v37 = vsel %vm2673_vm3, %v3141_v58, %v2670_v5 }
 0x61d   : > { %v2690_v50 = vmul.f32 %v2674_v37, %v4656_v18 }
 0x61e   : > { %v2707_v32 = vmul.f32 %v4676_v41, %v2689_v49 }
 0x61f   : > { %v2708_v52 = vmul.f32 %v4676_v41, %v2690_v50 }
 0x620   : > { %v2725_v7 = vadd.f32 %v4681_v20, %v2707_v32 }
 0x621   : > { %v2726_v33 = vadd.f32 %v4681_v20, %v2708_v52 }
 0x622   : > { %2741 = vst.msk [vmem:[%s4688_s22 + $0x70] sm:$0xff] %vm2331_vm14, %v2725_v7 }
 0x623   : > { %2742 = vst.msk [vmem:[%s4688_s22 + $0x78] sm:$0xff] %vm2331_vm14, %v2726_v33 }
 0x624 PF: > { %s17_s28 = sadd.s32 1, %s3189_s28   ;;  %s4826_s24 = smov %s3181_s26 }
 0x625   : > { %p14_p8 = scmp.ge.s32.totalorder %s17_s28, 6   ;;  %s4827_s25 = smov %s3185_s27 }
 0x626   : > { %s4828_s26 = smov %s4831_s29  ;;  %s4829_s27 = smov %s4835_s30 }
 0x627   :  { %16 = sbr.rel (!%p14_p8) target bundleno = 3 (0x3), region = 78 }

</bundles_post_ra>
